<compile_context>
chip_gen: v6e
topology: v6e:2x2x1
jax: 0.10.0
libtpu: 0.0.40
codegen_flags: <defaults>
</compile_context>

<pallas_src>
import functools

import jax
import jax.numpy as jnp
from jax.experimental import pallas as pl
from jax.experimental.pallas import tpu as pltpu


def news_encoder_kernel(x_ref, wqkv_ref, wa_ref, ba_ref, qv_ref, o_ref, *,
                        num_heads, dim_per_head):
    # x_ref: (BT, S, E) embedded words for a tile of news items.
    BT, S, E = x_ref.shape
    Qd = wa_ref.shape[1]

    # --- MultiHeadSelfAttention -------------------------------------------
    # One fused, lane-dense projection: (BT*S, E) @ (E, 3E).
    x2 = x_ref[...].reshape(BT * S, E)
    qkv = jnp.dot(x2, wqkv_ref[...],
                  preferred_element_type=jnp.float32)        # (BT*S, 3E)
    qkv = qkv.reshape(BT, S, 3 * E)

    # 1/sqrt(dk) is already folded into the Q columns of wqkv (host-side).
    ctx_heads = []
    for h in range(num_heads):  # static Python loop, H is small (unrolled)
        lo = h * dim_per_head
        qh = qkv[:, :, lo:lo + dim_per_head]                 # (BT, S, dk)
        kh = qkv[:, :, E + lo:E + lo + dim_per_head]         # (BT, S, dk)
        vh = qkv[:, :, 2 * E + lo:2 * E + lo + dim_per_head]  # (BT, S, dk)
        scores = jnp.einsum("bqd,bkd->bqk", qh, kh,
                            preferred_element_type=jnp.float32)   # (BT, S, S)
        e = jnp.exp(scores)  # mirrors the PyTorch module (no max subtraction)
        inv = pl.reciprocal(jnp.sum(e, axis=-1, keepdims=True) + 1e-8,
                            approx=True)
        attn = e * inv
        ctx_heads.append(jnp.einsum("bqk,bkd->bqd", attn, vh,
                                    preferred_element_type=jnp.float32))
    ctx = jnp.concatenate(ctx_heads, axis=-1)                # (BT, S, E)

    # --- AdditiveAttention --------------------------------------------------
    temp = jnp.tanh(
        jnp.dot(ctx.reshape(BT * S, E), wa_ref[...],
                preferred_element_type=jnp.float32).reshape(BT, S, Qd)
        + ba_ref[...])                                       # (BT, S, Qd)

    # Logits via VPU multiply + lane reduce (avoids an N=1 MXU matmul).
    logits = jnp.sum(temp * qv_ref[...], axis=-1, keepdims=True)  # (BT, S, 1)
    logits = logits - jnp.max(logits, axis=1, keepdims=True)
    w = jnp.exp(logits)
    w = w * pl.reciprocal(jnp.sum(w, axis=1, keepdims=True), approx=True)

    # Weighted sum over the sequence via broadcast-multiply + reduce.
    out = jnp.sum(w * ctx, axis=1)                           # (BT, E)
    o_ref[...] = out.astype(o_ref.dtype)


def _round_up(a, m):
    return ((a + m - 1) // m) * m


def news_encoder_pallas(word_vecs, wq, wk, wv, wa, ba, qv, *,
                        num_heads, dim_per_head, block_b=256):
    B, S, E = word_vecs.shape
    Qd = wa.shape[1]

    # Fuse Q/K/V into one lane-dense (E, 3E) weight; fold 1/sqrt(dk) into Q.
    scale = 1.0 / (dim_per_head ** 0.5)
    wqkv = jnp.concatenate([wq * scale, wk, wv], axis=1)     # (E, 3E)

    # Batch tile: as large as requested, multiple of 8 sublanes. Pad the batch
    # with zero rows (they produce finite outputs and are sliced off below).
    bt = min(block_b, _round_up(B, 8))
    b_pad = _round_up(B, bt)
    if b_pad != B:
        word_vecs = jnp.pad(word_vecs,
                            ((0, b_pad - B), (0, 0), (0, 0)))

    kernel = functools.partial(news_encoder_kernel,
                               num_heads=num_heads,
                               dim_per_head=dim_per_head)
    out = pl.pallas_call(
        kernel,
        out_shape=jax.ShapeDtypeStruct((b_pad, E), jnp.float32),
        grid_spec=pl.GridSpec(
            grid=(b_pad // bt,),
            in_specs=[
                pl.BlockSpec((bt, S, E), lambda b: (b, 0, 0)),   # embedded words
                pl.BlockSpec((E, 3 * E), lambda b: (0, 0)),      # fused Wq|Wk|Wv
                pl.BlockSpec((E, Qd), lambda b: (0, 0)),         # additive W
                pl.BlockSpec((1, Qd), lambda b: (0, 0)),         # additive bias
                pl.BlockSpec((1, Qd), lambda b: (0, 0)),         # query vector
            ],
            out_specs=pl.BlockSpec((bt, E), lambda b: (b, 0)),
        ),
        compiler_params=pltpu.CompilerParams(
            dimension_semantics=("parallel",)),
    )(word_vecs, wqkv, wa, ba, qv)
    return out[:B]


def news_encoder_ref(word_vecs, wq, wk, wv, wa, ba, qv, *,
                     num_heads, dim_per_head):
    """Pure-JAX reference mirroring the PyTorch forward (eval mode)."""
    B, S, E = word_vecs.shape
    q = word_vecs @ wq
    k = word_vecs @ wk
    v = word_vecs @ wv

    def split(t):  # (B, S, E) -> (B, H, S, dk)
        return t.reshape(B, S, num_heads, dim_per_head).transpose(0, 2, 1, 3)

    qh, kh, vh = split(q), split(k), split(v)
    scores = jnp.einsum("bhqd,bhkd->bhqk", qh, kh) / jnp.sqrt(
        jnp.float32(dim_per_head))
    e = jnp.exp(scores)
    attn = e / (jnp.sum(e, axis=-1, keepdims=True) + 1e-8)
    ctx = jnp.einsum("bhqk,bhkd->bhqd", attn, vh)
    ctx = ctx.transpose(0, 2, 1, 3).reshape(B, S, E)

    temp = jnp.tanh(ctx @ wa + ba)            # (B, S, Qd)
    logits = temp @ qv.reshape(-1)            # (B, S)
    w = jax.nn.softmax(logits, axis=1)
    return jnp.einsum("bs,bse->be", w, ctx)


if __name__ == "__main__":
    # Small config consistent with the module.
    VOCAB = 100
    BATCH = 10               # not a multiple of the batch tile -> tests padding
    SEQ = 16                 # word_num_per_news
    EMB = 32                 # embedding_size
    HEADS = 4                # num_attention_heads
    DK = EMB // HEADS        # dim_per_head
    QDIM = 32                # news_query_vector_dim

    key = jax.random.PRNGKey(0)
    keys = jax.random.split(key, 8)

    # Deterministic parameter init (synthetic, not a checkpoint).
    emb_table = jax.random.normal(keys[0], (VOCAB, EMB), jnp.float32) * 0.1
    wq = jax.random.normal(keys[1], (EMB, HEADS * DK), jnp.float32) * 0.1
    wk = jax.random.normal(keys[2], (EMB, HEADS * DK), jnp.float32) * 0.1
    wv = jax.random.normal(keys[3], (EMB, HEADS * DK), jnp.float32) * 0.1
    wa = jax.random.normal(keys[4], (EMB, QDIM), jnp.float32) * 0.1
    ba = jax.random.normal(keys[5], (1, QDIM), jnp.float32) * 0.1
    qv = jax.random.uniform(keys[6], (1, QDIM), jnp.float32, -0.1, 0.1)

    # Token ids (tokenization already done, per the docstring).
    tokens = jax.random.randint(keys[7], (BATCH, SEQ), 0, VOCAB)

    # Word embedding lookup (glue); dropout is identity in eval mode.
    word_vecs = jnp.take(emb_table, tokens, axis=0)  # (B, S, E)

    out = news_encoder_pallas(word_vecs, wq, wk, wv, wa, ba, qv,
                              num_heads=HEADS, dim_per_head=DK,
                              block_b=8)             # 8-item tiles -> grid=(2,)
    out = jax.block_until_ready(out)

    ref = news_encoder_ref(word_vecs, wq, wk, wv, wa, ba, qv,
                           num_heads=HEADS, dim_per_head=DK)
    assert out.shape == (BATCH, EMB)
    # Slightly relaxed tolerance: the kernel uses the EUP approximate
    # reciprocal for the softmax normalizations.
    assert jnp.allclose(out, ref, rtol=1e-3, atol=1e-3), "mismatch vs reference"
    print("KERNEL_OK")
</pallas_src>

<mosaic_0001>
module attributes {stable_mosaic.version = 11 : i64} {
  func.func @news_encoder_kernel(%arg0: i32, %arg1: memref<8x16x32xf32, #tpu.memory_space<vmem>>, %arg2: memref<32x96xf32, #tpu.memory_space<vmem>>, %arg3: memref<32x32xf32, #tpu.memory_space<vmem>>, %arg4: memref<1x32xf32, #tpu.memory_space<vmem>>, %arg5: memref<1x32xf32, #tpu.memory_space<vmem>>, %arg6: memref<8x32xf32, #tpu.memory_space<vmem>>) attributes {dimension_semantics = [#tpu.dimension_semantics<parallel>], iteration_bounds = array<i64: 2>, scalar_prefetch = 0 : i64, scratch_operands = 0 : i64, tpu.core_type = #tpu.core_type<tc>, window_params = [{transform_indices = @transform_0, window_bounds = array<i64: 8, 16, 32>}, {pipeline_mode = #tpu.pipeline_mode<synchronous>, transform_indices = @transform_1, window_bounds = array<i64: 32, 96>}, {pipeline_mode = #tpu.pipeline_mode<synchronous>, transform_indices = @transform_2, window_bounds = array<i64: 32, 32>}, {pipeline_mode = #tpu.pipeline_mode<synchronous>, transform_indices = @transform_3, window_bounds = array<i64: 1, 32>}, {pipeline_mode = #tpu.pipeline_mode<synchronous>, transform_indices = @transform_4, window_bounds = array<i64: 1, 32>}, {transform_indices = @transform_5, window_bounds = array<i64: 8, 32>}]} {
    %c0 = arith.constant 0 : index
    %c0_0 = arith.constant 0 : index
    %c0_1 = arith.constant 0 : index
    %0 = vector.load %arg1[%c0, %c0_0, %c0_1] : memref<8x16x32xf32, #tpu.memory_space<vmem>>, vector<8x16x32xf32>
    %1 = vector.shape_cast %0 : vector<8x16x32xf32> to vector<128x32xf32>
    %c0_2 = arith.constant 0 : index
    %c0_3 = arith.constant 0 : index
    %2 = vector.load %arg2[%c0_2, %c0_3] : memref<32x96xf32, #tpu.memory_space<vmem>>, vector<32x96xf32>
    %cst = arith.constant dense<0.000000e+00> : vector<128x96xf32>
    %3 = tpu.matmul %1, %2, %cst {dimension_numbers = #tpu.dot_dimension_numbers<[1], [0], [0], [1], [0, 0, 1, 1], [], []>} : vector<128x32xf32>, vector<32x96xf32>, vector<128x96xf32> -> vector<128x96xf32>
    %4 = vector.shape_cast %3 : vector<128x96xf32> to vector<8x16x96xf32>
    %5 = vector.extract_strided_slice %4 {offsets = [0, 0, 0], sizes = [8, 16, 8], strides = [1, 1, 1]} : vector<8x16x96xf32> to vector<8x16x8xf32>
    %6 = vector.extract_strided_slice %4 {offsets = [0, 0, 32], sizes = [8, 16, 8], strides = [1, 1, 1]} : vector<8x16x96xf32> to vector<8x16x8xf32>
    %7 = vector.extract_strided_slice %4 {offsets = [0, 0, 64], sizes = [8, 16, 8], strides = [1, 1, 1]} : vector<8x16x96xf32> to vector<8x16x8xf32>
    "tpu.trace_start"() <{level = 10 : i32, message = "bqd,bkd->bqk"}> : () -> ()
    %cst_4 = arith.constant dense<0.000000e+00> : vector<8x16x16xf32>
    %8 = tpu.matmul %5, %6, %cst_4 {dimension_numbers = #tpu.dot_dimension_numbers<[2], [2], [1], [1], [0, 0, 0, 1, 1, 1], [0], [0]>} : vector<8x16x8xf32>, vector<8x16x8xf32>, vector<8x16x16xf32> -> vector<8x16x16xf32>
    "tpu.trace_stop"() : () -> ()
    %9 = math.exp %8 : vector<8x16x16xf32>
    %cst_5 = arith.constant dense<0.000000e+00> : vector<8x16xf32>
    %10 = vector.multi_reduction <add>, %9, %cst_5 [2] : vector<8x16x16xf32> to vector<8x16xf32>
    %11 = vector.shape_cast %10 : vector<8x16xf32> to vector<8x16x1xf32>
    %cst_6 = arith.constant 9.99999993E-9 : f32
    %12 = vector.broadcast %cst_6 : f32 to vector<8x16x1xf32>
    %13 = arith.addf %11, %12 : vector<8x16x1xf32>
    %14 = tpu.reciprocal %13 {approx = true} : vector<8x16x1xf32> -> vector<8x16x1xf32>
    %15 = vector.broadcast %14 : vector<8x16x1xf32> to vector<8x16x16xf32>
    %16 = arith.mulf %9, %15 : vector<8x16x16xf32>
    "tpu.trace_start"() <{level = 10 : i32, message = "bqk,bkd->bqd"}> : () -> ()
    %cst_7 = arith.constant dense<0.000000e+00> : vector<8x16x8xf32>
    %17 = tpu.matmul %16, %7, %cst_7 {dimension_numbers = #tpu.dot_dimension_numbers<[2], [1], [1], [2], [0, 0, 0, 1, 1, 2], [0], [0]>} : vector<8x16x16xf32>, vector<8x16x8xf32>, vector<8x16x8xf32> -> vector<8x16x8xf32>
    "tpu.trace_stop"() : () -> ()
    %18 = vector.extract_strided_slice %4 {offsets = [0, 0, 8], sizes = [8, 16, 8], strides = [1, 1, 1]} : vector<8x16x96xf32> to vector<8x16x8xf32>
    %19 = vector.extract_strided_slice %4 {offsets = [0, 0, 40], sizes = [8, 16, 8], strides = [1, 1, 1]} : vector<8x16x96xf32> to vector<8x16x8xf32>
    %20 = vector.extract_strided_slice %4 {offsets = [0, 0, 72], sizes = [8, 16, 8], strides = [1, 1, 1]} : vector<8x16x96xf32> to vector<8x16x8xf32>
    "tpu.trace_start"() <{level = 10 : i32, message = "bqd,bkd->bqk"}> : () -> ()
    %cst_8 = arith.constant dense<0.000000e+00> : vector<8x16x16xf32>
    %21 = tpu.matmul %18, %19, %cst_8 {dimension_numbers = #tpu.dot_dimension_numbers<[2], [2], [1], [1], [0, 0, 0, 1, 1, 1], [0], [0]>} : vector<8x16x8xf32>, vector<8x16x8xf32>, vector<8x16x16xf32> -> vector<8x16x16xf32>
    "tpu.trace_stop"() : () -> ()
    %22 = math.exp %21 : vector<8x16x16xf32>
    %cst_9 = arith.constant dense<0.000000e+00> : vector<8x16xf32>
    %23 = vector.multi_reduction <add>, %22, %cst_9 [2] : vector<8x16x16xf32> to vector<8x16xf32>
    %24 = vector.shape_cast %23 : vector<8x16xf32> to vector<8x16x1xf32>
    %cst_10 = arith.constant 9.99999993E-9 : f32
    %25 = vector.broadcast %cst_10 : f32 to vector<8x16x1xf32>
    %26 = arith.addf %24, %25 : vector<8x16x1xf32>
    %27 = tpu.reciprocal %26 {approx = true} : vector<8x16x1xf32> -> vector<8x16x1xf32>
    %28 = vector.broadcast %27 : vector<8x16x1xf32> to vector<8x16x16xf32>
    %29 = arith.mulf %22, %28 : vector<8x16x16xf32>
    "tpu.trace_start"() <{level = 10 : i32, message = "bqk,bkd->bqd"}> : () -> ()
    %cst_11 = arith.constant dense<0.000000e+00> : vector<8x16x8xf32>
    %30 = tpu.matmul %29, %20, %cst_11 {dimension_numbers = #tpu.dot_dimension_numbers<[2], [1], [1], [2], [0, 0, 0, 1, 1, 2], [0], [0]>} : vector<8x16x16xf32>, vector<8x16x8xf32>, vector<8x16x8xf32> -> vector<8x16x8xf32>
    "tpu.trace_stop"() : () -> ()
    %31 = vector.extract_strided_slice %4 {offsets = [0, 0, 16], sizes = [8, 16, 8], strides = [1, 1, 1]} : vector<8x16x96xf32> to vector<8x16x8xf32>
    %32 = vector.extract_strided_slice %4 {offsets = [0, 0, 48], sizes = [8, 16, 8], strides = [1, 1, 1]} : vector<8x16x96xf32> to vector<8x16x8xf32>
    %33 = vector.extract_strided_slice %4 {offsets = [0, 0, 80], sizes = [8, 16, 8], strides = [1, 1, 1]} : vector<8x16x96xf32> to vector<8x16x8xf32>
    "tpu.trace_start"() <{level = 10 : i32, message = "bqd,bkd->bqk"}> : () -> ()
    %cst_12 = arith.constant dense<0.000000e+00> : vector<8x16x16xf32>
    %34 = tpu.matmul %31, %32, %cst_12 {dimension_numbers = #tpu.dot_dimension_numbers<[2], [2], [1], [1], [0, 0, 0, 1, 1, 1], [0], [0]>} : vector<8x16x8xf32>, vector<8x16x8xf32>, vector<8x16x16xf32> -> vector<8x16x16xf32>
    "tpu.trace_stop"() : () -> ()
    %35 = math.exp %34 : vector<8x16x16xf32>
    %cst_13 = arith.constant dense<0.000000e+00> : vector<8x16xf32>
    %36 = vector.multi_reduction <add>, %35, %cst_13 [2] : vector<8x16x16xf32> to vector<8x16xf32>
    %37 = vector.shape_cast %36 : vector<8x16xf32> to vector<8x16x1xf32>
    %cst_14 = arith.constant 9.99999993E-9 : f32
    %38 = vector.broadcast %cst_14 : f32 to vector<8x16x1xf32>
    %39 = arith.addf %37, %38 : vector<8x16x1xf32>
    %40 = tpu.reciprocal %39 {approx = true} : vector<8x16x1xf32> -> vector<8x16x1xf32>
    %41 = vector.broadcast %40 : vector<8x16x1xf32> to vector<8x16x16xf32>
    %42 = arith.mulf %35, %41 : vector<8x16x16xf32>
    "tpu.trace_start"() <{level = 10 : i32, message = "bqk,bkd->bqd"}> : () -> ()
    %cst_15 = arith.constant dense<0.000000e+00> : vector<8x16x8xf32>
    %43 = tpu.matmul %42, %33, %cst_15 {dimension_numbers = #tpu.dot_dimension_numbers<[2], [1], [1], [2], [0, 0, 0, 1, 1, 2], [0], [0]>} : vector<8x16x16xf32>, vector<8x16x8xf32>, vector<8x16x8xf32> -> vector<8x16x8xf32>
    "tpu.trace_stop"() : () -> ()
    %44 = vector.extract_strided_slice %4 {offsets = [0, 0, 24], sizes = [8, 16, 8], strides = [1, 1, 1]} : vector<8x16x96xf32> to vector<8x16x8xf32>
    %45 = vector.extract_strided_slice %4 {offsets = [0, 0, 56], sizes = [8, 16, 8], strides = [1, 1, 1]} : vector<8x16x96xf32> to vector<8x16x8xf32>
    %46 = vector.extract_strided_slice %4 {offsets = [0, 0, 88], sizes = [8, 16, 8], strides = [1, 1, 1]} : vector<8x16x96xf32> to vector<8x16x8xf32>
    "tpu.trace_start"() <{level = 10 : i32, message = "bqd,bkd->bqk"}> : () -> ()
    %cst_16 = arith.constant dense<0.000000e+00> : vector<8x16x16xf32>
    %47 = tpu.matmul %44, %45, %cst_16 {dimension_numbers = #tpu.dot_dimension_numbers<[2], [2], [1], [1], [0, 0, 0, 1, 1, 1], [0], [0]>} : vector<8x16x8xf32>, vector<8x16x8xf32>, vector<8x16x16xf32> -> vector<8x16x16xf32>
    "tpu.trace_stop"() : () -> ()
    %48 = math.exp %47 : vector<8x16x16xf32>
    %cst_17 = arith.constant dense<0.000000e+00> : vector<8x16xf32>
    %49 = vector.multi_reduction <add>, %48, %cst_17 [2] : vector<8x16x16xf32> to vector<8x16xf32>
    %50 = vector.shape_cast %49 : vector<8x16xf32> to vector<8x16x1xf32>
    %cst_18 = arith.constant 9.99999993E-9 : f32
    %51 = vector.broadcast %cst_18 : f32 to vector<8x16x1xf32>
    %52 = arith.addf %50, %51 : vector<8x16x1xf32>
    %53 = tpu.reciprocal %52 {approx = true} : vector<8x16x1xf32> -> vector<8x16x1xf32>
    %54 = vector.broadcast %53 : vector<8x16x1xf32> to vector<8x16x16xf32>
    %55 = arith.mulf %48, %54 : vector<8x16x16xf32>
    "tpu.trace_start"() <{level = 10 : i32, message = "bqk,bkd->bqd"}> : () -> ()
    %cst_19 = arith.constant dense<0.000000e+00> : vector<8x16x8xf32>
    %56 = tpu.matmul %55, %46, %cst_19 {dimension_numbers = #tpu.dot_dimension_numbers<[2], [1], [1], [2], [0, 0, 0, 1, 1, 2], [0], [0]>} : vector<8x16x16xf32>, vector<8x16x8xf32>, vector<8x16x8xf32> -> vector<8x16x8xf32>
    "tpu.trace_stop"() : () -> ()
    %57 = tpu.concatenate %17, %30, %43, %56 in 2 : vector<8x16x8xf32>, vector<8x16x8xf32>, vector<8x16x8xf32>, vector<8x16x8xf32> -> vector<8x16x32xf32>
    %58 = vector.shape_cast %57 : vector<8x16x32xf32> to vector<128x32xf32>
    %c0_20 = arith.constant 0 : index
    %c0_21 = arith.constant 0 : index
    %59 = vector.load %arg3[%c0_20, %c0_21] : memref<32x32xf32, #tpu.memory_space<vmem>>, vector<32x32xf32>
    %cst_22 = arith.constant dense<0.000000e+00> : vector<128x32xf32>
    %60 = tpu.matmul %58, %59, %cst_22 {dimension_numbers = #tpu.dot_dimension_numbers<[1], [0], [0], [1], [0, 0, 1, 1], [], []>} : vector<128x32xf32>, vector<32x32xf32>, vector<128x32xf32> -> vector<128x32xf32>
    %61 = vector.shape_cast %60 : vector<128x32xf32> to vector<8x16x32xf32>
    %c0_23 = arith.constant 0 : index
    %c0_24 = arith.constant 0 : index
    %62 = vector.load %arg4[%c0_23, %c0_24] : memref<1x32xf32, #tpu.memory_space<vmem>>, vector<1x32xf32>
    %63 = vector.shape_cast %62 : vector<1x32xf32> to vector<1x1x32xf32>
    %64 = vector.broadcast %63 : vector<1x1x32xf32> to vector<8x16x32xf32>
    %65 = arith.addf %61, %64 : vector<8x16x32xf32>
    %66 = math.tanh %65 : vector<8x16x32xf32>
    %c0_25 = arith.constant 0 : index
    %c0_26 = arith.constant 0 : index
    %67 = vector.load %arg5[%c0_25, %c0_26] : memref<1x32xf32, #tpu.memory_space<vmem>>, vector<1x32xf32>
    %68 = vector.shape_cast %67 : vector<1x32xf32> to vector<1x1x32xf32>
    %69 = vector.broadcast %68 : vector<1x1x32xf32> to vector<8x16x32xf32>
    %70 = arith.mulf %66, %69 : vector<8x16x32xf32>
    %cst_27 = arith.constant dense<0.000000e+00> : vector<8x16xf32>
    %71 = vector.multi_reduction <add>, %70, %cst_27 [2] : vector<8x16x32xf32> to vector<8x16xf32>
    %72 = vector.shape_cast %71 : vector<8x16xf32> to vector<8x16x1xf32>
    %cst_28 = arith.constant dense<0xFF800000> : vector<8x1xf32>
    %73 = vector.multi_reduction <maximumf>, %72, %cst_28 [1] : vector<8x16x1xf32> to vector<8x1xf32>
    %74 = vector.shape_cast %73 : vector<8x1xf32> to vector<8x1x1xf32>
    %75 = vector.broadcast %74 : vector<8x1x1xf32> to vector<8x16x1xf32>
    %76 = arith.subf %72, %75 : vector<8x16x1xf32>
    %77 = math.exp %76 : vector<8x16x1xf32>
    %cst_29 = arith.constant dense<0.000000e+00> : vector<8x1xf32>
    %78 = vector.multi_reduction <add>, %77, %cst_29 [1] : vector<8x16x1xf32> to vector<8x1xf32>
    %79 = vector.shape_cast %78 : vector<8x1xf32> to vector<8x1x1xf32>
    %80 = tpu.reciprocal %79 {approx = true} : vector<8x1x1xf32> -> vector<8x1x1xf32>
    %81 = vector.broadcast %80 : vector<8x1x1xf32> to vector<8x16x1xf32>
    %82 = arith.mulf %77, %81 : vector<8x16x1xf32>
    %83 = vector.broadcast %82 : vector<8x16x1xf32> to vector<8x16x32xf32>
    %84 = arith.mulf %83, %57 : vector<8x16x32xf32>
    %cst_30 = arith.constant dense<0.000000e+00> : vector<8x32xf32>
    %85 = vector.multi_reduction <add>, %84, %cst_30 [1] : vector<8x16x32xf32> to vector<8x32xf32>
    %c0_31 = arith.constant 0 : index
    %c0_32 = arith.constant 0 : index
    %86 = vector.load %arg6[%c0_31, %c0_32] : memref<8x32xf32, #tpu.memory_space<vmem>>, vector<8x32xf32>
    tpu.vector_store %arg6[%c0_31, %c0_32], %85 {strides = array<i32>} : memref<8x32xf32, #tpu.memory_space<vmem>>, vector<8x32xf32>,
    return
  }
  func.func @transform_0(%arg0: i32) -> (i32, i32, i32) {
    %c0_i32 = arith.constant 0 : i32
    %c0_i32_0 = arith.constant 0 : i32
    %c0_i32_1 = arith.constant 0 : i32
    return %arg0, %c0_i32, %c0_i32_0 : i32, i32, i32
  }
  func.func @transform_1(%arg0: i32) -> (i32, i32) {
    %c0_i32 = arith.constant 0 : i32
    %c0_i32_0 = arith.constant 0 : i32
    %c0_i32_1 = arith.constant 0 : i32
    return %c0_i32, %c0_i32_0 : i32, i32
  }
  func.func @transform_2(%arg0: i32) -> (i32, i32) {
    %c0_i32 = arith.constant 0 : i32
    %c0_i32_0 = arith.constant 0 : i32
    %c0_i32_1 = arith.constant 0 : i32
    return %c0_i32, %c0_i32_0 : i32, i32
  }
  func.func @transform_3(%arg0: i32) -> (i32, i32) {
    %c0_i32 = arith.constant 0 : i32
    %c0_i32_0 = arith.constant 0 : i32
    %c0_i32_1 = arith.constant 0 : i32
    return %c0_i32, %c0_i32_0 : i32, i32
  }
  func.func @transform_4(%arg0: i32) -> (i32, i32) {
    %c0_i32 = arith.constant 0 : i32
    %c0_i32_0 = arith.constant 0 : i32
    %c0_i32_1 = arith.constant 0 : i32
    return %c0_i32, %c0_i32_0 : i32, i32
  }
  func.func @transform_5(%arg0: i32) -> (i32, i32) {
    %c0_i32 = arith.constant 0 : i32
    %c0_i32_0 = arith.constant 0 : i32
    return %arg0, %c0_i32 : i32, i32
  }
}

</mosaic_0001>

<bundles_post_ra>
// kernel: tpu_custom_call.1
= control target key start
LH: loop header
LB: loop body
LE: loop exit
PB: predicated region body
PF: predicated region fallthrough
CT: control target
= control target key end

     0   :  { %10 = vsyncpa [#allocation3], 0  ;;  %s11333_s0 = inlined_call_operand.hbm [shape: f32[16,16,32], index: 0, kind: input, shape index: {}]   ;;  %s11334_s1 = inlined_call_operand.hbm [shape: f32[32,96], index: 1, kind: input, shape index: {}]   ;;  %s11335_s2 = inlined_call_operand.hbm [shape: f32[32,32], index: 2, kind: input, shape index: {}]   ;;  %s11336_s3 = inlined_call_operand.vmem [shape: f32[1,32], index: 3, kind: input, shape index: {}]   ;;  %s11337_s4 = inlined_call_operand.vmem [shape: f32[1,32], index: 4, kind: input, shape index: {}]   ;;  %s11338_s5 = inlined_call_operand.hbm [shape: f32[16,32], index: 5, kind: output, shape index: {}]  }
   0x1   :  { %12 = vsyncpa [#allocation3 + $0x1], 0 }
   0x2   :  { %13 = vsyncpa [#allocation6], 0 }
   0x3   :  { %14 = vsyncpa [#allocation4], 0 }
   0x4   :  { %16 = vsyncpa [#allocation4 + $0x1], 0  ;;  %s9310_s18 = smov 0   ;;  %s9312_s19 = smov 0  }
   0x5   :  { %s9314_s20 = smov 0   ;;  %s9316_s21 = smov 0  }
   0x6 LB: > { %s9331_s22 = sadd.s32 4294967295, %s9258_s21   ;;  %s7629_s23 = sadd.s32 4294967294, %s9258_s21   ;;  %s9258_s21 = sphi %s9316_s21, %s11437_s21   ;;  %s9254_s20 = sphi %s9314_s20, %s11436_s20   ;;  %s9250_s19 = sphi %s9312_s19, %s11435_s19   ;;  %s9246_s18 = sphi %s9310_s18, %s11434_s18  }
   0x7   : > { %p42_p0 = scmp.ne.s32.totalorder %s9250_s19, %s9246_s18  ;;  %p11339_p1 = scmp.eq.s32.totalorder %s9331_s22, 0 }
   0x8   : > { %p150_p2 = scmp.eq.s32.totalorder %s9331_s22, 1  ;;  %p156_p3 = scmp.eq.s32.totalorder %s7629_s23, 1 }
   0x9   : > { %p9340_p4 = por %p11339_p1, %p42_p0  ;;  %p7630_p5 = scmp.ge.s32.totalorder %s9258_s21, 1 }
   0xa   : > { %p9345_p6 = por %p156_p3, %p42_p0  ;;  %p163_p7 = scmp.lt.s32.totalorder %s9258_s21, 3 }
   0xb   : > { %s11348_s24 = scalar_select %p9340_p4, 1, 0 }
   0xc   : > { %s11349_s25 = scalar_select %p9345_p6, 1, 0 }
   0xd   : > { %p9350_p8 = pnand %p7630_p5, %p163_p7  ;;  %s9260_s27 = smov [#allocation5]  }
   0xe   : > { %s175_s28 = sshll.u32 %s9260_s27, 4  ;;  %s9261_s30 = smov [#allocation7]   ;;  %s176_s28 = int_to_ptr.vmem [resolvable:$true] %s175_s28 }
   0xf   : > { %s11350_s26 = scalar_select %p9350_p8, 1, 0 }
  0x10   : > { %p8703_p9 = pneg %p9350_p8  ;;  %s188_s6 = sshll.u32 %s9261_s30, 4  ;;  %s189_s6 = int_to_ptr.vmem [resolvable:$true] %s188_s6 }
  0x11   : > { %s9121_s7 = scalar_lea.vmem %s176_s28, 512  ;;  %p9129_p5 = scmp.lt.s32.totalorder %s176_s28, %s176_s28 }
  0x12   : > { %p9359_p11 = pnand %p8703_p9, %p11339_p1  ;;  %p9122_p13 = scmp.ne.s32.totalorder %s176_s28, %s9121_s7 }
  0x13   : > { %p9130_p7 = scmp.lt.s32.totalorder %s9121_s7, %s9121_s7 }
  0x14   : > { %p9112_p12 = pneg %p9359_p11 }
  0x15   : > { %p9131_p10 = por %p9130_p7, %p9129_p5 }
  0x16   : > { %p9124_p0 = pnand %p9122_p13, %p9112_p12 }
  0x18   : > { %p9125_p3 = pneg %p9124_p0 }
  0x1a   : > { %p9132_p9 = pnand %p9131_p10, %p9125_p3 }
  0x1c   : > { %9135 = shalt.err (!%p9132_p9)
}
  0x1d   : > { %s11340_s8 = smov 128   ;;  %s9263_s9 = smov 8  }
  0x1e   : > { %8706 = dma.hbm_to_vmem [thread:$0]  (!%p9359_p11), %s11334_s1, 512, %s176_s28, [#allocation6], %s11340_s8, %s11340_s8, %s9263_s9  }
  0x1f   : > { %s9147_s12 = scalar_lea.vmem %s189_s6, 512  ;;  %p9155_p10 = scmp.lt.s32.totalorder %s189_s6, %s189_s6 }
  0x20   : > { %p9148_p13 = scmp.ne.s32.totalorder %s189_s6, %s9147_s12  ;;  %p9156_p3 = scmp.lt.s32.totalorder %s9147_s12, %s9147_s12 }
  0x22   : > { %p9150_p0 = pnand %p9148_p13, %p9112_p12  ;;  %p9157_p7 = por %p9156_p3, %p9155_p10 }
  0x24   : > { %p9151_p5 = pneg %p9150_p0 }
  0x26   : > { %p9158_p9 = pnand %p9157_p7, %p9151_p5 }
  0x28   : > { %9161 = shalt.err (!%p9158_p9)
}
  0x29   : > { %8709 = dma.hbm_to_vmem [thread:$0]  (!%p9359_p11), %s11335_s2, 512, %s189_s6, [#allocation6], %s11340_s8, %s11340_s8, %s9263_s9  }
  0x2a   : > { %s9388_s15 = sadd.s32 1, %s9258_s21   ;;  %s29_s16 = sadd.s32 1, %s9254_s20 }
  0x2b   : > { %s26_s17 = ssub.s32 %s9258_s21, %s9388_s15  ;;  %p36_p12 = scmp.ne.s32.totalorder %s9254_s20, %s9250_s19 }
  0x2c   : > { %p27_p13 = scmp.eq.s32.totalorder %s26_s17, 0  ;;  %p37_p0 = scmp.eq.s32.totalorder %s9258_s21, 0 }
  0x2d   : > { %p9398_p5 = por %p150_p2, %p36_p12  ;;  %p8720_p10 = scmp.lt.s32.totalorder %s9258_s21, 2 }
  0x2e   : > { %s9404_s27 = scalar_select %p27_p13, %s9254_s20, %s29_s16  }
  0x2f   : > { %s11352_s23 = scalar_select %p9398_p5, 1, 0 }
  0x30   : > { %p38_p3 = por %p37_p0, %p36_p12  ;;  %s208_s28 = sand.u32 1, %s9254_s20  }
  0x31   : > { %s7634_s29 = sshll.u32 %s208_s28, 7  ;;  %s7874_s30 = sshll.u32 %s9258_s21, 11 }
  0x32   : > { %s9411_s10 = scalar_lea.hbm %s11333_s0, %s7874_s30  ;;  %s212_s11 = scalar_lea.vmem [#allocation2], %s7634_s29 }
  0x33   : > { %s220_s12 = sshll.u32 %s212_s11, 4  ;;  %p9415_p2 = pnand %p8720_p10, %p38_p3  ;;  %s9413_s12 = int_to_ptr.vmem [resolvable:$true] %s220_s12 }
  0x34   : > { %s9419_s14 = scalar_lea.sflag [#allocation3], %s208_s28  ;;  %s9162_s16 = scalar_lea.hbm %s9411_s10, 2048 }
  0x35   : > { %p9163_p11 = scmp.ne.s32.totalorder %s9411_s10, %s9162_s16  ;;  %p9164_p7 = pneg %p9415_p2 }
  0x36   : > { %s9167_s29 = scalar_lea.hbm %s11333_s0, 4096  ;;  %p9168_p13 = scmp.lt.s32.totalorder %s9411_s10, %s11333_s0 }
  0x37   : > { %p9165_p9 = pnand %p9164_p7, %p9163_p11  ;;  %p9169_p0 = scmp.lt.s32.totalorder %s9167_s29, %s9162_s16 }
  0x39   : > { %p9166_p12 = pneg %p9165_p9  ;;  %p9170_p10 = por %p9169_p0, %p9168_p13 }
  0x3b   : > { %p9171_p3 = pnand %p9170_p10, %p9166_p12 }
  0x3d   : > { %9174 = shalt.err (!%p9171_p3)
}
  0x3e   : > { %s9175_s28 = scalar_lea.vmem %s9413_s12, 2048  ;;  %s9264_s11 = smov [#allocation2]  }
  0x3f   : > { %p9176_p1 = scmp.ne.s32.totalorder %s9413_s12, %s9175_s28  ;;  %s9180_s8 = sshll.u32 %s9264_s11, 4  ;;  %s9181_s8 = int_to_ptr.vmem [resolvable:$false] %s9180_s8 }
  0x40   : > { %s9182_s17 = scalar_lea.vmem %s9181_s8, 4096  ;;  %p9183_p9 = scmp.lt.s32.totalorder %s9413_s12, %s9181_s8 }
  0x41   : > { %p9178_p6 = pnand %p9176_p1, %p9164_p7  ;;  %p9184_p5 = scmp.lt.s32.totalorder %s9182_s17, %s9175_s28 }
  0x43   : > { %p9179_p11 = pneg %p9178_p6  ;;  %p9185_p4 = por %p9184_p5, %p9183_p9 }
  0x45   : > { %p9186_p8 = pnand %p9185_p4, %p9179_p11 }
  0x47   : > { %9189 = shalt.err (!%p9186_p8)
}
  0x48   : > { %s11354_s16 = smov 128   ;;  %p11355_p1 = scmp.ne.s32.totalorder %s11350_s26, 0 }
  0x49   : > { %8713 = dma.hbm_to_vmem [thread:$0]  (!%p9415_p2), %s9411_s10, 2048, %s9413_s12, %s9419_s14, %s11354_s16, %s11354_s16, %s9263_s9  }
  0x4a   : > { %232 = sbr.rel (%p11355_p1) target bundleno = 2968 (0xb98), region = 40 }
  0x4f   : > { %s9446_s30 = sand.u32 1, %s9250_s19   ;;  %p11356_p4 = scmp.ne.s32.totalorder %s11348_s24, 0 }
  0x50   : > { %s7639_s8 = sshll.u32 %s9446_s30, 7  ;;  %s235_s29 = scalar_lea.sflag [#allocation3], %s9446_s30 }
  0x51   : > { %s9450_s6 = scalar_lea.vmem [#allocation2], %s7639_s8 }
  0x52   : > { %9233 = dma.done.wait (%p11356_p4), %s235_s29, 2048  }
  0x53   : > { %9235 = vsyncadd (%p11356_p4), %s235_s29, 4294965248  ;;  %p11357_p6 = scmp.eq.s32.totalorder %s9331_s22, 0 }
  0x55   : > { %9237 = dma.done.wait (%p11357_p6), [#allocation6], 1024   ;;  %p11358_p8 = pmov %p11357_p6 }
  0x56   : > { %vm294_vm0 = vcmask 261120   ;;  %v293_v0 = vld [vmem:[#allocation5 + $0x18] sm:$0xff]  ;;  %v292_v1 = vld [vmem:[#allocation5 + $0x10] sm:$0xff]  ;;  %v274_v2 = vld [vmem:[%s9450_s6] sm:$0xff]  ;;  %vm494_vm1 = vcmask 64512   ;;  %s9265_s24 = smov 96  }
  0x57   : > { %9239 = vsyncadd (%p11358_p8), [#allocation6], 4294966272  ;;  %8171 = vmatprep.subr.mxu0 %v293_v0  ;;  %8683 = vmatprep.subr.mxu1 %v293_v0  ;;  %v291_v3 = vld [vmem:[#allocation5 + $0x8] sm:$0xff]  ;;  %v290_v4 = vld [vmem:[#allocation5] sm:$0xff]  ;;  %s9266_s26 = smov 64   ;;  %s9267_s9 = smov 88  }
  0x58   : > { %8172 = vmatpush3.msra.mxu0 %v293_v0  ;;  %8179 = vmatprep.mubr.msk.f32.mxu0 %vm294_vm0, %v274_v2  ;;  %v275_v5 = vld [vmem:[%s9450_s6 + $0x8] sm:$0xff]  ;;  %v276_v6 = vld [vmem:[%s9450_s6 + $0x10] sm:$0xff]  ;;  %v282_v7 = vld [vmem:[%s9450_s6 + $0x40] sm:$0xff]  ;;  %s9268_s10 = smov 120   ;;  %vm1233_vm2 = vcmask 130048   ;;  %s9269_s12 = smov 56  }
  0x59   : > { %8173 = vmatprep.subr.mxu0 %v292_v1  ;;  %8687 = vmatpush3.msra.mxu1 %v293_v0  ;;  %v283_v8 = vld [vmem:[%s9450_s6 + $0x48] sm:$0xff]  ;;  %v284_v9 = vld [vmem:[%s9450_s6 + $0x50] sm:$0xff]  ;;  %v277_v10 = vld [vmem:[%s9450_s6 + $0x18] sm:$0xff]  ;;  %s9270_s13 = smov 80   ;;  %s9271_s14 = smov 112   ;;  %vm6906_vm3 = vcmask 195584  }
  0x5a   : > { %8174 = vmatpush3.msra.mxu0 %v292_v1  ;;  %8684 = vmatprep.subr.mxu1 %v292_v1  ;;  %v278_v11 = vld [vmem:[%s9450_s6 + $0x20] sm:$0xff]  ;;  %v285_v12 = vld [vmem:[%s9450_s6 + $0x58] sm:$0xff]  ;;  %v279_v14 = vld [vmem:[%s9450_s6 + $0x28] sm:$0xff]  ;;  %s9272_s7 = smov 48   ;;  %s9273_s28 = smov 72   ;;  %vm7510_vm4 = vcmask 1041409  }
  0x5b   : > { %8175 = vmatprep.subr.mxu0 %v291_v3  ;;  %8688 = vmatpush3.msra.mxu1 %v292_v1  ;;  %v286_v13 = vld [vmem:[%s9450_s6 + $0x60] sm:$0xff]  ;;  %v280_v15 = vld [vmem:[%s9450_s6 + $0x30] sm:$0xff]  ;;  %v287_v16 = vld [vmem:[%s9450_s6 + $0x68] sm:$0xff]  ;;  %s9274_s11 = smov 104   ;;  %s9275_s17 = smov 40   ;;  %vm7512_vm5 = vcmask 1042434  }
  0x5c   : > { %8176 = vmatpush3.msra.mxu0 %v291_v3  ;;  %8685 = vmatprep.subr.mxu1 %v291_v3  ;;  %v288_v17 = vld [vmem:[%s9450_s6 + $0x70] sm:$0xff]  ;;  %v281_v18 = vld [vmem:[%s9450_s6 + $0x38] sm:$0xff]  ;;  %s9276_s16 = smov 8   ;;  %s9277_s8 = smov 16   ;;  %vm7514_vm6 = vcmask 1043459   ;;  %vm7516_vm7 = vcmask 1044484  }
  0x5d   : > { %8177 = vmatprep.subr.mxu0 %v290_v4  ;;  %8689 = vmatpush3.msra.mxu1 %v291_v3  ;;  %v289_v19 = vld [vmem:[%s9450_s6 + $0x78] sm:$0xff]  ;;  %s9278_s29 = smov 24   ;;  %vm7518_vm8 = vcmask 1045509   ;;  %vm7520_vm9 = vcmask 1046534   ;;  %vm7522_vm10 = vcmask 1047559   ;;  %p11431_p2 = scmp.ne.s32.totalorder %s11352_s23, 0 }
  0x5e   : > { %8178 = vmatpush3.msra.mxu0 %v290_v4  ;;  %8686 = vmatprep.subr.mxu1 %v290_v4 }
  0x5f   : > { %8180 = vmatmul.mubr.msk.f32.vlgmr.msra.gmra.mxu0 %vm294_vm0, %v275_v5  ;;  %8690 = vmatpush3.msra.mxu1 %v290_v4 }
  0x60   : > { %8182 = vmatprep.mubr.msk.f32.mxu0 %vm294_vm0, %v276_v6  ;;  %8191 = vmatprep.mubr.msk.f32.mxu1 %vm294_vm0, %v282_v7 }
  0x61   : > { %8192 = vmatmul.mubr.msk.f32.vlgmr.msra.gmra.mxu1 %vm294_vm0, %v283_v8 }
  0x62   : > { %8194 = vmatprep.mubr.msk.f32.mxu1 %vm294_vm0, %v284_v9 }
  0x63   : > { %8183 = vmatmul.mubr.msk.f32.gmra.mxu0 %vm294_vm0, %v277_v10 }
  0x64   : > { %8185 = vmatprep.mubr.msk.f32.mxu0 %vm294_vm0, %v278_v11 }
  0x65   : > { %8195 = vmatmul.mubr.msk.f32.gmra.mxu1 %vm294_vm0, %v285_v12 }
  0x66   : > { %8197 = vmatprep.mubr.msk.f32.mxu1 %vm294_vm0, %v286_v13 }
  0x67   : > { %8186 = vmatmul.mubr.msk.f32.gmra.mxu0 %vm294_vm0, %v279_v14 }
  0x68   : > { %8188 = vmatprep.mubr.msk.f32.mxu0 %vm294_vm0, %v280_v15 }
  0x69   : > { %8198 = vmatmul.mubr.msk.f32.gmra.mxu1 %vm294_vm0, %v287_v16 }
  0x6a   : > { %8200 = vmatprep.mubr.msk.f32.mxu1 %vm294_vm0, %v288_v17 }
  0x6b   : > { %8189 = vmatmul.mubr.msk.f32.gmra.mxu0 %vm294_vm0, %v281_v18 }
  0x6d   : > { %8201 = vmatmul.mubr.msk.f32.gmra.mxu1 %vm294_vm0, %v289_v19 }
 0x11f   : > { %v9492_v20 = vpop.f32.mrf.mxu0 }
 0x120   : > { %492 = vrot.lane.b32.xlu0 %v9492_v20, %s9265_s24 }
 0x121   : > { %v9496_v21 = vpop.f32.mrf.mxu0  ;;  %v9498_v22 = vpop.f32.mrf.mxu1 }
 0x122   : > { %8207 = vmatprep.mubr.msk.f32.mxu1 %vm494_vm1, %v9496_v21 }
 0x123   : > { %v9502_v23 = vpop.f32.mrf.mxu0  ;;  %v9508_v24 = vpop.f32.mrf.mxu1 }
 0x124   : > { %490 = vrot.lane.b32.xlu0 %v9496_v21, %s9265_s24  ;;  %582 = vrot.lane.b32.xlu1 %v9502_v23, %s9265_s24 }
 0x125   : > { %v9510_v25 = vpop.f32.mrf.mxu0  ;;  %8235 = vmatprep.mubr.msk.f32.mxu0 %vm494_vm1, %v9508_v24  ;;  %v9522_v28 = vpop.f32.mrf.mxu1 }
 0x126   : > { %11359 = vst [vmem:[#allocation12_spill] sm:$0xff] %v9522_v28 }
 0x127   : > { %v9514_v26 = vpop.f32.mrf.mxu0  ;;  %v9532_v31 = vpop.f32.mrf.mxu1 }
 0x128   : > { %580 = vrot.lane.b32.xlu1 %v9510_v25, %s9265_s24  ;;  %671 = vrot.lane.b32.xlu0 %v9514_v26, %s9265_s24 }
 0x129   : > { %v9520_v27 = vpop.f32.mrf.mxu0  ;;  %v9538_v32 = vpop.f32.mrf.mxu1 }
 0x12b   : > { %v9524_v29 = vpop.f32.mrf.mxu0  ;;  %v9544_v33 = vpop.f32.mrf.mxu1 }
 0x12c   : > { %669 = vrot.lane.b32.xlu1 %v9520_v27, %s9265_s24  ;;  %760 = vrot.lane.b32.xlu0 %v9524_v29, %s9265_s24 }
 0x12d   : > { %v9530_v30 = vpop.f32.mrf.mxu0  ;;  %v9550_v34 = vpop.f32.mrf.mxu1 }
 0x12f   : > { %v9556_v35 = vpop.f32.mrf.mxu1 }
 0x130   : > { %849 = vrot.lane.b32.xlu0 %v9498_v22, %s9265_s24  ;;  %758 = vrot.lane.b32.xlu1 %v9530_v30, %s9265_s24 }
 0x134   : > { %938 = vrot.lane.b32.xlu0 %v9522_v28, %s9265_s24  ;;  %847 = vrot.lane.b32.xlu1 %v9508_v24, %s9265_s24 }
 0x138   : > { %1027 = vrot.lane.b32.xlu0 %v9538_v32, %s9265_s24  ;;  %936 = vrot.lane.b32.xlu1 %v9532_v31, %s9265_s24 }
 0x13c   : > { %1116 = vrot.lane.b32.xlu0 %v9550_v34, %s9265_s24  ;;  %1025 = vrot.lane.b32.xlu1 %v9544_v33, %s9265_s24 }
 0x140   : > { %1330 = vrot.lane.b32.xlu0 %v9496_v21, %s9266_s26  ;;  %1114 = vrot.lane.b32.xlu1 %v9556_v35, %s9265_s24 }
 0x144   : > { %1417 = vrot.lane.b32.xlu0 %v9510_v25, %s9266_s26  ;;  %1332 = vrot.lane.b32.xlu1 %v9492_v20, %s9266_s26 }
 0x148   : > { %1593 = vrot.lane.b32.xlu0 %v9524_v29, %s9266_s26  ;;  %1419 = vrot.lane.b32.xlu1 %v9502_v23, %s9266_s26 }
 0x14c   : > { %1767 = vrot.lane.b32.xlu0 %v9522_v28, %s9266_s26  ;;  %1506 = vrot.lane.b32.xlu1 %v9514_v26, %s9266_s26 }
 0x150   : > { %1765 = vrot.lane.b32.xlu0 %v9532_v31, %s9266_s26  ;;  %1504 = vrot.lane.b32.xlu1 %v9520_v27, %s9266_s26 }
 0x154   : > { %1941 = vrot.lane.b32.xlu0 %v9550_v34, %s9266_s26  ;;  %1680 = vrot.lane.b32.xlu1 %v9498_v22, %s9266_s26 }
 0x158   : > { %2123 = vrot.lane.b32.xlu0 %v9502_v23, %s9267_s9  ;;  %1678 = vrot.lane.b32.xlu1 %v9508_v24, %s9266_s26 }
 0x15c   : > { %2121 = vrot.lane.b32.xlu0 %v9510_v25, %s9267_s9  ;;  %1854 = vrot.lane.b32.xlu1 %v9538_v32, %s9266_s26 }
 0x160   : > { %2028 = vrot.lane.b32.xlu0 %v9492_v20, %s9268_s10  ;;  %1852 = vrot.lane.b32.xlu1 %v9544_v33, %s9266_s26 }
 0x164   : > { %2212 = vrot.lane.b32.xlu0 %v9520_v27, %s9267_s9  ;;  %2032 = vrot.lane.b32.xlu1 %v9492_v20, %s9267_s9 }
 0x168   : > { %2119 = vrot.lane.b32.xlu0 %v9502_v23, %s9268_s10  ;;  %2030 = vrot.lane.b32.xlu1 %v9496_v21, %s9267_s9 }
 0x16c   : > { %1591 = vrot.lane.b32.xlu0 %v9530_v30, %s9266_s26  ;;  %2026 = vrot.lane.b32.xlu1 %v9496_v21, %s9268_s10 }
 0x170   : > { %2214 = vrot.lane.b32.xlu1 %v9514_v26, %s9267_s9  ;;  %1939 = vrot.lane.b32.xlu0 %v9556_v35, %s9266_s26 }
 0x174   : > { %2117 = vrot.lane.b32.xlu1 %v9510_v25, %s9268_s10 }
 0x178   : > { %2305 = vrot.lane.b32.xlu1 %v9524_v29, %s9267_s9 }
 0x17c   : > { %2208 = vrot.lane.b32.xlu1 %v9520_v27, %s9268_s10 }
 0x192   : > { %v493_v36 = vpop.permute.xlu0 %492 }
 0x193   : > { %8203 = vmatprep.subr.msk.mxu1 %vm494_vm1, %v493_v36 }
 0x194   : > { %8204 = vmatpush3.xpose.msk.msra.mxu1 %vm494_vm1, %v493_v36 }
 0x196   : > { %v491_v37 = vpop.permute.xlu0 %490  ;;  %v583_v38 = vpop.permute.xlu1 %582 }
 0x197   : > { %8205 = vmatprep.subr.msk.mxu1 %vm494_vm1, %v491_v37 }
 0x198   : > { %8206 = vmatpush3.xpose.msk.msra.mxu1 %vm494_vm1, %v491_v37 }
 0x199   : > { %8210 = vmatprep.subr.msk.mxu1 %vm494_vm1, %v583_v38 }
 0x19a   : > { %v581_v39 = vpop.permute.xlu1 %580  ;;  %v672_v40 = vpop.permute.xlu0 %671 }
 0x19b   : > { %8208 = vmatmul.mubr.msk.f32.vlgmr.msra.gmra.mxu1 %vm494_vm1, %v9492_v20 }
 0x19c   : > { %8211 = vmatpush3.xpose.msk.msra.mxu1 %vm494_vm1, %v583_v38  ;;  %8214 = vmatprep.mubr.msk.f32.mxu1 %vm494_vm1, %v9510_v25 }
 0x19d   : > { %8212 = vmatprep.subr.msk.mxu1 %vm494_vm1, %v581_v39 }
 0x19e   : > { %v670_v41 = vpop.permute.xlu1 %669  ;;  %v761_v42 = vpop.permute.xlu0 %760 }
 0x1a0   : > { %8213 = vmatpush3.xpose.msk.msra.mxu1 %vm494_vm1, %v581_v39 }
 0x1a1   : > { %8217 = vmatprep.subr.msk.mxu1 %vm494_vm1, %v672_v40 }
 0x1a2   : > { %v850_v43 = vpop.permute.xlu0 %849  ;;  %v759_v44 = vpop.permute.xlu1 %758 }
 0x1a3   : > { %8215 = vmatmul.mubr.msk.f32.vlgmr.msra.gmra.mxu1 %vm494_vm1, %v9502_v23  ;;  %8231 = vmatprep.subr.msk.mxu0 %vm494_vm1, %v850_v43 }
 0x1a4   : > { %8218 = vmatpush3.xpose.msk.msra.mxu1 %vm494_vm1, %v672_v40  ;;  %8221 = vmatprep.mubr.msk.f32.mxu1 %vm494_vm1, %v9520_v27 }
 0x1a5   : > { %8232 = vmatpush3.xpose.msk.msra.mxu0 %vm494_vm1, %v850_v43  ;;  %8219 = vmatprep.subr.msk.mxu1 %vm494_vm1, %v670_v41 }
 0x1a6   : > { %v939_v45 = vpop.permute.xlu0 %938  ;;  %v848_v46 = vpop.permute.xlu1 %847 }
 0x1a7   : > { %8233 = vmatprep.subr.msk.mxu0 %vm494_vm1, %v848_v46 }
 0x1a8   : > { %8220 = vmatpush3.xpose.msk.msra.mxu1 %vm494_vm1, %v670_v41 }
 0x1a9   : > { %8234 = vmatpush3.xpose.msk.msra.mxu0 %vm494_vm1, %v848_v46  ;;  %8224 = vmatprep.subr.msk.mxu1 %vm494_vm1, %v761_v42 }
 0x1aa   : > { %v1028_v47 = vpop.permute.xlu0 %1027  ;;  %v937_v48 = vpop.permute.xlu1 %936 }
 0x1ab   : > { %8222 = vmatmul.mubr.msk.f32.vlgmr.msra.gmra.mxu1 %vm494_vm1, %v9514_v26  ;;  %8245 = vmatprep.subr.msk.mxu0 %vm494_vm1, %v1028_v47 }
 0x1ac   : > { %8236 = vmatmul.mubr.msk.f32.vlgmr.msra.gmra.mxu0 %vm494_vm1, %v9498_v22  ;;  %8225 = vmatpush3.xpose.msk.msra.mxu1 %vm494_vm1, %v761_v42 }
 0x1ad   : > { %8228 = vmatprep.mubr.msk.f32.mxu1 %vm494_vm1, %v9530_v30  ;;  %8246 = vmatpush3.xpose.msk.msra.mxu0 %vm494_vm1, %v1028_v47 }
 0x1ae   : > { %8249 = vmatprep.mubr.msk.f32.mxu0 %vm494_vm1, %v9544_v33  ;;  %v1026_v49 = vpop.permute.xlu1 %1025  ;;  %8226 = vmatprep.subr.msk.mxu1 %vm494_vm1, %v759_v44  ;;  %v1117_v50 = vpop.permute.xlu0 %1116 }
 0x1af   : > { %8247 = vmatprep.subr.msk.mxu0 %vm494_vm1, %v1026_v49 }
 0x1b0   : > { %8227 = vmatpush3.xpose.msk.msra.mxu1 %vm494_vm1, %v759_v44 }
 0x1b1   : > { %8248 = vmatpush3.xpose.msk.msra.mxu0 %vm494_vm1, %v1026_v49  ;;  %8238 = vmatprep.subr.msk.mxu1 %vm494_vm1, %v939_v45 }
 0x1b2   : > { %v1115_v51 = vpop.permute.xlu1 %1114  ;;  %v1331_v53 = vpop.permute.xlu0 %1330 }
 0x1b3   : > { %8229 = vmatmul.mubr.msk.f32.vlgmr.msra.gmra.mxu1 %vm494_vm1, %v9524_v29 }
 0x1b4   : > { %8250 = vmatmul.mubr.msk.f32.vlgmr.msra.gmra.mxu0 %vm494_vm1, %v9538_v32  ;;  %8239 = vmatpush3.xpose.msk.msra.mxu1 %vm494_vm1, %v939_v45 }
 0x1b5   : > { %8242 = vmatprep.mubr.msk.f32.mxu1 %vm494_vm1, %v9532_v31  ;;  %8240 = vmatprep.subr.msk.mxu1 %vm494_vm1, %v937_v48 }
 0x1b6   : > { %v1333_v52 = vpop.permute.xlu1 %1332  ;;  %v1418_v56 = vpop.permute.xlu0 %1417 }
 0x1b7   : > { %8259 = vmatprep.subr.mxu0 %v1333_v52 }
 0x1b8   : > { %8241 = vmatpush3.xpose.msk.msra.mxu1 %vm494_vm1, %v937_v48  ;;  %8260 = vmatpush3.msra.mxu0 %v1333_v52 }
 0x1b9   : > { %8261 = vmatprep.subr.mxu0 %v1331_v53  ;;  %8252 = vmatprep.subr.msk.mxu1 %vm494_vm1, %v1117_v50 }
 0x1ba   : > { %8262 = vmatpush3.msra.mxu0 %v1331_v53  ;;  %v1420_v54 = vpop.permute.xlu1 %1419  ;;  %v9663_v57 = vpop.permute.xlu0 %1593 }
 0x1bb   : > { %8243 = vmatmul.mubr.msk.f32.vlgmr.msra.gmra.mxu1 %vm494_vm1, %v9522_v28 }
 0x1bc   : > { %8253 = vmatpush3.xpose.msk.msra.mxu1 %vm494_vm1, %v1117_v50  ;;  %8256 = vmatprep.mubr.msk.f32.mxu1 %vm494_vm1, %v9556_v35 }
 0x1bd   : > { %8254 = vmatprep.subr.msk.mxu1 %vm494_vm1, %v1115_v51 }
 0x1be   : > { %v9657_v55 = vpop.permute.xlu1 %1506 }
 0x1bf   : > { %8273 = vmatprep.subr.mxu0 %v9657_v55 }
 0x1c0   : > { %8255 = vmatpush3.xpose.msk.msra.mxu1 %vm494_vm1, %v1115_v51 }
 0x1c1   : > { %8266 = vmatprep.subr.mxu1 %v1420_v54 }
 0x1c3   : > { %8257 = vmatmul.mubr.msk.f32.vlgmr.msra.gmra.mxu1 %vm494_vm1, %v9550_v34 }
 0x1c4   : > { %8267 = vmatpush3.msra.mxu1 %v1420_v54 }
 0x1c5   : > { %8268 = vmatprep.subr.mxu1 %v1418_v56 }
 0x1c6   : > { %8269 = vmatpush3.msra.mxu1 %v1418_v56 }
 0x1c7   : > { %8280 = vmatprep.subr.mxu1 %v9663_v57 }
 0x25b   : > { %v8209_v58 = vpop.f32.mrf.mxu1 }
 0x25c   : > { %v1203_v59 = vmul.f32 1.442695, %v8209_v58 }
 0x25d   : > { %v569_v60 = vpop.f32.mrf.mxu1 }
 0x25e   : > { %8774 = vpow2.f32 %v1203_v59  ;;  %v1201_v2 = vmul.f32 1.442695, %v569_v60 }
 0x263   : > { %v8216_v61 = vpop.f32.mrf.mxu1 }
 0x264   : > { %v1207_v62 = vmul.f32 1.442695, %v8216_v61 }
 0x265   : > { %v658_v10 = vpop.f32.mrf.mxu1 }
 0x266   : > { %8776 = vpow2.f32 %v1207_v62  ;;  %v1205_v11 = vmul.f32 1.442695, %v658_v10 }
 0x26b   : > { %v9666_v63 = vpop.eup %8774  ;;  %v8223_v17 = vpop.f32.mrf.mxu1 }
 0x26c   : > { %v8237_v0 = vpop.f32.mrf.mxu0  ;;  %v1237_v1 = vsel %vm1233_vm2, %v9666_v63, 0.0  ;;  %v1211_v18 = vmul.f32 1.442695, %v8223_v17 }
 0x26d   : > { %v1219_v3 = vmul.f32 1.442695, %v8237_v0  ;;  %1238 = vadd.xlane.f32.xlu1 %v1237_v1  ;;  %v747_v37 = vpop.f32.mrf.mxu1 }
 0x26e   : > { %v925_v4 = vpop.f32.mrf.mxu0  ;;  %v1209_v38 = vmul.f32 1.442695, %v747_v37 }
 0x26f   : > { %8778 = vpow2.f32 %v1219_v3  ;;  %v1217_v5 = vmul.f32 1.442695, %v925_v4 }
 0x270   : > { %8780 = vpow2.f32 %v1201_v2 }
 0x271   : > { %8782 = vpow2.f32 %v1217_v5 }
 0x273   : > { %v9670_v6 = vpop.eup %8776  ;;  %v8230_v47 = vpop.f32.mrf.mxu1 }
 0x274   : > { %v8251_v7 = vpop.f32.mrf.mxu0  ;;  %v1243_v8 = vsel %vm1233_vm2, %v9670_v6, 0.0  ;;  %v1215_v48 = vmul.f32 1.442695, %v8230_v47 }
 0x275   : > { %v1227_v9 = vmul.f32 1.442695, %v8251_v7  ;;  %1244 = vadd.xlane.f32.xlu1 %v1243_v8  ;;  %v836_v51 = vpop.f32.mrf.mxu1  ;;  %v9726_v8 = vpop.permute.xlu1 %1504 }
 0x276   : > { %v1103_v12 = vpop.f32.mrf.mxu0  ;;  %v1213_v52 = vmul.f32 1.442695, %v836_v51 }
 0x277   : > { %8784 = vpow2.f32 %v1227_v9  ;;  %v1225_v14 = vmul.f32 1.442695, %v1103_v12 }
 0x278   : > { %8786 = vpow2.f32 %v1205_v11 }
 0x279   : > { %8788 = vpow2.f32 %v1225_v14  ;;  %v9728_v9 = vpop.permute.xlu1 %1680  ;;  %v9738_v14 = vpop.permute.xlu0 %1767 }
 0x27a   : > { %8790 = vpow2.f32 %v1211_v18 }
 0x27b   : > { %8792 = vpow2.f32 %v1209_v38  ;;  %v8244_v54 = vpop.f32.mrf.mxu1 }
 0x27c   : > { %v9674_v13 = vpop.eup %8778  ;;  %8794 = vpow2.f32 %v1215_v48  ;;  %v1223_v56 = vmul.f32 1.442695, %v8244_v54 }
 0x27d   : > { %v1261_v15 = vsel %vm1233_vm2, %v9674_v13, 0.0  ;;  %v9678_v16 = vpop.eup %8780  ;;  %8796 = vpow2.f32 %v1213_v52  ;;  %v1014_v58 = vpop.f32.mrf.mxu1 }
 0x27e   : > { %1262 = vadd.xlane.f32.xlu0 %v1261_v15  ;;  %v1234_v19 = vsel %vm1233_vm2, %v9678_v16, 0.0  ;;  %v9682_v36 = vpop.eup %8782  ;;  %8798 = vpow2.f32 %v1223_v56  ;;  %v1221_v59 = vmul.f32 1.442695, %v1014_v58  ;;  %v9734_v11 = vpop.permute.xlu1 %1678 }
 0x27f   : > { %v1258_v39 = vsel %vm1233_vm2, %v9682_v36, 0.0  ;;  %v9742_v18 = vpop.permute.xlu0 %1765 }
 0x280   : > { %8800 = vpow2.f32 %v1221_v59 }
 0x282   : > { %1235 = vadd.xlane.f32.xlu0 %v1234_v19  ;;  %v9740_v15 = vpop.permute.xlu1 %1854 }
 0x283   : > { %v8258_v5 = vpop.f32.mrf.mxu1  ;;  %v9746_v38 = vpop.permute.xlu0 %1941 }
 0x284   : > { %v9686_v40 = vpop.eup %8784  ;;  %v1231_v7 = vmul.f32 1.442695, %v8258_v5 }
 0x285   : > { %v1273_v41 = vsel %vm1233_vm2, %v9686_v40, 0.0  ;;  %v9692_v42 = vpop.eup %8786  ;;  %v1192_v17 = vpop.f32.mrf.mxu1 }
 0x286   : > { %1259 = vadd.xlane.f32.xlu0 %v1258_v39  ;;  %2396 = vrot.lane.b32.xlu1 %v9498_v22, %s9267_s9  ;;  %v1240_v43 = vsel %vm1233_vm2, %v9692_v42, 0.0  ;;  %v9696_v44 = vpop.eup %8788  ;;  %8802 = vpow2.f32 %v1231_v7  ;;  %v1229_v19 = vmul.f32 1.442695, %v1192_v17  ;;  %v9744_v37 = vpop.permute.xlu1 %1852 }
 0x287   : > { %v1270_v45 = vsel %vm1233_vm2, %v9696_v44, 0.0  ;;  %v9700_v46 = vpop.eup %8790 }
 0x288   : > { %v1249_v49 = vsel %vm1233_vm2, %v9700_v46, 0.0  ;;  %v9704_v50 = vpop.eup %8792  ;;  %8804 = vpow2.f32 %v1229_v19 }
 0x289   : > { %v1246_v53 = vsel %vm1233_vm2, %v9704_v50, 0.0  ;;  %v9708_v60 = vpop.eup %8794 }
 0x28a   : > { %1274 = vadd.xlane.f32.xlu0 %v1273_v41  ;;  %v1255_v61 = vsel %vm1233_vm2, %v9708_v60, 0.0  ;;  %v9712_v62 = vpop.eup %8796  ;;  %v9748_v39 = vpop.permute.xlu1 %2032 }
 0x28b   : > { %v1252_v0 = vsel %vm1233_vm2, %v9712_v62, 0.0  ;;  %v9716_v1 = vpop.eup %8798  ;;  %v9750_v41 = vpop.permute.xlu0 %2123 }
 0x28c   : > { %v1267_v2 = vsel %vm1233_vm2, %v9716_v1, 0.0 }
 0x28d   : > { %v9722_v3 = vpop.eup %8800 }
 0x28e   : > { %1241 = vadd.xlane.f32.xlu0 %v1240_v43  ;;  %v1264_v4 = vsel %vm1233_vm2, %v9722_v3, 0.0  ;;  %v9752_v43 = vpop.permute.xlu1 %2030 }
 0x28f   : > { %v9758_v47 = vpop.permute.xlu0 %2121 }
 0x292   : > { %1271 = vadd.xlane.f32.xlu0 %v1270_v45  ;;  %v9762_v48 = vpop.permute.xlu1 %2026 }
 0x293   : > { %v9732_v10 = vpop.eup %8802  ;;  %v9766_v51 = vpop.permute.xlu0 %2028 }
 0x294   : > { %v1279_v12 = vsel %vm1233_vm2, %v9732_v10, 0.0 }
 0x295   : > { %v9756_v45 = vpop.eup %8804 }
 0x296   : > { %1250 = vadd.xlane.f32.xlu0 %v1249_v49  ;;  %v1276_v49 = vsel %vm1233_vm2, %v9756_v45, 0.0  ;;  %v9770_v52 = vpop.permute.xlu1 %2214 }
 0x29a   : > { %1247 = vadd.xlane.f32.xlu0 %v1246_v53  ;;  %v9774_v53 = vpop.permute.xlu0 %2212  ;;  %v9778_v54 = vpop.permute.xlu1 %2117 }
 0x29e   : > { %v9780_v56 = vpop.permute.xlu0 %2119  ;;  %v9784_v58 = vpop.permute.xlu1 %2305 }
 0x29f   : > { %11360 = vst [vmem:[#allocation13_spill] sm:$0xff] %v9780_v56  ;;  %11361 = vst [vmem:[#allocation14_spill] sm:$0xff] %v9784_v58 }
 0x2a2   : > { %v9790_v59 = vpop.permute.xlu0 %1591 }
 0x2aa   : > { %1256 = vadd.xlane.f32.xlu1 %v1255_v61  ;;  %v9796_v61 = vpop.permute.xlu1 %2208 }
 0x2ae   : > { %1253 = vadd.xlane.f32.xlu1 %v1252_v0  ;;  %v9798_v0 = vpop.permute.xlu0 %1939 }
 0x2b0   : > { %2303 = vrot.lane.b32.xlu0 %v9530_v30, %s9267_s9 }
 0x2b2   : > { %1268 = vadd.xlane.f32.xlu1 %v1267_v2 }
 0x2b6   : > { %1265 = vadd.xlane.f32.xlu1 %v1264_v4 }
 0x2c7   : > { %2299 = vrot.lane.b32.xlu1 %v9530_v30, %s9268_s10 }
 0x2cf   : > { %1280 = vadd.xlane.f32.xlu0 %v1279_v12 }
 0x2e5   : > { %2210 = vrot.lane.b32.xlu0 %v9514_v26, %s9268_s10 }
 0x2e9   : > { %2394 = vrot.lane.b32.xlu0 %v9508_v24, %s9267_s9 }
 0x2eb   : > { %1277 = vadd.xlane.f32.xlu1 %v1276_v49 }
 0x2ed   : > { %2301 = vrot.lane.b32.xlu0 %v9524_v29, %s9268_s10 }
 0x2f1   : > { %2485 = vrot.lane.b32.xlu0 %v9532_v31, %s9267_s9 }
 0x2f5   : > { %2392 = vrot.lane.b32.xlu0 %v9498_v22, %s9268_s10 }
 0x2f6   : > { %v1239_v2 = vpop.xlane.xlu1 %1238 }
 0x2f7   : > { %v1283_v5 = vadd.f32 1e-08, %v1239_v2 }
 0x2f9   : > { %2576 = vrot.lane.b32.xlu0 %v9544_v33, %s9267_s9  ;;  %8806 = vrcp.f32 %v1283_v5 }
 0x2fc   : > { %2487 = vrot.lane.b32.xlu1 %v9522_v28, %s9267_s9 }
 0x2fd   : > { %2483 = vrot.lane.b32.xlu0 %v9522_v28, %s9268_s10 }
 0x2fe   : > { %v1245_v19 = vpop.xlane.xlu1 %1244 }
 0x2ff   : > { %v1285_v2 = vadd.f32 1e-08, %v1245_v19 }
 0x300   : > { %2390 = vrot.lane.b32.xlu1 %v9508_v24, %s9268_s10 }
 0x301   : > { %2574 = vrot.lane.b32.xlu0 %v9538_v32, %s9268_s10 }
 0x304   : > { %2578 = vrot.lane.b32.xlu1 %v9538_v32, %s9267_s9 }
 0x305   : > { %2663 = vrot.lane.b32.xlu0 %v9556_v35, %s9268_s10 }
 0x307   : > { %v1263_v4 = vpop.xlane.xlu0 %1262 }
 0x308   : > { %2481 = vrot.lane.b32.xlu1 %v9532_v31, %s9268_s10 }
 0x309   : > { %2882 = vrot.lane.b32.xlu0 %v9496_v21, %s9269_s12 }
 0x30b   : > { %v1236_v7 = vpop.xlane.xlu0 %1235 }
 0x30c   : > { %v1282_v12 = vadd.f32 1e-08, %v1236_v7  ;;  %2669 = vrot.lane.b32.xlu1 %v9550_v34, %s9267_s9 }
 0x30d   : > { %2969 = vrot.lane.b32.xlu0 %v9510_v25, %s9269_s12 }
 0x30e   : > { %8808 = vrcp.f32 %v1282_v12  ;;  %v8807_v12 = vpop.eup %8806 }
 0x30f   : > { %v1260_v17 = vpop.xlane.xlu0 %1259  ;;  %8810 = vrcp.f32 %v1285_v2 }
 0x310   : > { %2572 = vrot.lane.b32.xlu1 %v9544_v33, %s9268_s10 }
 0x311   : > { %3145 = vrot.lane.b32.xlu0 %v9524_v29, %s9269_s12 }
 0x313   : > { %v1275_v49 = vpop.xlane.xlu0 %1274 }
 0x314   : > { %2667 = vrot.lane.b32.xlu1 %v9556_v35, %s9267_s9 }
 0x315   : > { %3143 = vrot.lane.b32.xlu0 %v9530_v30, %s9269_s12 }
 0x317   : > { %v1242_v5 = vpop.xlane.xlu0 %1241 }
 0x318   : > { %v1284_v7 = vadd.f32 1e-08, %v1242_v5  ;;  %2665 = vrot.lane.b32.xlu1 %v9550_v34, %s9268_s10  ;;  %v1315_v5 = vmul.f32 %v8807_v12, %v9666_v63  ;;  %s7642_s10 = sshll.u32 %s9446_s30, 3 }
 0x319   : > { %3319 = vrot.lane.b32.xlu0 %v9522_v28, %s9269_s12  ;;  %v1290_v28 = vadd.f32 1e-08, %v1260_v17 }
 0x31a   : > { %8812 = vrcp.f32 %v1284_v7 }
 0x31b   : > { %v8809_v56 = vpop.eup %8808  ;;  %v1272_v58 = vpop.xlane.xlu0 %1271  ;;  %8814 = vrcp.f32 %v1290_v28  ;;  %v1295_v28 = vadd.f32 1e-08, %v1275_v49 }
 0x31c   : > { %2884 = vrot.lane.b32.xlu1 %v9492_v20, %s9269_s12  ;;  %v1314_v19 = vmul.f32 %v8809_v56, %v9678_v16  ;;  %v8811_v56 = vpop.eup %8810  ;;  %v1294_v17 = vadd.f32 1e-08, %v1272_v58 }
 0x31d   : > { %3317 = vrot.lane.b32.xlu0 %v9532_v31, %s9269_s12 }
 0x31e   : > { %8263 = vmatprep.mubr.msk.f32.mxu0 %vm1233_vm2, %v1314_v19 }
 0x31f   : > { %v1251_v2 = vpop.xlane.xlu0 %1250  ;;  %8264 = vmatmul.mubr.msk.f32.vlgmr.msra.gmra.mxu0 %vm1233_vm2, %v1315_v5 }
 0x320   : > { %8274 = vmatpush3.msra.mxu0 %v9657_v55  ;;  %2971 = vrot.lane.b32.xlu1 %v9502_v23, %s9269_s12  ;;  %v1287_v7 = vadd.f32 1e-08, %v1251_v2  ;;  %v1291_v55 = vadd.f32 1e-08, %v1263_v4  ;;  %v1317_v4 = vmul.f32 %v8811_v56, %v9670_v6 }
 0x321   : > { %8275 = vmatprep.subr.mxu0 %v9726_v8  ;;  %3493 = vrot.lane.b32.xlu0 %v9550_v34, %s9269_s12 }
 0x322   : > { %8276 = vmatpush3.msra.mxu0 %v9726_v8  ;;  %8816 = vrcp.f32 %v1287_v7 }
 0x323   : > { %8287 = vmatprep.subr.mxu0 %v9728_v9  ;;  %v1248_v63 = vpop.xlane.xlu0 %1247 }
 0x324   : > { %v1286_v16 = vadd.f32 1e-08, %v1248_v63  ;;  %3058 = vrot.lane.b32.xlu1 %v9514_v26, %s9269_s12 }
 0x325   : > { %3491 = vrot.lane.b32.xlu0 %v9556_v35, %s9269_s12 }
 0x326   : > { %8818 = vrcp.f32 %v1286_v16 }
 0x327   : > { %v8813_v12 = vpop.eup %8812  ;;  %8820 = vrcp.f32 %v1291_v55 }
 0x328   : > { %3056 = vrot.lane.b32.xlu1 %v9520_v27, %s9269_s12  ;;  %v1316_v8 = vmul.f32 %v8813_v12, %v9692_v42  ;;  %8822 = vrcp.f32 %v1294_v17  ;;  %v9859_v42 = vpop.permute.xlu1 %2396  ;;  %v8815_v6 = vpop.eup %8814 }
 0x329   : > { %3675 = vrot.lane.b32.xlu0 %v9502_v23, %s9270_s13  ;;  %8824 = vrcp.f32 %v1295_v28  ;;  %v1322_v7 = vmul.f32 %v8815_v6, %v9682_v36 }
 0x32a   : > { %8270 = vmatprep.mubr.msk.f32.mxu1 %vm1233_vm2, %v1316_v8 }
 0x32b   : > { %8271 = vmatmul.mubr.msk.f32.vlgmr.msra.gmra.mxu1 %vm1233_vm2, %v1317_v4 }
 0x32c   : > { %8281 = vmatpush3.msra.mxu1 %v9663_v57  ;;  %3232 = vrot.lane.b32.xlu1 %v9498_v22, %s9269_s12 }
 0x32d   : > { %8282 = vmatprep.subr.mxu1 %v9790_v59  ;;  %3673 = vrot.lane.b32.xlu0 %v9510_v25, %s9270_s13 }
 0x32e   : > { %8283 = vmatpush3.msra.mxu1 %v9790_v59 }
 0x32f   : > { %8294 = vmatprep.subr.mxu1 %v9738_v14  ;;  %v8817_v57 = vpop.eup %8816 }
 0x330   : > { %3230 = vrot.lane.b32.xlu1 %v9508_v24, %s9269_s12  ;;  %v1319_v5 = vmul.f32 %v8817_v57, %v9700_v46 }
 0x331   : > { %3580 = vrot.lane.b32.xlu0 %v9492_v20, %s9271_s14 }
 0x333   : > { %v8819_v58 = vpop.eup %8818  ;;  %v1257_v49 = vpop.xlane.xlu1 %1256 }
 0x334   : > { %3406 = vrot.lane.b32.xlu1 %v9538_v32, %s9269_s12  ;;  %v1318_v59 = vmul.f32 %v8819_v58, %v9704_v50  ;;  %v1289_v19 = vadd.f32 1e-08, %v1257_v49  ;;  %v8821_v2 = vpop.eup %8820 }
 0x335   : > { %3764 = vrot.lane.b32.xlu0 %v9520_v27, %s9270_s13  ;;  %v8823_v63 = vpop.eup %8822  ;;  %v1323_v46 = vmul.f32 %v8821_v2, %v9674_v13  ;;  %v11363_v2 = vld [vmem:[#allocation13_spill] sm:$0xff] }
 0x336   : > { %8277 = vmatprep.mubr.msk.f32.mxu0 %vm1233_vm2, %v1318_v59  ;;  %8826 = vrcp.f32 %v1289_v19  ;;  %v8825_v55 = vpop.eup %8824  ;;  %v1326_v36 = vmul.f32 %v8823_v63, %v9696_v44 }
 0x337   : > { %8278 = vmatmul.mubr.msk.f32.vlgmr.msra.gmra.mxu0 %vm1233_vm2, %v1319_v5  ;;  %v1254_v16 = vpop.xlane.xlu1 %1253 }
 0x338   : > { %8288 = vmatpush3.msra.mxu0 %v9728_v9  ;;  %8291 = vmatprep.mubr.msk.f32.mxu0 %vm1233_vm2, %v1322_v7  ;;  %v1288_v50 = vadd.f32 1e-08, %v1254_v16 }
 0x339   : > { %8289 = vmatprep.subr.mxu0 %v9734_v11  ;;  %3671 = vrot.lane.b32.xlu0 %v9502_v23, %s9271_s14 }
 0x33a   : > { %8828 = vrcp.f32 %v1288_v50  ;;  %8290 = vmatpush3.msra.mxu0 %v9734_v11  ;;  %3404 = vrot.lane.b32.xlu1 %v9544_v33, %s9269_s12  ;;  %v1327_v11 = vmul.f32 %v8825_v55, %v9686_v40  ;;  %s7870_s12 = sshll.u32 %s9331_s22, 7  ;;  %s9279_s22 = smov [#allocation8]  }
 0x33b   : > { %8301 = vmatprep.subr.mxu0 %v9740_v15  ;;  %8292 = vmatmul.mubr.msk.f32.vlgmr.msra.gmra.mxu0 %vm1233_vm2, %v1323_v46  ;;  %v1269_v9 = vpop.xlane.xlu1 %1268 }
 0x33c   : > { %8302 = vmatpush3.msra.mxu0 %v9740_v15  ;;  %8305 = vmatprep.mubr.msk.f32.mxu0 %vm1233_vm2, %v1326_v36  ;;  %v1293_v13 = vadd.f32 1e-08, %v1269_v9 }
 0x33d   : > { %8303 = vmatprep.subr.mxu0 %v9744_v37  ;;  %3855 = vrot.lane.b32.xlu0 %v9530_v30, %s9270_s13 }
 0x33e   : > { %8304 = vmatpush3.msra.mxu0 %v9744_v37  ;;  %3584 = vrot.lane.b32.xlu1 %v9492_v20, %s9270_s13  ;;  %8830 = vrcp.f32 %v1293_v13 }
 0x33f   : > { %8315 = vmatprep.subr.msk.mxu0 %vm494_vm1, %v9748_v39  ;;  %8306 = vmatmul.mubr.msk.f32.vlgmr.msra.gmra.mxu0 %vm1233_vm2, %v1327_v11  ;;  %v1266_v44 = vpop.xlane.xlu1 %1265 }
 0x340   : > { %8316 = vmatpush3.xpose.msk.msra.mxu0 %vm494_vm1, %v9748_v39  ;;  %8319 = vmatprep.mubr.msk.f32.mxu0 %vm494_vm1, %v9762_v48  ;;  %v1292_v15 = vadd.f32 1e-08, %v1266_v44 }
 0x341   : > { %8317 = vmatprep.subr.msk.mxu0 %vm494_vm1, %v9752_v43 }
 0x342   : > { %8832 = vrcp.f32 %v1292_v15  ;;  %3582 = vrot.lane.b32.xlu1 %v9496_v21, %s9270_s13 }
 0x343   : > { %v8827_v40 = vpop.eup %8826 }
 0x344   : > { %8318 = vmatpush3.xpose.msk.msra.mxu0 %vm494_vm1, %v9752_v43  ;;  %v1321_v43 = vmul.f32 %v8827_v40, %v9708_v60 }
 0x345   : > { %8329 = vmatprep.subr.msk.mxu0 %vm494_vm1, %v9770_v52 }
 0x346   : > { %3578 = vrot.lane.b32.xlu1 %v9496_v21, %s9271_s14 }
 0x347   : > { %v8829_v37 = vpop.eup %8828  ;;  %8320 = vmatmul.mubr.msk.f32.vlgmr.msra.gmra.mxu0 %vm494_vm1, %v9766_v51 }
 0x348   : > { %8330 = vmatpush3.xpose.msk.msra.mxu0 %vm494_vm1, %v9770_v52  ;;  %8333 = vmatprep.mubr.msk.f32.mxu0 %vm494_vm1, %v9796_v61  ;;  %v1320_v39 = vmul.f32 %v8829_v37, %v9712_v62  ;;  %v2300_v52 = vpop.permute.xlu1 %2299 }
 0x349   : > { %8331 = vmatprep.subr.msk.mxu0 %vm494_vm1, %v9774_v53 }
 0x34a   : > { %3766 = vrot.lane.b32.xlu1 %v9514_v26, %s9270_s13  ;;  %8284 = vmatprep.mubr.msk.f32.mxu1 %vm1233_vm2, %v1320_v39 }
 0x34b   : > { %8285 = vmatmul.mubr.msk.f32.vlgmr.msra.gmra.mxu1 %vm1233_vm2, %v1321_v43  ;;  %v8831_v62 = vpop.eup %8830 }
 0x34c   : > { %8332 = vmatpush3.xpose.msk.msra.mxu0 %vm494_vm1, %v9774_v53  ;;  %8295 = vmatpush3.msra.mxu1 %v9738_v14  ;;  %v1325_v51 = vmul.f32 %v8831_v62, %v9716_v1  ;;  %v2304_v14 = vpop.permute.xlu0 %2303 }
 0x34d   : > { %8343 = vmatprep.subr.msk.mxu0 %vm494_vm1, %v9859_v42  ;;  %8296 = vmatprep.subr.mxu1 %v9742_v18 }
 0x34e   : > { %3669 = vrot.lane.b32.xlu1 %v9510_v25, %s9271_s14  ;;  %8297 = vmatpush3.msra.mxu1 %v9742_v18 }
 0x34f   : > { %v8833_v60 = vpop.eup %8832  ;;  %8308 = vmatprep.subr.mxu1 %v9746_v38 }
 0x350   : > { %v1324_v48 = vmul.f32 %v8833_v60, %v9722_v3 }
 0x352   : > { %3857 = vrot.lane.b32.xlu1 %v9524_v29, %s9270_s13  ;;  %8298 = vmatprep.mubr.msk.f32.mxu1 %vm1233_vm2, %v1324_v48 }
 0x353   : > { %8299 = vmatmul.mubr.msk.f32.vlgmr.msra.gmra.mxu1 %vm1233_vm2, %v1325_v51 }
 0x354   : > { %8309 = vmatpush3.msra.mxu1 %v9746_v38 }
 0x355   : > { %8310 = vmatprep.subr.mxu1 %v9798_v0 }
 0x356   : > { %3760 = vrot.lane.b32.xlu1 %v9520_v27, %s9271_s14  ;;  %8311 = vmatpush3.msra.mxu1 %v9798_v0 }
 0x357   : > { %8322 = vmatprep.subr.msk.mxu1 %vm494_vm1, %v9750_v41 }
 0x358   : > { %v1281_v1 = vpop.xlane.xlu0 %1280 }
 0x359   : > { %v1297_v53 = vadd.f32 1e-08, %v1281_v1 }
 0x35a   : > { %3948 = vrot.lane.b32.xlu1 %v9498_v22, %s9270_s13 }
 0x35b   : > { %8834 = vrcp.f32 %v1297_v53 }
 0x35c   : > { %v2211_v3 = vpop.permute.xlu0 %2210 }
 0x35d   : > { %8334 = vmatmul.mubr.msk.f32.vlgmr.msra.gmra.mxu0 %vm494_vm1, %v2211_v3 }
 0x35e   : > { %8344 = vmatpush3.xpose.msk.msra.mxu0 %vm494_vm1, %v9859_v42 }
 0x360   : > { %v2395_v18 = vpop.permute.xlu0 %2394 }
 0x361   : > { %8345 = vmatprep.subr.msk.mxu0 %vm494_vm1, %v2395_v18 }
 0x362   : > { %8346 = vmatpush3.xpose.msk.msra.mxu0 %vm494_vm1, %v2395_v18 }
 0x364   : > { %v2302_v38 = vpop.permute.xlu0 %2301 }
 0x368   : > { %v2486_v0 = vpop.permute.xlu0 %2485  ;;  %v8835_v42 = vpop.eup %8834 }
 0x369   : > { %v1329_v49 = vmul.f32 %v8835_v42, %v9732_v10  ;;  %v11362_v10 = vld [vmem:[#allocation14_spill] sm:$0xff] }
 0x36c   : > { %v2393_v12 = vpop.permute.xlu0 %2392 }
 0x370   : > { %v2577_v4 = vpop.permute.xlu0 %2576 }
 0x374   : > { %v1278_v61 = vpop.xlane.xlu1 %1277  ;;  %v2484_v59 = vpop.permute.xlu0 %2483 }
 0x375   : > { %v1296_v56 = vadd.f32 1e-08, %v1278_v61 }
 0x377   : > { %8836 = vrcp.f32 %v1296_v56 }
 0x378   : > { %v2488_v17 = vpop.permute.xlu1 %2487  ;;  %v2575_v5 = vpop.permute.xlu0 %2574 }
 0x37c   : > { %v2391_v8 = vpop.permute.xlu1 %2390 }
 0x37d   : > { %8347 = vmatprep.mubr.msk.f32.mxu0 %vm494_vm1, %v2391_v8 }
 0x37e   : > { %8348 = vmatmul.mubr.msk.f32.vlgmr.msra.gmra.mxu0 %vm494_vm1, %v2393_v12 }
 0x380   : > { %v2579_v28 = vpop.permute.xlu1 %2578 }
 0x381   : > { %8357 = vmatprep.subr.msk.mxu0 %vm494_vm1, %v2579_v28 }
 0x382   : > { %8358 = vmatpush3.xpose.msk.msra.mxu0 %vm494_vm1, %v2579_v28 }
 0x383   : > { %8359 = vmatprep.subr.msk.mxu0 %vm494_vm1, %v2577_v4 }
 0x384   : > { %v8837_v6 = vpop.eup %8836  ;;  %v2482_v57 = vpop.permute.xlu1 %2481 }
 0x385   : > { %v1328_v58 = vmul.f32 %v8837_v6, %v9756_v45 }
 0x386   : > { %8360 = vmatpush3.xpose.msk.msra.mxu0 %vm494_vm1, %v2577_v4 }
 0x387   : > { %8312 = vmatprep.mubr.msk.f32.mxu1 %vm1233_vm2, %v1328_v58 }
 0x388   : > { %8313 = vmatmul.mubr.msk.f32.vlgmr.msra.gmra.mxu1 %vm1233_vm2, %v1329_v49  ;;  %v2670_v19 = vpop.permute.xlu1 %2669 }
 0x389   : > { %8323 = vmatpush3.xpose.msk.msra.mxu1 %vm494_vm1, %v9750_v41  ;;  %8326 = vmatprep.mubr.msk.f32.mxu1 %vm494_vm1, %v9778_v54 }
 0x38a   : > { %8324 = vmatprep.subr.msk.mxu1 %vm494_vm1, %v9758_v47 }
 0x38c   : > { %v2573_v45 = vpop.permute.xlu1 %2572 }
 0x38d   : > { %8325 = vmatpush3.xpose.msk.msra.mxu1 %vm494_vm1, %v9758_v47  ;;  %8361 = vmatprep.mubr.msk.f32.mxu0 %vm494_vm1, %v2573_v45  ;;  %v2664_v47 = vpop.permute.xlu0 %2663 }
 0x38e   : > { %8336 = vmatprep.subr.msk.mxu1 %vm494_vm1, %v11362_v10  ;;  %8362 = vmatmul.mubr.msk.f32.vlgmr.msra.gmra.mxu0 %vm494_vm1, %v2575_v5 }
 0x390   : > { %8327 = vmatmul.mubr.msk.f32.vlgmr.msra.gmra.mxu1 %vm494_vm1, %v11363_v2  ;;  %v2668_v41 = vpop.permute.xlu1 %2667 }
 0x391   : > { %8337 = vmatpush3.xpose.msk.msra.mxu1 %vm494_vm1, %v11362_v10  ;;  %8340 = vmatprep.mubr.msk.f32.mxu1 %vm494_vm1, %v2300_v52  ;;  %v2883_v63 = vpop.permute.xlu0 %2882 }
 0x392   : > { %8338 = vmatprep.subr.msk.mxu1 %vm494_vm1, %v2304_v14 }
 0x394   : > { %v2666_v54 = vpop.permute.xlu1 %2665 }
 0x395   : > { %8339 = vmatpush3.xpose.msk.msra.mxu1 %vm494_vm1, %v2304_v14  ;;  %v2970_v46 = vpop.permute.xlu0 %2969 }
 0x396   : > { %8350 = vmatprep.subr.msk.mxu1 %vm494_vm1, %v2488_v17 }
 0x398   : > { %8341 = vmatmul.mubr.msk.f32.vlgmr.msra.gmra.mxu1 %vm494_vm1, %v2302_v38  ;;  %v2885_v7 = vpop.permute.xlu1 %2884 }
 0x399   : > { %8351 = vmatpush3.xpose.msk.msra.mxu1 %vm494_vm1, %v2488_v17  ;;  %8354 = vmatprep.mubr.msk.f32.mxu1 %vm494_vm1, %v2482_v57  ;;  %v10002_v55 = vpop.permute.xlu0 %3145 }
 0x39a   : > { %8352 = vmatprep.subr.msk.mxu1 %vm494_vm1, %v2486_v0  ;;  %8371 = vmatprep.subr.mxu0 %v2885_v7 }
 0x39b   : > { %8372 = vmatpush3.msra.mxu0 %v2885_v7 }
 0x39c   : > { %8373 = vmatprep.subr.mxu0 %v2883_v63  ;;  %v2972_v16 = vpop.permute.xlu1 %2971 }
 0x39d   : > { %8353 = vmatpush3.xpose.msk.msra.mxu1 %vm494_vm1, %v2486_v0  ;;  %8374 = vmatpush3.msra.mxu0 %v2883_v63 }
 0x39e   : > { %8364 = vmatprep.subr.msk.mxu1 %vm494_vm1, %v2670_v19 }
 0x3a0   : > { %8355 = vmatmul.mubr.msk.f32.vlgmr.msra.gmra.mxu1 %vm494_vm1, %v2484_v59  ;;  %v9994_v50 = vpop.permute.xlu1 %3058 }
 0x3a1   : > { %8365 = vmatpush3.xpose.msk.msra.mxu1 %vm494_vm1, %v2670_v19  ;;  %8368 = vmatprep.mubr.msk.f32.mxu1 %vm494_vm1, %v2664_v47 }
 0x3a2   : > { %8366 = vmatprep.subr.msk.mxu1 %vm494_vm1, %v2668_v41  ;;  %8385 = vmatprep.subr.mxu0 %v9994_v50 }
 0x3a4   : > { %v10057_v7 = vpop.permute.xlu1 %3056 }
 0x3a5   : > { %8367 = vmatpush3.xpose.msk.msra.mxu1 %vm494_vm1, %v2668_v41 }
 0x3a6   : > { %8378 = vmatprep.subr.mxu1 %v2972_v16 }
 0x3a8   : > { %8369 = vmatmul.mubr.msk.f32.vlgmr.msra.gmra.mxu1 %vm494_vm1, %v2666_v54 }
 0x3a9   : > { %8379 = vmatpush3.msra.mxu1 %v2972_v16 }
 0x3aa   : > { %8380 = vmatprep.subr.mxu1 %v2970_v46 }
 0x3ab   : > { %8381 = vmatpush3.msra.mxu1 %v2970_v46 }
 0x3ac   : > { %8392 = vmatprep.subr.mxu1 %v10002_v55 }
 0x3df   : > { %v10005_v36 = vpop.f32.mrf.mxu0 }
 0x3e0   : > { %11364 = vst [vmem:[#allocation14_spill] sm:$0xff] %v10005_v36 }
 0x3e1   : > { %v10007_v9 = vpop.f32.mrf.mxu0 }
 0x3e2   : > { %11365 = vst [vmem:[#allocation13_spill] sm:$0xff] %v10007_v9 }
 0x3eb   : > { %v10037_v17 = vpop.f32.mrf.mxu1 }
 0x3ec   : > { %11372 = vst [vmem:[#allocation21_spill] sm:$0xff] %v10037_v17 }
 0x3ed   : > { %v10039_v12 = vpop.f32.mrf.mxu1 }
 0x3ee   : > { %11373 = vst [vmem:[#allocation22_spill] sm:$0xff] %v10039_v12 }
 0x3f7   : > { %v10009_v13 = vpop.f32.mrf.mxu0 }
 0x3f8   : > { %11366 = vst [vmem:[#allocation15_spill] sm:$0xff] %v10009_v13 }
 0x3f9   : > { %v10011_v11 = vpop.f32.mrf.mxu0 }
 0x3fa   : > { %11367 = vst [vmem:[#allocation16_spill] sm:$0xff] %v10011_v11 }
 0x3fb   : > { %v10013_v44 = vpop.f32.mrf.mxu0 }
 0x3fc   : > { %11368 = vst [vmem:[#allocation17_spill] sm:$0xff] %v10013_v44 }
 0x3fd   : > { %v10015_v15 = vpop.f32.mrf.mxu0 }
 0x3fe   : > { %11369 = vst [vmem:[#allocation18_spill] sm:$0xff] %v10015_v15 }
 0x3ff   : > { %v10017_v40 = vpop.f32.mrf.mxu0 }
 0x400   : > { %11370 = vst [vmem:[#allocation19_spill] sm:$0xff] %v10017_v40 }
 0x401   : > { %v10019_v37 = vpop.f32.mrf.mxu0 }
 0x402   : > { %11371 = vst [vmem:[#allocation20_spill] sm:$0xff] %v10019_v37 }
 0x407   : > { %v8321_v39 = vpop.f32.mrf.mxu0 }
 0x408   : > { %v2756_v43 = vmul.f32 1.442695, %v8321_v39 }
 0x409   : > { %v2108_v62 = vpop.f32.mrf.mxu0 }
 0x40a   : > { %8838 = vpow2.f32 %v2756_v43  ;;  %v2754_v60 = vmul.f32 1.442695, %v2108_v62 }
 0x40b   : > { %v10041_v8 = vpop.f32.mrf.mxu1 }
 0x40c   : > { %8840 = vpow2.f32 %v2754_v60  ;;  %11374 = vst [vmem:[#allocation23_spill] sm:$0xff] %v10041_v8 }
 0x40d   : > { %v10043_v42 = vpop.f32.mrf.mxu1 }
 0x40e   : > { %11375 = vst [vmem:[#allocation24_spill] sm:$0xff] %v10043_v42 }
 0x413   : > { %v10045_v6 = vpop.f32.mrf.mxu1 }
 0x414   : > { %11376 = vst [vmem:[#allocation25_spill] sm:$0xff] %v10045_v6 }
 0x415   : > { %v10047_v57 = vpop.f32.mrf.mxu1 }
 0x416   : > { %11377 = vst [vmem:[#allocation26_spill] sm:$0xff] %v10047_v57 }
 0x417   : > { %v10021_v48 = vpop.eup %8838 }
 0x418   : > { %v2789_v51 = vsel %vm1233_vm2, %v10021_v48, 0.0 }
 0x419   : > { %v10025_v14 = vpop.eup %8840  ;;  %2790 = vadd.xlane.f32.xlu1 %v2789_v51  ;;  %v10059_v51 = vpop.permute.xlu1 %3232 }
 0x41a   : > { %v2786_v1 = vsel %vm1233_vm2, %v10025_v14, 0.0 }
 0x41b   : > { %2787 = vadd.xlane.f32.xlu0 %v2786_v1 }
 0x41d   : > { %v8335_v3 = vpop.f32.mrf.mxu0 }
 0x41e   : > { %v2764_v18 = vmul.f32 1.442695, %v8335_v3 }
 0x41f   : > { %v2290_v38 = vpop.f32.mrf.mxu0 }
 0x420   : > { %8842 = vpow2.f32 %v2764_v18  ;;  %v2762_v52 = vmul.f32 1.442695, %v2290_v38 }
 0x422   : > { %8844 = vpow2.f32 %v2762_v52 }
 0x42d   : > { %v10029_v53 = vpop.eup %8842 }
 0x42e   : > { %v2801_v61 = vsel %vm1233_vm2, %v10029_v53, 0.0 }
 0x42f   : > { %v10033_v0 = vpop.eup %8844  ;;  %2802 = vadd.xlane.f32.xlu0 %v2801_v61  ;;  %v10067_v61 = vpop.permute.xlu1 %3230 }
 0x430   : > { %v2798_v56 = vsel %vm1233_vm2, %v10033_v0, 0.0 }
 0x433   : > { %2799 = vadd.xlane.f32.xlu0 %v2798_v56 }
 0x43e   : > { %v8349_v28 = vpop.f32.mrf.mxu0 }
 0x43f   : > { %v2772_v4 = vmul.f32 1.442695, %v8349_v28 }
 0x440   : > { %v2472_v45 = vpop.f32.mrf.mxu0 }
 0x441   : > { %8846 = vpow2.f32 %v2772_v4  ;;  %v2770_v41 = vmul.f32 1.442695, %v2472_v45  ;;  %v10073_v45 = vpop.permute.xlu0 %3143 }
 0x448   : > { %v10049_v58 = vpop.f32.mrf.mxu1 }
 0x449   : > { %11378 = vst [vmem:[#allocation27_spill] sm:$0xff] %v10049_v58 }
 0x44a   : > { %v10053_v59 = vpop.f32.mrf.mxu1 }
 0x44b   : > { %11379 = vst [vmem:[#allocation28_spill] sm:$0xff] %v10053_v59 }
 0x44e   : > { %v10051_v49 = vpop.eup %8846  ;;  %v8363_v54 = vpop.f32.mrf.mxu0 }
 0x44f   : > { %v2813_v19 = vsel %vm1233_vm2, %v10051_v49, 0.0  ;;  %v2780_v63 = vmul.f32 1.442695, %v8363_v54 }
 0x450   : > { %v8328_v5 = vpop.f32.mrf.mxu1  ;;  %2814 = vadd.xlane.f32.xlu0 %v2813_v19  ;;  %v2654_v16 = vpop.f32.mrf.mxu0 }
 0x451   : > { %v2760_v10 = vmul.f32 1.442695, %v8328_v5  ;;  %v2778_v62 = vmul.f32 1.442695, %v2654_v16 }
 0x452   : > { %v2199_v2 = vpop.f32.mrf.mxu1 }
 0x453   : > { %8848 = vpow2.f32 %v2760_v10  ;;  %v2758_v47 = vmul.f32 1.442695, %v2199_v2 }
 0x455   : > { %8850 = vpow2.f32 %v2758_v47 }
 0x456   : > { %8852 = vpow2.f32 %v2770_v41  ;;  %v10081_v41 = vpop.permute.xlu1 %3406 }
 0x457   : > { %8854 = vpow2.f32 %v2780_v63 }
 0x458   : > { %v8342_v46 = vpop.f32.mrf.mxu1 }
 0x459   : > { %v2768_v39 = vmul.f32 1.442695, %v8342_v46  ;;  %v10087_v46 = vpop.permute.xlu0 %3319 }
 0x45a   : > { %v2381_v43 = vpop.f32.mrf.mxu1 }
 0x45b   : > { %8856 = vpow2.f32 %v2768_v39  ;;  %v2766_v60 = vmul.f32 1.442695, %v2381_v43 }
 0x45d   : > { %8858 = vpow2.f32 %v2766_v60  ;;  %v10095_v60 = vpop.permute.xlu1 %3404 }
 0x45e   : > { %8860 = vpow2.f32 %v2778_v62 }
 0x460   : > { %v10061_v1 = vpop.eup %8848  ;;  %v8356_v3 = vpop.f32.mrf.mxu1 }
 0x461   : > { %v2776_v18 = vmul.f32 1.442695, %v8356_v3  ;;  %v2795_v38 = vsel %vm1233_vm2, %v10061_v1, 0.0 }
 0x462   : > { %v10065_v52 = vpop.eup %8850  ;;  %2796 = vadd.xlane.f32.xlu1 %v2795_v38  ;;  %v2563_v56 = vpop.f32.mrf.mxu1 }
 0x463   : > { %8862 = vpow2.f32 %v2776_v18  ;;  %v2774_v28 = vmul.f32 1.442695, %v2563_v56  ;;  %v2792_v4 = vsel %vm1233_vm2, %v10065_v52, 0.0  ;;  %v10071_v19 = vpop.eup %8852  ;;  %v10101_v38 = vpop.permute.xlu0 %3317 }
 0x464   : > { %2793 = vadd.xlane.f32.xlu0 %v2792_v4  ;;  %v10075_v5 = vpop.eup %8854  ;;  %v2810_v10 = vsel %vm1233_vm2, %v10071_v19, 0.0  ;;  %v10107_v4 = vpop.permute.xlu1 %3584 }
 0x465   : > { %8864 = vpow2.f32 %v2774_v28  ;;  %v2825_v39 = vsel %vm1233_vm2, %v10075_v5, 0.0 }
 0x468   : > { %v10079_v2 = vpop.eup %8856  ;;  %2811 = vadd.xlane.f32.xlu0 %v2810_v10  ;;  %v8370_v54 = vpop.f32.mrf.mxu1 }
 0x469   : > { %v2784_v47 = vmul.f32 1.442695, %v8370_v54  ;;  %v2807_v63 = vsel %vm1233_vm2, %v10079_v2, 0.0  ;;  %v10111_v54 = vpop.permute.xlu0 %3493 }
 0x46a   : > { %v10085_v16 = vpop.eup %8858  ;;  %2808 = vadd.xlane.f32.xlu1 %v2807_v63  ;;  %v2745_v9 = vpop.f32.mrf.mxu1 }
 0x46b   : > { %8866 = vpow2.f32 %v2784_v47  ;;  %v10091_v43 = vpop.eup %8860  ;;  %v2804_v62 = vsel %vm1233_vm2, %v10085_v16, 0.0  ;;  %v2782_v40 = vmul.f32 1.442695, %v2745_v9 }
 0x46c   : > { %2826 = vadd.xlane.f32.xlu0 %v2825_v39  ;;  %v2822_v3 = vsel %vm1233_vm2, %v10091_v43, 0.0  ;;  %v10117_v39 = vpop.permute.xlu1 %3582 }
 0x46d   : > { %8868 = vpow2.f32 %v2782_v40  ;;  %v11380_v40 = vld [vmem:[#allocation12_spill] sm:$0xff] }
 0x46e   : > { %2805 = vadd.xlane.f32.xlu1 %v2804_v62  ;;  %v10119_v62 = vpop.permute.xlu0 %3491 }
 0x470   : > { %v10099_v18 = vpop.eup %8862  ;;  %2823 = vadd.xlane.f32.xlu0 %v2822_v3  ;;  %v10121_v3 = vpop.permute.xlu1 %3578 }
 0x471   : > { %v2819_v56 = vsel %vm1233_vm2, %v10099_v18, 0.0 }
 0x472   : > { %v10105_v28 = vpop.eup %8864  ;;  %2820 = vadd.xlane.f32.xlu1 %v2819_v56  ;;  %v10123_v56 = vpop.permute.xlu0 %3675 }
 0x473   : > { %v2816_v10 = vsel %vm1233_vm2, %v10105_v28, 0.0 }
 0x474   : > { %v10125_v58 = vpop.permute.xlu1 %3766 }
 0x476   : > { %2817 = vadd.xlane.f32.xlu1 %v2816_v10  ;;  %v10129_v10 = vpop.permute.xlu0 %3673 }
 0x478   : > { %v10113_v47 = vpop.eup %8866  ;;  %v10131_v59 = vpop.permute.xlu1 %3669 }
 0x479   : > { %v2831_v63 = vsel %vm1233_vm2, %v10113_v47, 0.0 }
 0x47a   : > { %2832 = vadd.xlane.f32.xlu0 %v2831_v63  ;;  %v10133_v36 = vpop.permute.xlu0 %3580  ;;  %v10159_v13 = vpop.eup %8868 }
 0x47b   : > { %v2828_v12 = vsel %vm1233_vm2, %v10159_v13, 0.0 }
 0x47c   : > { %v10137_v63 = vpop.permute.xlu1 %3857 }
 0x47e   : > { %v10139_v37 = vpop.permute.xlu0 %3764 }
 0x480   : > { %v10143_v57 = vpop.permute.xlu1 %3760 }
 0x482   : > { %v10147_v6 = vpop.permute.xlu0 %3671 }
 0x484   : > { %v10151_v15 = vpop.permute.xlu1 %3948 }
 0x486   : > { %v10153_v44 = vpop.permute.xlu0 %3855 }
 0x487   : > { %3851 = vrot.lane.b32.xlu1 %v9530_v30, %s9271_s14 }
 0x490   : > { %3762 = vrot.lane.b32.xlu0 %v9514_v26, %s9271_s14 }
 0x494   : > { %3946 = vrot.lane.b32.xlu0 %v9508_v24, %s9270_s13 }
 0x498   : > { %3853 = vrot.lane.b32.xlu0 %v9524_v29, %s9271_s14 }
 0x49c   : > { %4037 = vrot.lane.b32.xlu0 %v9532_v31, %s9270_s13 }
 0x4a0   : > { %3944 = vrot.lane.b32.xlu0 %v9498_v22, %s9271_s14 }
 0x4a2   : > { %v2791_v42 = vpop.xlane.xlu1 %2790 }
 0x4a3   : > { %v2835_v9 = vadd.f32 1e-08, %v2791_v42 }
 0x4a4   : > { %v2788_v8 = vpop.xlane.xlu0 %2787  ;;  %4128 = vrot.lane.b32.xlu0 %v9544_v33, %s9270_s13 }
 0x4a5   : > { %v2834_v11 = vadd.f32 1e-08, %v2788_v8  ;;  %8870 = vrcp.f32 %v2835_v9 }
 0x4a7   : > { %8872 = vrcp.f32 %v2834_v11 }
 0x4a8   : > { %4035 = vrot.lane.b32.xlu0 %v11380_v40, %s9271_s14 }
 0x4ab   : > { %2829 = vadd.xlane.f32.xlu1 %v2828_v12 }
 0x4ac   : > { %4126 = vrot.lane.b32.xlu0 %v9538_v32, %s9271_s14 }
 0x4b0   : > { %4215 = vrot.lane.b32.xlu0 %v9556_v35, %s9271_s14 }
 0x4b2   : > { %v8871_v42 = vpop.eup %8870 }
 0x4b3   : > { %v2867_v8 = vmul.f32 %v8871_v42, %v10021_v48 }
 0x4b4   : > { %v8873_v17 = vpop.eup %8872  ;;  %4434 = vrot.lane.b32.xlu0 %v9496_v21, %s9272_s7 }
 0x4b5   : > { %v2866_v11 = vmul.f32 %v8873_v17, %v10025_v14 }
 0x4b7   : > { %8375 = vmatprep.mubr.msk.f32.mxu0 %vm1233_vm2, %v2866_v11 }
 0x4b8   : > { %8376 = vmatmul.mubr.msk.f32.vlgmr.msra.gmra.mxu0 %vm1233_vm2, %v2867_v8  ;;  %v2803_v12 = vpop.xlane.xlu0 %2802  ;;  %4521 = vrot.lane.b32.xlu0 %v9510_v25, %s9272_s7 }
 0x4b9   : > { %8386 = vmatpush3.msra.mxu0 %v9994_v50  ;;  %v2839_v9 = vadd.f32 1e-08, %v2803_v12 }
 0x4ba   : > { %8387 = vmatprep.subr.mxu0 %v10057_v7 }
 0x4bb   : > { %8388 = vmatpush3.msra.mxu0 %v10057_v7  ;;  %8874 = vrcp.f32 %v2839_v9 }
 0x4bc   : > { %8399 = vmatprep.subr.mxu0 %v10059_v51  ;;  %v2800_v14 = vpop.xlane.xlu0 %2799  ;;  %4697 = vrot.lane.b32.xlu0 %v9524_v29, %s9272_s7 }
 0x4bd   : > { %v2838_v48 = vadd.f32 1e-08, %v2800_v14  ;;  %4039 = vrot.lane.b32.xlu1 %v11380_v40, %s9270_s13 }
 0x4bf   : > { %8876 = vrcp.f32 %v2838_v48 }
 0x4c0   : > { %4695 = vrot.lane.b32.xlu0 %v9530_v30, %s9272_s7 }
 0x4c1   : > { %3942 = vrot.lane.b32.xlu1 %v9508_v24, %s9271_s14 }
 0x4c4   : > { %4871 = vrot.lane.b32.xlu0 %v11380_v40, %s9272_s7 }
 0x4c5   : > { %4130 = vrot.lane.b32.xlu1 %v9538_v32, %s9270_s13 }
 0x4c8   : > { %4869 = vrot.lane.b32.xlu0 %v9532_v31, %s9272_s7  ;;  %v8875_v50 = vpop.eup %8874 }
 0x4c9   : > { %4033 = vrot.lane.b32.xlu1 %v9532_v31, %s9271_s14  ;;  %v2871_v42 = vmul.f32 %v8875_v50, %v10029_v53 }
 0x4cc   : > { %v8877_v17 = vpop.eup %8876  ;;  %5045 = vrot.lane.b32.xlu0 %v9550_v34, %s9272_s7 }
 0x4cd   : > { %4221 = vrot.lane.b32.xlu1 %v9550_v34, %s9270_s13  ;;  %v2870_v7 = vmul.f32 %v8877_v17, %v10033_v0 }
 0x4cf   : > { %8389 = vmatprep.mubr.msk.f32.mxu0 %vm1233_vm2, %v2870_v7 }
 0x4d0   : > { %5043 = vrot.lane.b32.xlu0 %v9556_v35, %s9272_s7  ;;  %8390 = vmatmul.mubr.msk.f32.vlgmr.msra.gmra.mxu0 %vm1233_vm2, %v2871_v42 }
 0x4d1   : > { %4124 = vrot.lane.b32.xlu1 %v9544_v33, %s9271_s14  ;;  %8400 = vmatpush3.msra.mxu0 %v10059_v51 }
 0x4d2   : > { %8401 = vmatprep.subr.mxu0 %v10067_v61 }
 0x4d3   : > { %8402 = vmatpush3.msra.mxu0 %v10067_v61 }
 0x4d4   : > { %8413 = vmatprep.subr.mxu0 %v10081_v41  ;;  %5227 = vrot.lane.b32.xlu0 %v9502_v23, %s9273_s28 }
 0x4d5   : > { %4219 = vrot.lane.b32.xlu1 %v9556_v35, %s9270_s13  ;;  %s272_s13 = scalar_lea.vmem [#allocation8], %s7642_s10 }
 0x4d8   : > { %5132 = vrot.lane.b32.xlu0 %v9492_v20, %s9274_s11 }
 0x4d9   : > { %4217 = vrot.lane.b32.xlu1 %v9550_v34, %s9271_s14  ;;  %v2815_v53 = vpop.xlane.xlu0 %2814  ;;  %s7540_s14 = sshll.u32 %s272_s13, 4  ;;  %s7541_s14 = int_to_ptr.vmem [resolvable:$true] %s7540_s14 }
 0x4da   : > { %v2843_v8 = vadd.f32 1e-08, %v2815_v53 }
 0x4dc   : > { %5318 = vrot.lane.b32.xlu0 %v9514_v26, %s9273_s28 }
 0x4dd   : > { %4436 = vrot.lane.b32.xlu1 %v9492_v20, %s9272_s7 }
 0x4e0   : > { %5223 = vrot.lane.b32.xlu0 %v9502_v23, %s9274_s11 }
 0x4e1   : > { %4523 = vrot.lane.b32.xlu1 %v9502_v23, %s9272_s7 }
 0x4e4   : > { %5409 = vrot.lane.b32.xlu0 %v9524_v29, %s9273_s28 }
 0x4e5   : > { %4610 = vrot.lane.b32.xlu1 %v9514_v26, %s9272_s7 }
 0x4e8   : > { %5314 = vrot.lane.b32.xlu0 %v9514_v26, %s9274_s11 }
 0x4e9   : > { %4608 = vrot.lane.b32.xlu1 %v9520_v27, %s9272_s7 }
 0x4eb   : > { %v2797_v0 = vpop.xlane.xlu1 %2796 }
 0x4ec   : > { %v2837_v51 = vadd.f32 1e-08, %v2797_v0 }
 0x4ed   : > { %4784 = vrot.lane.b32.xlu1 %v9498_v22, %s9272_s7  ;;  %v2794_v61 = vpop.xlane.xlu0 %2793 }
 0x4ee   : > { %v2836_v11 = vadd.f32 1e-08, %v2794_v61  ;;  %8878 = vrcp.f32 %v2837_v51 }
 0x4f0   : > { %8880 = vrcp.f32 %v2836_v11 }
 0x4f1   : > { %4782 = vrot.lane.b32.xlu1 %v9508_v24, %s9272_s7  ;;  %v2812_v12 = vpop.xlane.xlu0 %2811  ;;  %8882 = vrcp.f32 %v2843_v8 }
 0x4f2   : > { %v2842_v9 = vadd.f32 1e-08, %v2812_v12 }
 0x4f3   : > { %v2809_v14 = vpop.xlane.xlu1 %2808 }
 0x4f4   : > { %8884 = vrcp.f32 %v2842_v9  ;;  %v2841_v48 = vadd.f32 1e-08, %v2809_v14 }
 0x4f5   : > { %4958 = vrot.lane.b32.xlu1 %v9538_v32, %s9272_s7  ;;  %v2827_v50 = vpop.xlane.xlu0 %2826 }
 0x4f6   : > { %v2847_v17 = vadd.f32 1e-08, %v2827_v50  ;;  %8886 = vrcp.f32 %v2841_v48 }
 0x4f7   : > { %v2806_v7 = vpop.xlane.xlu1 %2805 }
 0x4f8   : > { %v2840_v42 = vadd.f32 1e-08, %v2806_v7 }
 0x4f9   : > { %4956 = vrot.lane.b32.xlu1 %v9544_v33, %s9272_s7  ;;  %v2824_v53 = vpop.xlane.xlu0 %2823 }
 0x4fa   : > { %8888 = vrcp.f32 %v2840_v42  ;;  %v2846_v0 = vadd.f32 1e-08, %v2824_v53 }
 0x4fb   : > { %8890 = vrcp.f32 %v2847_v17  ;;  %v2821_v51 = vpop.xlane.xlu1 %2820  ;;  %v8879_v61 = vpop.eup %8878 }
 0x4fc   : > { %8892 = vrcp.f32 %v2846_v0  ;;  %v2845_v8 = vadd.f32 1e-08, %v2821_v51  ;;  %v2869_v14 = vmul.f32 %v8879_v61, %v10061_v1 }
 0x4fd   : > { %v8881_v11 = vpop.eup %8880  ;;  %5136 = vrot.lane.b32.xlu1 %v9492_v20, %s9273_s28 }
 0x4fe   : > { %v2868_v12 = vmul.f32 %v8881_v11, %v10065_v52  ;;  %v8883_v48 = vpop.eup %8882  ;;  %8894 = vrcp.f32 %v2845_v8 }
 0x4ff   : > { %v2818_v9 = vpop.xlane.xlu1 %2817  ;;  %v2875_v1 = vmul.f32 %v8883_v48, %v10051_v49 }
 0x500   : > { %v2844_v50 = vadd.f32 1e-08, %v2818_v9  ;;  %8382 = vmatprep.mubr.msk.f32.mxu1 %vm1233_vm2, %v2868_v12 }
 0x501   : > { %v8885_v7 = vpop.eup %8884  ;;  %5134 = vrot.lane.b32.xlu1 %v9496_v21, %s9273_s28  ;;  %8383 = vmatmul.mubr.msk.f32.vlgmr.msra.gmra.mxu1 %vm1233_vm2, %v2869_v14 }
 0x502   : > { %8896 = vrcp.f32 %v2844_v50  ;;  %8393 = vmatpush3.msra.mxu1 %v10002_v55  ;;  %v2874_v17 = vmul.f32 %v8885_v7, %v10071_v19 }
 0x503   : > { %8394 = vmatprep.subr.mxu1 %v10073_v45  ;;  %v8887_v52 = vpop.eup %8886 }
 0x504   : > { %8395 = vmatpush3.msra.mxu1 %v10073_v45  ;;  %8403 = vmatprep.mubr.msk.f32.mxu0 %vm1233_vm2, %v2874_v17  ;;  %v2873_v49 = vmul.f32 %v8887_v52, %v10079_v2 }
 0x505   : > { %5130 = vrot.lane.b32.xlu1 %v9496_v21, %s9274_s11  ;;  %8406 = vmatprep.subr.mxu1 %v10087_v46 }
 0x506   : > { %8404 = vmatmul.mubr.msk.f32.vlgmr.msra.gmra.mxu0 %vm1233_vm2, %v2875_v1 }
 0x507   : > { %v8889_v42 = vpop.eup %8888  ;;  %8414 = vmatpush3.msra.mxu0 %v10081_v41 }
 0x508   : > { %v8891_v55 = vpop.eup %8890  ;;  %8415 = vmatprep.subr.mxu0 %v10095_v60  ;;  %v2872_v19 = vmul.f32 %v8889_v42, %v10085_v16 }
 0x509   : > { %v8893_v45 = vpop.eup %8892  ;;  %8416 = vmatpush3.msra.mxu0 %v10095_v60  ;;  %5225 = vrot.lane.b32.xlu1 %v9510_v25, %s9273_s28  ;;  %v2879_v16 = vmul.f32 %v8891_v55, %v10075_v5 }
 0x50a   : > { %8427 = vmatprep.subr.msk.mxu0 %vm494_vm1, %v10107_v4  ;;  %8396 = vmatprep.mubr.msk.f32.mxu1 %vm1233_vm2, %v2872_v19  ;;  %v2878_v41 = vmul.f32 %v8893_v45, %v10091_v43  ;;  %v2833_v43 = vpop.xlane.xlu0 %2832 }
 0x50b   : > { %8397 = vmatmul.mubr.msk.f32.vlgmr.msra.gmra.mxu1 %vm1233_vm2, %v2873_v49  ;;  %v8895_v2 = vpop.eup %8894 }
 0x50c   : > { %8407 = vmatpush3.msra.mxu1 %v10087_v46  ;;  %8417 = vmatprep.mubr.msk.f32.mxu0 %vm1233_vm2, %v2878_v41  ;;  %v2877_v46 = vmul.f32 %v8895_v2, %v10099_v18 }
 0x50d   : > { %5221 = vrot.lane.b32.xlu1 %v9510_v25, %s9274_s11  ;;  %8408 = vmatprep.subr.mxu1 %v10101_v38 }
 0x50e   : > { %8409 = vmatpush3.msra.mxu1 %v10101_v38  ;;  %8418 = vmatmul.mubr.msk.f32.vlgmr.msra.gmra.mxu0 %vm1233_vm2, %v2879_v16  ;;  %v3763_v18 = vpop.permute.xlu0 %3762  ;;  %v2849_v38 = vadd.f32 1e-08, %v2833_v43 }
 0x50f   : > { %v8897_v60 = vpop.eup %8896  ;;  %8428 = vmatpush3.xpose.msk.msra.mxu0 %vm494_vm1, %v10107_v4  ;;  %8420 = vmatprep.subr.mxu1 %v10111_v54 }
 0x510   : > { %8429 = vmatprep.subr.msk.mxu0 %vm494_vm1, %v10117_v39  ;;  %8431 = vmatprep.mubr.msk.f32.mxu0 %vm494_vm1, %v10121_v3  ;;  %v2876_v5 = vmul.f32 %v8897_v60, %v10105_v28  ;;  %8898 = vrcp.f32 %v2849_v38 }
 0x511   : > { %5316 = vrot.lane.b32.xlu1 %v9520_v27, %s9273_s28 }
 0x512   : > { %8410 = vmatprep.mubr.msk.f32.mxu1 %vm1233_vm2, %v2876_v5 }
 0x513   : > { %8430 = vmatpush3.xpose.msk.msra.mxu0 %vm494_vm1, %v10117_v39  ;;  %8411 = vmatmul.mubr.msk.f32.vlgmr.msra.gmra.mxu1 %vm1233_vm2, %v2877_v46 }
 0x514   : > { %8441 = vmatprep.subr.msk.mxu0 %vm494_vm1, %v10125_v58  ;;  %8421 = vmatpush3.msra.mxu1 %v10111_v54 }
 0x515   : > { %5312 = vrot.lane.b32.xlu1 %v9520_v27, %s9274_s11  ;;  %8422 = vmatprep.subr.mxu1 %v10119_v62 }
 0x516   : > { %8432 = vmatmul.mubr.msk.f32.vlgmr.msra.gmra.mxu0 %vm494_vm1, %v10133_v36  ;;  %8423 = vmatpush3.msra.mxu1 %v10119_v62  ;;  %v3947_v36 = vpop.permute.xlu0 %3946 }
 0x517   : > { %8442 = vmatpush3.xpose.msk.msra.mxu0 %vm494_vm1, %v10125_v58  ;;  %8445 = vmatprep.mubr.msk.f32.mxu0 %vm494_vm1, %v10143_v57  ;;  %v3852_v58 = vpop.permute.xlu1 %3851 }
 0x518   : > { %8434 = vmatprep.subr.msk.mxu1 %vm494_vm1, %v10123_v56  ;;  %8443 = vmatprep.subr.msk.mxu0 %vm494_vm1, %v10139_v37 }
 0x519   : > { %5407 = vrot.lane.b32.xlu1 %v9530_v30, %s9273_s28 }
 0x51a   : > { %v3854_v57 = vpop.permute.xlu0 %3853 }
 0x51b   : > { %8444 = vmatpush3.xpose.msk.msra.mxu0 %vm494_vm1, %v10139_v37 }
 0x51c   : > { %8455 = vmatprep.subr.msk.mxu0 %vm494_vm1, %v10151_v15 }
 0x51d   : > { %v8899_v53 = vpop.eup %8898 }
 0x51e   : > { %8446 = vmatmul.mubr.msk.f32.vlgmr.msra.gmra.mxu0 %vm494_vm1, %v3763_v18  ;;  %v4038_v4 = vpop.permute.xlu0 %4037  ;;  %v2881_v11 = vmul.f32 %v8899_v53, %v10113_v47 }
 0x51f   : > { %8456 = vmatpush3.xpose.msk.msra.mxu0 %vm494_vm1, %v10151_v15 }
 0x520   : > { %8457 = vmatprep.subr.msk.mxu0 %vm494_vm1, %v3947_v36 }
 0x522   : > { %v3945_v39 = vpop.permute.xlu0 %3944 }
 0x523   : > { %8458 = vmatpush3.xpose.msk.msra.mxu0 %vm494_vm1, %v3947_v36 }
 0x526   : > { %v4129_v3 = vpop.permute.xlu0 %4128 }
 0x52a   : > { %v4036_v8 = vpop.permute.xlu0 %4035 }
 0x52e   : > { %v4127_v9 = vpop.permute.xlu0 %4126 }
 0x534   : > { %v2830_v28 = vpop.xlane.xlu1 %2829 }
 0x535   : > { %v2848_v54 = vadd.f32 1e-08, %v2830_v28 }
 0x537   : > { %8900 = vrcp.f32 %v2848_v54 }
 0x538   : > { %v4040_v37 = vpop.permute.xlu1 %4039 }
 0x53c   : > { %v3943_v62 = vpop.permute.xlu1 %3942 }
 0x53d   : > { %8459 = vmatprep.mubr.msk.f32.mxu0 %vm494_vm1, %v3943_v62 }
 0x53e   : > { %8460 = vmatmul.mubr.msk.f32.vlgmr.msra.gmra.mxu0 %vm494_vm1, %v3945_v39 }
 0x540   : > { %v4131_v15 = vpop.permute.xlu1 %4130 }
 0x541   : > { %8469 = vmatprep.subr.msk.mxu0 %vm494_vm1, %v4131_v15 }
 0x542   : > { %8470 = vmatpush3.xpose.msk.msra.mxu0 %vm494_vm1, %v4131_v15 }
 0x543   : > { %8471 = vmatprep.subr.msk.mxu0 %vm494_vm1, %v4129_v3 }
 0x544   : > { %v8901_v0 = vpop.eup %8900  ;;  %v4034_v51 = vpop.permute.xlu1 %4033 }
 0x545   : > { %v2880_v61 = vmul.f32 %v8901_v0, %v10159_v13 }
 0x546   : > { %8472 = vmatpush3.xpose.msk.msra.mxu0 %vm494_vm1, %v4129_v3 }
 0x547   : > { %8424 = vmatprep.mubr.msk.f32.mxu1 %vm1233_vm2, %v2880_v61 }
 0x548   : > { %8425 = vmatmul.mubr.msk.f32.vlgmr.msra.gmra.mxu1 %vm1233_vm2, %v2881_v11  ;;  %v4222_v12 = vpop.permute.xlu1 %4221 }
 0x549   : > { %8435 = vmatpush3.xpose.msk.msra.mxu1 %vm494_vm1, %v10123_v56  ;;  %8438 = vmatprep.mubr.msk.f32.mxu1 %vm494_vm1, %v10131_v59  ;;  %v4216_v56 = vpop.permute.xlu0 %4215 }
 0x54a   : > { %8436 = vmatprep.subr.msk.mxu1 %vm494_vm1, %v10129_v10 }
 0x54c   : > { %v4125_v13 = vpop.permute.xlu1 %4124 }
 0x54d   : > { %8437 = vmatpush3.xpose.msk.msra.mxu1 %vm494_vm1, %v10129_v10  ;;  %8473 = vmatprep.mubr.msk.f32.mxu0 %vm494_vm1, %v4125_v13 }
 0x54e   : > { %8448 = vmatprep.subr.msk.mxu1 %vm494_vm1, %v10137_v63  ;;  %8474 = vmatmul.mubr.msk.f32.vlgmr.msra.gmra.mxu0 %vm494_vm1, %v4127_v9 }
 0x550   : > { %8439 = vmatmul.mubr.msk.f32.vlgmr.msra.gmra.mxu1 %vm494_vm1, %v10147_v6  ;;  %v4220_v47 = vpop.permute.xlu1 %4219  ;;  %v4435_v6 = vpop.permute.xlu0 %4434 }
 0x551   : > { %8449 = vmatpush3.xpose.msk.msra.mxu1 %vm494_vm1, %v10137_v63  ;;  %8452 = vmatprep.mubr.msk.f32.mxu1 %vm494_vm1, %v3852_v58 }
 0x552   : > { %8450 = vmatprep.subr.msk.mxu1 %vm494_vm1, %v10153_v44 }
 0x554   : > { %v4218_v59 = vpop.permute.xlu1 %4217  ;;  %v4522_v14 = vpop.permute.xlu0 %4521 }
 0x555   : > { %8451 = vmatpush3.xpose.msk.msra.mxu1 %vm494_vm1, %v10153_v44 }
 0x556   : > { %8462 = vmatprep.subr.msk.mxu1 %vm494_vm1, %v4040_v37 }
 0x558   : > { %8453 = vmatmul.mubr.msk.f32.vlgmr.msra.gmra.mxu1 %vm494_vm1, %v3854_v57  ;;  %v4437_v10 = vpop.permute.xlu1 %4436  ;;  %v10373_v48 = vpop.permute.xlu0 %4697 }
 0x559   : > { %8463 = vmatpush3.xpose.msk.msra.mxu1 %vm494_vm1, %v4040_v37  ;;  %8466 = vmatprep.mubr.msk.f32.mxu1 %vm494_vm1, %v4034_v51 }
 0x55a   : > { %8464 = vmatprep.subr.msk.mxu1 %vm494_vm1, %v4038_v4  ;;  %8483 = vmatprep.subr.mxu0 %v4437_v10 }
 0x55b   : > { %8484 = vmatpush3.msra.mxu0 %v4437_v10 }
 0x55c   : > { %8485 = vmatprep.subr.mxu0 %v4435_v6  ;;  %v4524_v63 = vpop.permute.xlu1 %4523 }
 0x55d   : > { %8465 = vmatpush3.xpose.msk.msra.mxu1 %vm494_vm1, %v4038_v4  ;;  %8486 = vmatpush3.msra.mxu0 %v4435_v6 }
 0x55e   : > { %8476 = vmatprep.subr.msk.mxu1 %vm494_vm1, %v4222_v12 }
 0x560   : > { %8467 = vmatmul.mubr.msk.f32.vlgmr.msra.gmra.mxu1 %vm494_vm1, %v4036_v8  ;;  %v10365_v44 = vpop.permute.xlu1 %4610 }
 0x561   : > { %8477 = vmatpush3.xpose.msk.msra.mxu1 %vm494_vm1, %v4222_v12  ;;  %8480 = vmatprep.mubr.msk.f32.mxu1 %vm494_vm1, %v4216_v56 }
 0x562   : > { %8478 = vmatprep.subr.msk.mxu1 %vm494_vm1, %v4220_v47  ;;  %8497 = vmatprep.subr.mxu0 %v10365_v44 }
 0x565   : > { %8479 = vmatpush3.xpose.msk.msra.mxu1 %vm494_vm1, %v4220_v47 }
 0x566   : > { %8490 = vmatprep.subr.mxu1 %v4524_v63 }
 0x568   : > { %8481 = vmatmul.mubr.msk.f32.vlgmr.msra.gmra.mxu1 %vm494_vm1, %v4218_v59 }
 0x569   : > { %8491 = vmatpush3.msra.mxu1 %v4524_v63 }
 0x56a   : > { %8492 = vmatprep.subr.mxu1 %v4522_v14 }
 0x56b   : > { %8493 = vmatpush3.msra.mxu1 %v4522_v14 }
 0x56c   : > { %8504 = vmatprep.subr.mxu1 %v10373_v48 }
 0x578   : > { %v10376_v50 = vpop.f32.mrf.mxu0 }
 0x579   : > { %11381 = vst [vmem:[#allocation12_spill] sm:$0xff] %v10376_v50 }
 0x57a   : > { %v10378_v7 = vpop.f32.mrf.mxu0 }
 0x57b   : > { %11382 = vst [vmem:[#allocation29_spill] sm:$0xff] %v10378_v7 }
 0x590   : > { %v10380_v17 = vpop.f32.mrf.mxu0 }
 0x591   : > { %11383 = vst [vmem:[#allocation30_spill] sm:$0xff] %v10380_v17 }
 0x592   : > { %v10382_v1 = vpop.f32.mrf.mxu0 }
 0x593   : > { %11384 = vst [vmem:[#allocation31_spill] sm:$0xff] %v10382_v1 }
 0x5c1   : > { %v10408_v54 = vpop.f32.mrf.mxu1 }
 0x5c2   : > { %11389 = vst [vmem:[#allocation36_spill] sm:$0xff] %v10408_v54 }
 0x5c3   : > { %v10410_v37 = vpop.f32.mrf.mxu1 }
 0x5c4   : > { %11390 = vst [vmem:[#allocation37_spill] sm:$0xff] %v10410_v37 }
 0x5c6   : > { %v10384_v52 = vpop.f32.mrf.mxu0 }
 0x5c7   : > { %11385 = vst [vmem:[#allocation32_spill] sm:$0xff] %v10384_v52 }
 0x5c8   : > { %v10386_v42 = vpop.f32.mrf.mxu0 }
 0x5c9   : > { %11386 = vst [vmem:[#allocation33_spill] sm:$0xff] %v10386_v42 }
 0x5cb   : > { %v10412_v39 = vpop.f32.mrf.mxu1 }
 0x5cc   : > { %11391 = vst [vmem:[#allocation38_spill] sm:$0xff] %v10412_v39 }
 0x5cd   : > { %v10414_v3 = vpop.f32.mrf.mxu1 }
 0x5ce   : > { %v10388_v55 = vpop.f32.mrf.mxu0  ;;  %11392 = vst [vmem:[#allocation39_spill] sm:$0xff] %v10414_v3 }
 0x5cf   : > { %11387 = vst [vmem:[#allocation34_spill] sm:$0xff] %v10388_v55 }
 0x5d0   : > { %v10390_v19 = vpop.f32.mrf.mxu0 }
 0x5d1   : > { %11388 = vst [vmem:[#allocation35_spill] sm:$0xff] %v10390_v19 }
 0x5d3   : > { %v10416_v53 = vpop.f32.mrf.mxu1 }
 0x5d4   : > { %11393 = vst [vmem:[#allocation40_spill] sm:$0xff] %v10416_v53 }
 0x5d5   : > { %v10418_v0 = vpop.f32.mrf.mxu1 }
 0x5d6   : > { %v8433_v45 = vpop.f32.mrf.mxu0  ;;  %11394 = vst [vmem:[#allocation41_spill] sm:$0xff] %v10418_v0 }
 0x5d7   : > { %v4308_v49 = vmul.f32 1.442695, %v8433_v45 }
 0x5d8   : > { %v3660_v41 = vpop.f32.mrf.mxu0 }
 0x5d9   : > { %8902 = vpow2.f32 %v4308_v49  ;;  %v4306_v16 = vmul.f32 1.442695, %v3660_v41 }
 0x5db   : > { %8904 = vpow2.f32 %v4306_v16 }
 0x5de   : > { %v8447_v2 = vpop.f32.mrf.mxu0 }
 0x5df   : > { %v4316_v60 = vmul.f32 1.442695, %v8447_v2 }
 0x5e0   : > { %v3842_v5 = vpop.f32.mrf.mxu0 }
 0x5e1   : > { %8906 = vpow2.f32 %v4316_v60  ;;  %v4314_v46 = vmul.f32 1.442695, %v3842_v5 }
 0x5e3   : > { %8908 = vpow2.f32 %v4314_v46 }
 0x5e6   : > { %v10392_v43 = vpop.eup %8902 }
 0x5e7   : > { %v4341_v18 = vsel %vm1233_vm2, %v10392_v43, 0.0 }
 0x5e8   : > { %v10396_v36 = vpop.eup %8904  ;;  %4342 = vadd.xlane.f32.xlu1 %v4341_v18 }
 0x5e9   : > { %v4338_v57 = vsel %vm1233_vm2, %v10396_v36, 0.0 }
 0x5ea   : > { %4339 = vadd.xlane.f32.xlu0 %v4338_v57 }
 0x5ee   : > { %v10400_v58 = vpop.eup %8906 }
 0x5ef   : > { %v4353_v38 = vsel %vm1233_vm2, %v10400_v58, 0.0 }
 0x5f0   : > { %v10404_v28 = vpop.eup %8908  ;;  %4354 = vadd.xlane.f32.xlu0 %v4353_v38 }
 0x5f1   : > { %v4350_v4 = vsel %vm1233_vm2, %v10404_v28, 0.0 }
 0x5f4   : > { %4351 = vadd.xlane.f32.xlu0 %v4350_v4 }
 0x5fe   : > { %v8461_v62 = vpop.f32.mrf.mxu0 }
 0x5ff   : > { %v4324_v15 = vmul.f32 1.442695, %v8461_v62 }
 0x600   : > { %v4024_v12 = vpop.f32.mrf.mxu0 }
 0x601   : > { %8910 = vpow2.f32 %v4324_v15  ;;  %v4322_v59 = vmul.f32 1.442695, %v4024_v12  ;;  %v10438_v15 = vpop.permute.xlu1 %4608 }
 0x608   : > { %v10420_v51 = vpop.f32.mrf.mxu1 }
 0x609   : > { %11395 = vst [vmem:[#allocation42_spill] sm:$0xff] %v10420_v51 }
 0x60a   : > { %v10424_v11 = vpop.f32.mrf.mxu1 }
 0x60b   : > { %11396 = vst [vmem:[#allocation43_spill] sm:$0xff] %v10424_v11 }
 0x60e   : > { %v10422_v61 = vpop.eup %8910  ;;  %v8475_v56 = vpop.f32.mrf.mxu0 }
 0x60f   : > { %v4365_v8 = vsel %vm1233_vm2, %v10422_v61, 0.0  ;;  %v4332_v6 = vmul.f32 1.442695, %v8475_v56 }
 0x610   : > { %v8440_v13 = vpop.f32.mrf.mxu1  ;;  %4366 = vadd.xlane.f32.xlu0 %v4365_v8  ;;  %v4206_v63 = vpop.f32.mrf.mxu0 }
 0x611   : > { %v4312_v9 = vmul.f32 1.442695, %v8440_v13  ;;  %v4330_v41 = vmul.f32 1.442695, %v4206_v63 }
 0x612   : > { %v3751_v47 = vpop.f32.mrf.mxu1 }
 0x613   : > { %8912 = vpow2.f32 %v4312_v9  ;;  %v4310_v10 = vmul.f32 1.442695, %v3751_v47 }
 0x615   : > { %8914 = vpow2.f32 %v4310_v10  ;;  %v10450_v10 = vpop.permute.xlu1 %4784 }
 0x616   : > { %8916 = vpow2.f32 %v4322_v59 }
 0x617   : > { %8918 = vpow2.f32 %v4332_v6 }
 0x618   : > { %v8454_v14 = vpop.f32.mrf.mxu1 }
 0x619   : > { %v4320_v45 = vmul.f32 1.442695, %v8454_v14 }
 0x61a   : > { %v3933_v49 = vpop.f32.mrf.mxu1 }
 0x61b   : > { %8920 = vpow2.f32 %v4320_v45  ;;  %v4318_v16 = vmul.f32 1.442695, %v3933_v49 }
 0x61d   : > { %8922 = vpow2.f32 %v4318_v16 }
 0x61e   : > { %8924 = vpow2.f32 %v4330_v41  ;;  %v10462_v41 = vpop.permute.xlu1 %4782 }
 0x620   : > { %v10428_v2 = vpop.eup %8912  ;;  %v8468_v60 = vpop.f32.mrf.mxu1 }
 0x621   : > { %v4328_v5 = vmul.f32 1.442695, %v8468_v60  ;;  %v4347_v46 = vsel %vm1233_vm2, %v10428_v2, 0.0 }
 0x622   : > { %v10432_v18 = vpop.eup %8914  ;;  %4348 = vadd.xlane.f32.xlu1 %v4347_v46  ;;  %v4115_v57 = vpop.f32.mrf.mxu1 }
 0x623   : > { %8926 = vpow2.f32 %v4328_v5  ;;  %v4326_v38 = vmul.f32 1.442695, %v4115_v57  ;;  %v4344_v4 = vsel %vm1233_vm2, %v10432_v18, 0.0  ;;  %v10436_v62 = vpop.eup %8916  ;;  %v10468_v5 = vpop.permute.xlu0 %4695 }
 0x624   : > { %4345 = vadd.xlane.f32.xlu0 %v4344_v4  ;;  %v10440_v8 = vpop.eup %8918  ;;  %v4362_v12 = vsel %vm1233_vm2, %v10436_v62, 0.0  ;;  %v10472_v57 = vpop.permute.xlu1 %4958 }
 0x625   : > { %8928 = vpow2.f32 %v4326_v38  ;;  %v4377_v6 = vsel %vm1233_vm2, %v10440_v8, 0.0 }
 0x627   : > { %v10476_v4 = vpop.permute.xlu0 %4871 }
 0x628   : > { %v10444_v13 = vpop.eup %8920  ;;  %4363 = vadd.xlane.f32.xlu0 %v4362_v12  ;;  %v8482_v9 = vpop.f32.mrf.mxu1 }
 0x629   : > { %v4336_v47 = vmul.f32 1.442695, %v8482_v9  ;;  %v4359_v59 = vsel %vm1233_vm2, %v10444_v13, 0.0  ;;  %v10480_v9 = vpop.permute.xlu1 %4956 }
 0x62a   : > { %v10448_v56 = vpop.eup %8922  ;;  %4360 = vadd.xlane.f32.xlu1 %v4359_v59 }
 0x62b   : > { %8930 = vpow2.f32 %v4336_v47  ;;  %v10454_v63 = vpop.eup %8924  ;;  %v4356_v14 = vsel %vm1233_vm2, %v10448_v56, 0.0  ;;  %v10482_v47 = vpop.permute.xlu0 %4869 }
 0x62c   : > { %4378 = vadd.xlane.f32.xlu0 %v4377_v6  ;;  %v4374_v45 = vsel %vm1233_vm2, %v10454_v63, 0.0 }
 0x62d   : > { %v10484_v59 = vpop.permute.xlu1 %5136 }
 0x62e   : > { %4357 = vadd.xlane.f32.xlu1 %v4356_v14 }
 0x62f   : > { %v10486_v6 = vpop.permute.xlu0 %5045 }
 0x630   : > { %v10460_v49 = vpop.eup %8926  ;;  %4375 = vadd.xlane.f32.xlu0 %v4374_v45 }
 0x631   : > { %v4371_v16 = vsel %vm1233_vm2, %v10460_v49, 0.0  ;;  %v10490_v14 = vpop.permute.xlu1 %5134 }
 0x632   : > { %v10466_v60 = vpop.eup %8928  ;;  %4372 = vadd.xlane.f32.xlu1 %v4371_v16 }
 0x633   : > { %v4368_v46 = vsel %vm1233_vm2, %v10466_v60, 0.0  ;;  %v10492_v45 = vpop.permute.xlu0 %5043 }
 0x635   : > { %v10494_v16 = vpop.permute.xlu1 %5130 }
 0x636   : > { %4369 = vadd.xlane.f32.xlu1 %v4368_v46 }
 0x637   : > { %v10498_v46 = vpop.permute.xlu0 %5227 }
 0x638   : > { %v10474_v38 = vpop.eup %8930 }
 0x639   : > { %v4383_v12 = vsel %vm1233_vm2, %v10474_v38, 0.0  ;;  %v10502_v11 = vpop.permute.xlu1 %5225 }
 0x63a   : > { %4384 = vadd.xlane.f32.xlu0 %v4383_v12  ;;  %v4297_v12 = vpop.f32.mrf.mxu1 }
 0x63b   : > { %v4334_v19 = vmul.f32 1.442695, %v4297_v12  ;;  %v10504_v51 = vpop.permute.xlu0 %5132 }
 0x63d   : > { %8932 = vpow2.f32 %v4334_v19  ;;  %v10508_v0 = vpop.permute.xlu1 %5221 }
 0x63f   : > { %v10512_v55 = vpop.permute.xlu0 %5318 }
 0x641   : > { %v10516_v42 = vpop.permute.xlu1 %5316 }
 0x643   : > { %v10518_v53 = vpop.permute.xlu0 %5223 }
 0x645   : > { %v10524_v19 = vpop.permute.xlu1 %5312 }
 0x647   : > { %5403 = vrot.lane.b32.xlu1 %v9530_v30, %s9274_s11  ;;  %v10528_v3 = vpop.permute.xlu0 %5409 }
 0x649   : > { %v10534_v1 = vpop.permute.xlu1 %5407 }
 0x64a   : > { %v10522_v12 = vpop.eup %8932  ;;  %11397 = vst [vmem:[#allocation44_spill] sm:$0xff] %v10534_v1 }
 0x64b   : > { %v4380_v52 = vsel %vm1233_vm2, %v10522_v12, 0.0  ;;  %v10536_v39 = vpop.permute.xlu0 %5314 }
 0x650   : > { %5500 = vrot.lane.b32.xlu0 %v9498_v22, %s9273_s28 }
 0x654   : > { %5405 = vrot.lane.b32.xlu0 %v9524_v29, %s9274_s11 }
 0x658   : > { %5591 = vrot.lane.b32.xlu0 %v11380_v40, %s9273_s28 }
 0x65c   : > { %5496 = vrot.lane.b32.xlu0 %v9498_v22, %s9274_s11 }
 0x660   : > { %5682 = vrot.lane.b32.xlu0 %v9538_v32, %s9273_s28 }
 0x664   : > { %5587 = vrot.lane.b32.xlu0 %v11380_v40, %s9274_s11 }
 0x668   : > { %5773 = vrot.lane.b32.xlu0 %v9550_v34, %s9273_s28 }
 0x66b   : > { %4381 = vadd.xlane.f32.xlu1 %v4380_v52 }
 0x66c   : > { %5678 = vrot.lane.b32.xlu0 %v9538_v32, %s9274_s11 }
 0x670   : > { %5767 = vrot.lane.b32.xlu0 %v9556_v35, %s9274_s11 }
 0x671   : > { %v4343_v37 = vpop.xlane.xlu1 %4342 }
 0x672   : > { %v4387_v17 = vadd.f32 1e-08, %v4343_v37 }
 0x673   : > { %v4340_v7 = vpop.xlane.xlu0 %4339 }
 0x674   : > { %v4386_v54 = vadd.f32 1e-08, %v4340_v7  ;;  %5986 = vrot.lane.b32.xlu0 %v9496_v21, %s9275_s17  ;;  %8934 = vrcp.f32 %v4387_v17 }
 0x676   : > { %8936 = vrcp.f32 %v4386_v54 }
 0x678   : > { %6249 = vrot.lane.b32.xlu0 %v9524_v29, %s9275_s17 }
 0x679   : > { %v4355_v52 = vpop.xlane.xlu0 %4354 }
 0x67a   : > { %v4391_v50 = vadd.f32 1e-08, %v4355_v52 }
 0x67c   : > { %6336 = vrot.lane.b32.xlu0 %v9498_v22, %s9275_s17  ;;  %5498 = vrot.lane.b32.xlu1 %v9508_v24, %s9273_s28  ;;  %8938 = vrcp.f32 %v4391_v50 }
 0x67d   : > { %v4352_v37 = vpop.xlane.xlu0 %4351 }
 0x67e   : > { %v4390_v1 = vadd.f32 1e-08, %v4352_v37 }
 0x680   : > { %8940 = vrcp.f32 %v4390_v1  ;;  %6423 = vrot.lane.b32.xlu0 %v11380_v40, %s9275_s17  ;;  %5494 = vrot.lane.b32.xlu1 %v9508_v24, %s9274_s11 }
 0x681   : > { %v8935_v21 = vpop.eup %8934 }
 0x682   : > { %v4419_v7 = vmul.f32 %v8935_v21, %v10392_v43 }
 0x683   : > { %v8937_v29 = vpop.eup %8936 }
 0x684   : > { %6510 = vrot.lane.b32.xlu0 %v9538_v32, %s9275_s17  ;;  %5589 = vrot.lane.b32.xlu1 %v9532_v31, %s9273_s28  ;;  %v4418_v22 = vmul.f32 %v8937_v29, %v10396_v36 }
 0x686   : > { %8487 = vmatprep.mubr.msk.f32.mxu0 %vm1233_vm2, %v4418_v22 }
 0x687   : > { %8488 = vmatmul.mubr.msk.f32.vlgmr.msra.gmra.mxu0 %vm1233_vm2, %v4419_v7 }
 0x688   : > { %8498 = vmatpush3.msra.mxu0 %v10365_v44  ;;  %5585 = vrot.lane.b32.xlu1 %v9532_v31, %s9274_s11 }
 0x689   : > { %8499 = vmatprep.subr.mxu0 %v10438_v15  ;;  %v8939_v32 = vpop.eup %8938 }
 0x68a   : > { %8500 = vmatpush3.msra.mxu0 %v10438_v15  ;;  %v4423_v17 = vmul.f32 %v8939_v32, %v10400_v58 }
 0x68b   : > { %8511 = vmatprep.subr.mxu0 %v10450_v10 }
 0x68c   : > { %5680 = vrot.lane.b32.xlu1 %v9544_v33, %s9273_s28 }
 0x68d   : > { %v8941_v40 = vpop.eup %8940 }
 0x68e   : > { %v4422_v50 = vmul.f32 %v8941_v40, %v10404_v28 }
 0x690   : > { %8501 = vmatprep.mubr.msk.f32.mxu0 %vm1233_vm2, %v4422_v50  ;;  %5676 = vrot.lane.b32.xlu1 %v9544_v33, %s9274_s11 }
 0x691   : > { %8502 = vmatmul.mubr.msk.f32.vlgmr.msra.gmra.mxu0 %vm1233_vm2, %v4423_v17 }
 0x692   : > { %8512 = vmatpush3.msra.mxu0 %v10450_v10 }
 0x693   : > { %8513 = vmatprep.subr.mxu0 %v10462_v41 }
 0x694   : > { %8514 = vmatpush3.msra.mxu0 %v10462_v41  ;;  %5771 = vrot.lane.b32.xlu1 %v9556_v35, %s9273_s28 }
 0x695   : > { %8525 = vmatprep.subr.mxu0 %v10472_v57 }
 0x698   : > { %5769 = vrot.lane.b32.xlu1 %v9550_v34, %s9274_s11  ;;  %s11295_s11 = scalar_lea.hbm %s11338_s5, %s7870_s12 }
 0x699   : > { %v4367_v44 = vpop.xlane.xlu0 %4366 }
 0x69a   : > { %v4395_v28 = vadd.f32 1e-08, %v4367_v44 }
 0x69c   : > { %5988 = vrot.lane.b32.xlu1 %v9492_v20, %s9275_s17 }
 0x6a0   : > { %6075 = vrot.lane.b32.xlu1 %v9502_v23, %s9275_s17 }
 0x6a4   : > { %6073 = vrot.lane.b32.xlu1 %v9510_v25, %s9275_s17 }
 0x6a8   : > { %6162 = vrot.lane.b32.xlu1 %v9514_v26, %s9275_s17 }
 0x6ab   : > { %v4349_v1 = vpop.xlane.xlu1 %4348 }
 0x6ac   : > { %v4389_v43 = vadd.f32 1e-08, %v4349_v1  ;;  %6160 = vrot.lane.b32.xlu1 %v9520_v27, %s9275_s17 }
 0x6ad   : > { %v4346_v36 = vpop.xlane.xlu0 %4345 }
 0x6ae   : > { %v4388_v58 = vadd.f32 1e-08, %v4346_v36  ;;  %8942 = vrcp.f32 %v4389_v43 }
 0x6b0   : > { %8944 = vrcp.f32 %v4388_v58  ;;  %6247 = vrot.lane.b32.xlu1 %v9530_v30, %s9275_s17 }
 0x6b1   : > { %v4364_v20 = vpop.xlane.xlu0 %4363  ;;  %8946 = vrcp.f32 %v4395_v28 }
 0x6b2   : > { %v4394_v23 = vadd.f32 1e-08, %v4364_v20 }
 0x6b3   : > { %v4361_v25 = vpop.xlane.xlu1 %4360 }
 0x6b4   : > { %8948 = vrcp.f32 %v4394_v23  ;;  %6334 = vrot.lane.b32.xlu1 %v9508_v24, %s9275_s17  ;;  %v4393_v26 = vadd.f32 1e-08, %v4361_v25 }
 0x6b5   : > { %v4379_v54 = vpop.xlane.xlu0 %4378 }
 0x6b6   : > { %v4399_v15 = vadd.f32 1e-08, %v4379_v54  ;;  %8950 = vrcp.f32 %v4393_v26 }
 0x6b7   : > { %v4358_v27 = vpop.xlane.xlu1 %4357 }
 0x6b8   : > { %v4392_v10 = vadd.f32 1e-08, %v4358_v27  ;;  %6421 = vrot.lane.b32.xlu1 %v9532_v31, %s9275_s17 }
 0x6b9   : > { %v4376_v41 = vpop.xlane.xlu0 %4375 }
 0x6ba   : > { %8952 = vrcp.f32 %v4392_v10  ;;  %v4398_v30 = vadd.f32 1e-08, %v4376_v41 }
 0x6bb   : > { %8954 = vrcp.f32 %v4399_v15  ;;  %v4373_v52 = vpop.xlane.xlu1 %4372  ;;  %v8943_v37 = vpop.eup %8942 }
 0x6bc   : > { %8956 = vrcp.f32 %v4398_v30  ;;  %v4397_v29 = vadd.f32 1e-08, %v4373_v52  ;;  %v4421_v7 = vmul.f32 %v8943_v37, %v10428_v2 }
 0x6bd   : > { %v8945_v21 = vpop.eup %8944 }
 0x6be   : > { %v4420_v24 = vmul.f32 %v8945_v21, %v10432_v18  ;;  %v8947_v32 = vpop.eup %8946  ;;  %8958 = vrcp.f32 %v4397_v29 }
 0x6bf   : > { %v4370_v22 = vpop.xlane.xlu1 %4369  ;;  %v4427_v18 = vmul.f32 %v8947_v32, %v10422_v61 }
 0x6c0   : > { %v4396_v40 = vadd.f32 1e-08, %v4370_v22  ;;  %8494 = vmatprep.mubr.msk.f32.mxu1 %vm1233_vm2, %v4420_v24 }
 0x6c1   : > { %v8949_v31 = vpop.eup %8948  ;;  %8495 = vmatmul.mubr.msk.f32.vlgmr.msra.gmra.mxu1 %vm1233_vm2, %v4421_v7 }
 0x6c2   : > { %8960 = vrcp.f32 %v4396_v40  ;;  %8505 = vmatpush3.msra.mxu1 %v10373_v48  ;;  %v4426_v50 = vmul.f32 %v8949_v31, %v10436_v62 }
 0x6c3   : > { %8506 = vmatprep.subr.mxu1 %v10468_v5  ;;  %v8951_v2 = vpop.eup %8950 }
 0x6c4   : > { %8507 = vmatpush3.msra.mxu1 %v10468_v5  ;;  %8515 = vmatprep.mubr.msk.f32.mxu0 %vm1233_vm2, %v4426_v50  ;;  %v4425_v5 = vmul.f32 %v8951_v2, %v10444_v13 }
 0x6c5   : > { %8518 = vmatprep.subr.mxu1 %v10476_v4  ;;  %8516 = vmatmul.mubr.msk.f32.vlgmr.msra.gmra.mxu0 %vm1233_vm2, %v4427_v18 }
 0x6c6   : > { %8526 = vmatpush3.msra.mxu0 %v10472_v57 }
 0x6c7   : > { %v8953_v17 = vpop.eup %8952  ;;  %8527 = vmatprep.subr.mxu0 %v10480_v9 }
 0x6c8   : > { %v8955_v48 = vpop.eup %8954  ;;  %8528 = vmatpush3.msra.mxu0 %v10480_v9  ;;  %v4424_v62 = vmul.f32 %v8953_v17, %v10448_v56 }
 0x6c9   : > { %v8957_v61 = vpop.eup %8956  ;;  %8539 = vmatprep.subr.msk.mxu0 %vm494_vm1, %v10484_v59  ;;  %v4431_v57 = vmul.f32 %v8955_v48, %v10440_v8 }
 0x6ca   : > { %8508 = vmatprep.mubr.msk.f32.mxu1 %vm1233_vm2, %v4424_v62  ;;  %v4430_v44 = vmul.f32 %v8957_v61, %v10454_v63 }
 0x6cb   : > { %8509 = vmatmul.mubr.msk.f32.vlgmr.msra.gmra.mxu1 %vm1233_vm2, %v4425_v5  ;;  %v8959_v56 = vpop.eup %8958 }
 0x6cc   : > { %8519 = vmatpush3.msra.mxu1 %v10476_v4  ;;  %8529 = vmatprep.mubr.msk.f32.mxu0 %vm1233_vm2, %v4430_v44  ;;  %v4429_v63 = vmul.f32 %v8959_v56, %v10460_v49  ;;  %v4385_v4 = vpop.xlane.xlu0 %4384 }
 0x6cd   : > { %8520 = vmatprep.subr.mxu1 %v10482_v47  ;;  %8530 = vmatmul.mubr.msk.f32.vlgmr.msra.gmra.mxu0 %vm1233_vm2, %v4431_v57  ;;  %v4401_v9 = vadd.f32 1e-08, %v4385_v4 }
 0x6ce   : > { %8521 = vmatpush3.msra.mxu1 %v10482_v47  ;;  %8540 = vmatpush3.xpose.msk.msra.mxu0 %vm494_vm1, %v10484_v59 }
 0x6cf   : > { %v8961_v13 = vpop.eup %8960  ;;  %8532 = vmatprep.subr.mxu1 %v10486_v6  ;;  %8541 = vmatprep.subr.msk.mxu0 %vm494_vm1, %v10490_v14  ;;  %8962 = vrcp.f32 %v4401_v9 }
 0x6d0   : > { %8543 = vmatprep.mubr.msk.f32.mxu0 %vm494_vm1, %v10494_v16  ;;  %v4428_v8 = vmul.f32 %v8961_v13, %v10466_v60  ;;  %v5501_v49 = vpop.permute.xlu0 %5500  ;;  %v5404_v60 = vpop.permute.xlu1 %5403 }
 0x6d2   : > { %8542 = vmatpush3.xpose.msk.msra.mxu0 %vm494_vm1, %v10490_v14  ;;  %8522 = vmatprep.mubr.msk.f32.mxu1 %vm1233_vm2, %v4428_v8 }
 0x6d3   : > { %8553 = vmatprep.subr.msk.mxu0 %vm494_vm1, %v10512_v55  ;;  %8523 = vmatmul.mubr.msk.f32.vlgmr.msra.gmra.mxu1 %vm1233_vm2, %v4429_v63 }
 0x6d4   : > { %8533 = vmatpush3.msra.mxu1 %v10486_v6 }
 0x6d5   : > { %8534 = vmatprep.subr.mxu1 %v10492_v45  ;;  %8544 = vmatmul.mubr.msk.f32.vlgmr.msra.gmra.mxu0 %vm494_vm1, %v10504_v51 }
 0x6d6   : > { %8535 = vmatpush3.msra.mxu1 %v10492_v45  ;;  %8554 = vmatpush3.xpose.msk.msra.mxu0 %vm494_vm1, %v10512_v55  ;;  %v5406_v55 = vpop.permute.xlu0 %5405 }
 0x6d7   : > { %8557 = vmatprep.mubr.msk.f32.mxu0 %vm494_vm1, %v10524_v19  ;;  %8546 = vmatprep.subr.msk.mxu1 %vm494_vm1, %v10498_v46 }
 0x6d8   : > { %8555 = vmatprep.subr.msk.mxu0 %vm494_vm1, %v10516_v42 }
 0x6da   : > { %8556 = vmatpush3.xpose.msk.msra.mxu0 %vm494_vm1, %v10516_v42  ;;  %v5592_v51 = vpop.permute.xlu0 %5591 }
 0x6db   : > { %8567 = vmatprep.subr.msk.mxu0 %vm494_vm1, %v5501_v49 }
 0x6dc   : > { %v8963_v19 = vpop.eup %8962 }
 0x6dd   : > { %8558 = vmatmul.mubr.msk.f32.vlgmr.msra.gmra.mxu0 %vm494_vm1, %v10536_v39  ;;  %v4433_v58 = vmul.f32 %v8963_v19, %v10474_v38 }
 0x6de   : > { %8568 = vmatpush3.xpose.msk.msra.mxu0 %vm494_vm1, %v5501_v49  ;;  %v5497_v47 = vpop.permute.xlu0 %5496 }
 0x6e2   : > { %v5683_v42 = vpop.permute.xlu0 %5682 }
 0x6e6   : > { %v5588_v16 = vpop.permute.xlu0 %5587 }
 0x6ea   : > { %v5774_v28 = vpop.permute.xlu0 %5773 }
 0x6f4   : > { %v4382_v59 = vpop.xlane.xlu1 %4381 }
 0x6f5   : > { %v4400_v6 = vadd.f32 1e-08, %v4382_v59 }
 0x6f7   : > { %8964 = vrcp.f32 %v4400_v6 }
 0x6f8   : > { %v5499_v14 = vpop.permute.xlu1 %5498 }
 0x6f9   : > { %8569 = vmatprep.subr.msk.mxu0 %vm494_vm1, %v5499_v14 }
 0x6fa   : > { %8570 = vmatpush3.xpose.msk.msra.mxu0 %vm494_vm1, %v5499_v14 }
 0x6fb   : > { %8581 = vmatprep.subr.msk.mxu0 %vm494_vm1, %v5683_v42 }
 0x6fc   : > { %v5495_v39 = vpop.permute.xlu1 %5494 }
 0x6fd   : > { %8571 = vmatprep.mubr.msk.f32.mxu0 %vm494_vm1, %v5495_v39 }
 0x6fe   : > { %8572 = vmatmul.mubr.msk.f32.vlgmr.msra.gmra.mxu0 %vm494_vm1, %v5497_v47 }
 0x6ff   : > { %8582 = vmatpush3.xpose.msk.msra.mxu0 %vm494_vm1, %v5683_v42 }
 0x700   : > { %v5590_v45 = vpop.permute.xlu1 %5589 }
 0x704   : > { %v8965_v1 = vpop.eup %8964  ;;  %v5586_v43 = vpop.permute.xlu1 %5585 }
 0x705   : > { %v4432_v36 = vmul.f32 %v8965_v1, %v10522_v12  ;;  %v5679_v12 = vpop.permute.xlu0 %5678 }
 0x707   : > { %8536 = vmatprep.mubr.msk.f32.mxu1 %vm1233_vm2, %v4432_v36 }
 0x708   : > { %8537 = vmatmul.mubr.msk.f32.vlgmr.msra.gmra.mxu1 %vm1233_vm2, %v4433_v58  ;;  %v5681_v20 = vpop.permute.xlu1 %5680 }
 0x709   : > { %8547 = vmatpush3.xpose.msk.msra.mxu1 %vm494_vm1, %v10498_v46  ;;  %8550 = vmatprep.mubr.msk.f32.mxu1 %vm494_vm1, %v10508_v0  ;;  %v11398_v46 = vld [vmem:[#allocation44_spill] sm:$0xff]  ;;  %v5768_v23 = vpop.permute.xlu0 %5767 }
 0x70a   : > { %8548 = vmatprep.subr.msk.mxu1 %vm494_vm1, %v10502_v11  ;;  %8583 = vmatprep.subr.msk.mxu0 %vm494_vm1, %v5681_v20 }
 0x70b   : > { %8584 = vmatpush3.xpose.msk.msra.mxu0 %vm494_vm1, %v5681_v20 }
 0x70c   : > { %v5677_v38 = vpop.permute.xlu1 %5676 }
 0x70d   : > { %8549 = vmatpush3.xpose.msk.msra.mxu1 %vm494_vm1, %v10502_v11  ;;  %8585 = vmatprep.mubr.msk.f32.mxu0 %vm494_vm1, %v5677_v38 }
 0x70e   : > { %8560 = vmatprep.subr.msk.mxu1 %vm494_vm1, %v10528_v3  ;;  %8586 = vmatmul.mubr.msk.f32.vlgmr.msra.gmra.mxu0 %vm494_vm1, %v5679_v12 }
 0x710   : > { %8551 = vmatmul.mubr.msk.f32.vlgmr.msra.gmra.mxu1 %vm494_vm1, %v10518_v53  ;;  %v5772_v0 = vpop.permute.xlu1 %5771 }
 0x711   : > { %8561 = vmatpush3.xpose.msk.msra.mxu1 %vm494_vm1, %v10528_v3  ;;  %8564 = vmatprep.mubr.msk.f32.mxu1 %vm494_vm1, %v5404_v60  ;;  %v5987_v3 = vpop.permute.xlu0 %5986 }
 0x712   : > { %8562 = vmatprep.subr.msk.mxu1 %vm494_vm1, %v11398_v46 }
 0x714   : > { %v5770_v11 = vpop.permute.xlu1 %5769 }
 0x715   : > { %8563 = vmatpush3.xpose.msk.msra.mxu1 %vm494_vm1, %v11398_v46  ;;  %v10709_v15 = vpop.permute.xlu0 %6249 }
 0x716   : > { %8574 = vmatprep.subr.msk.mxu1 %vm494_vm1, %v5592_v51 }
 0x718   : > { %8565 = vmatmul.mubr.msk.f32.vlgmr.msra.gmra.mxu1 %vm494_vm1, %v5406_v55  ;;  %v5989_v25 = vpop.permute.xlu1 %5988 }
 0x719   : > { %8575 = vmatpush3.xpose.msk.msra.mxu1 %vm494_vm1, %v5592_v51  ;;  %8578 = vmatprep.mubr.msk.f32.mxu1 %vm494_vm1, %v5586_v43 }
 0x71a   : > { %8576 = vmatprep.subr.msk.mxu1 %vm494_vm1, %v5590_v45  ;;  %8595 = vmatprep.subr.mxu0 %v5989_v25 }
 0x71b   : > { %8596 = vmatpush3.msra.mxu0 %v5989_v25 }
 0x71c   : > { %8597 = vmatprep.subr.mxu0 %v5987_v3  ;;  %v6076_v53 = vpop.permute.xlu1 %6075 }
 0x71d   : > { %8577 = vmatpush3.xpose.msk.msra.mxu1 %vm494_vm1, %v5590_v45  ;;  %8598 = vmatpush3.msra.mxu0 %v5987_v3 }
 0x71e   : > { %8588 = vmatprep.subr.msk.mxu1 %vm494_vm1, %v5774_v28 }
 0x720   : > { %8579 = vmatmul.mubr.msk.f32.vlgmr.msra.gmra.mxu1 %vm494_vm1, %v5588_v16  ;;  %v6074_v26 = vpop.permute.xlu1 %6073 }
 0x721   : > { %8589 = vmatpush3.xpose.msk.msra.mxu1 %vm494_vm1, %v5774_v28  ;;  %8592 = vmatprep.mubr.msk.f32.mxu1 %vm494_vm1, %v5768_v23 }
 0x722   : > { %8590 = vmatprep.subr.msk.mxu1 %vm494_vm1, %v5772_v0 }
 0x724   : > { %v10704_v54 = vpop.permute.xlu1 %6162 }
 0x725   : > { %8591 = vmatpush3.xpose.msk.msra.mxu1 %vm494_vm1, %v5772_v0  ;;  %8609 = vmatprep.subr.mxu0 %v10704_v54 }
 0x726   : > { %8602 = vmatprep.subr.mxu1 %v6076_v53 }
 0x728   : > { %8593 = vmatmul.mubr.msk.f32.vlgmr.msra.gmra.mxu1 %vm494_vm1, %v5770_v11 }
 0x729   : > { %8603 = vmatpush3.msra.mxu1 %v6076_v53 }
 0x72a   : > { %8604 = vmatprep.subr.mxu1 %v6074_v26 }
 0x72b   : > { %8605 = vmatpush3.msra.mxu1 %v6074_v26 }
 0x72c   : > { %8616 = vmatprep.subr.mxu1 %v10709_v15 }
 0x747   : > { %v10712_v27 = vpop.f32.mrf.mxu0 }
 0x749   : > { %v10714_v10 = vpop.f32.mrf.mxu0 }
 0x751   : > { %v10716_v41 = vpop.f32.mrf.mxu0 }
 0x753   : > { %v10718_v30 = vpop.f32.mrf.mxu0 }
 0x781   : > { %v10744_v56 = vpop.f32.mrf.mxu1 }
 0x783   : > { %v10746_v13 = vpop.f32.mrf.mxu1 }
 0x785   : > { %v10720_v52 = vpop.f32.mrf.mxu0 }
 0x787   : > { %v10722_v37 = vpop.f32.mrf.mxu0 }
 0x78b   : > { %v10748_v8 = vpop.f32.mrf.mxu1 }
 0x78d   : > { %v10724_v21 = vpop.f32.mrf.mxu0  ;;  %v10750_v55 = vpop.f32.mrf.mxu1 }
 0x78f   : > { %v10726_v29 = vpop.f32.mrf.mxu0 }
 0x793   : > { %v10752_v51 = vpop.f32.mrf.mxu1 }
 0x795   : > { %v8545_v24 = vpop.f32.mrf.mxu0  ;;  %v10754_v60 = vpop.f32.mrf.mxu1 }
 0x796   : > { %v5860_v22 = vmul.f32 1.442695, %v8545_v24 }
 0x797   : > { %v5212_v7 = vpop.f32.mrf.mxu0 }
 0x798   : > { %8966 = vpow2.f32 %v5860_v22  ;;  %v5858_v32 = vmul.f32 1.442695, %v5212_v7 }
 0x79a   : > { %8968 = vpow2.f32 %v5858_v32 }
 0x79d   : > { %v8559_v40 = vpop.f32.mrf.mxu0 }
 0x79e   : > { %v5868_v31 = vmul.f32 1.442695, %v8559_v40 }
 0x79f   : > { %v5394_v50 = vpop.f32.mrf.mxu0 }
 0x7a0   : > { %8970 = vpow2.f32 %v5868_v31  ;;  %v5866_v18 = vmul.f32 1.442695, %v5394_v50 }
 0x7a2   : > { %8972 = vpow2.f32 %v5866_v18 }
 0x7a5   : > { %v10728_v2 = vpop.eup %8966 }
 0x7a6   : > { %v5893_v17 = vsel %vm1233_vm2, %v10728_v2, 0.0 }
 0x7a7   : > { %v10732_v48 = vpop.eup %8968  ;;  %5894 = vadd.xlane.f32.xlu1 %v5893_v17 }
 0x7a8   : > { %v5890_v62 = vsel %vm1233_vm2, %v10732_v48, 0.0 }
 0x7a9   : > { %5891 = vadd.xlane.f32.xlu0 %v5890_v62 }
 0x7ad   : > { %v10736_v61 = vpop.eup %8970 }
 0x7ae   : > { %v5905_v5 = vsel %vm1233_vm2, %v10736_v61, 0.0 }
 0x7af   : > { %v10740_v44 = vpop.eup %8972  ;;  %5906 = vadd.xlane.f32.xlu0 %v5905_v5 }
 0x7b0   : > { %v5902_v57 = vsel %vm1233_vm2, %v10740_v44, 0.0 }
 0x7b1   : > { %5903 = vadd.xlane.f32.xlu1 %v5902_v57 }
 0x7be   : > { %v8573_v63 = vpop.f32.mrf.mxu0 }
 0x7bf   : > { %v5876_v14 = vmul.f32 1.442695, %v8573_v63 }
 0x7c0   : > { %v5576_v4 = vpop.f32.mrf.mxu0 }
 0x7c1   : > { %v5874_v49 = vmul.f32 1.442695, %v5576_v4 }
 0x7c3   : > { %8974 = vpow2.f32 %v5874_v49 }
 0x7c8   : > { %v10756_v9 = vpop.f32.mrf.mxu1 }
 0x7ca   : > { %v10758_v47 = vpop.f32.mrf.mxu1 }
 0x7ce   : > { %v8587_v16 = vpop.f32.mrf.mxu0 }
 0x7cf   : > { %v5884_v38 = vmul.f32 1.442695, %v8587_v16 }
 0x7d0   : > { %v10760_v59 = vpop.eup %8974  ;;  %v8552_v6 = vpop.f32.mrf.mxu1 }
 0x7d1   : > { %v5864_v42 = vmul.f32 1.442695, %v8552_v6  ;;  %v5914_v39 = vsel %vm1233_vm2, %v10760_v59, 0.0  ;;  %v5758_v1 = vpop.f32.mrf.mxu0 }
 0x7d2   : > { %v5303_v45 = vpop.f32.mrf.mxu1  ;;  %5915 = vadd.xlane.f32.xlu1 %v5914_v39  ;;  %v5882_v28 = vmul.f32 1.442695, %v5758_v1  ;;  %v11400_v1 = vld [vmem:[#allocation36_spill] sm:$0xff] }
 0x7d3   : > { %8976 = vpow2.f32 %v5864_v42  ;;  %v5862_v19 = vmul.f32 1.442695, %v5303_v45 }
 0x7d4   : > { %8978 = vpow2.f32 %v5876_v14 }
 0x7d5   : > { %8980 = vpow2.f32 %v5862_v19  ;;  %v11399_v19 = vld [vmem:[#allocation12_spill] sm:$0xff] }
 0x7d8   : > { %v8566_v43 = vpop.f32.mrf.mxu1 }
 0x7d9   : > { %v5872_v36 = vmul.f32 1.442695, %v8566_v43  ;;  %v11401_v43 = vld [vmem:[#allocation29_spill] sm:$0xff] }
 0x7da   : > { %v5485_v58 = vpop.f32.mrf.mxu1 }
 0x7db   : > { %v5870_v20 = vmul.f32 1.442695, %v5485_v58  ;;  %8982 = vpow2.f32 %v5872_v36  ;;  %v6337_v36 = vpop.permute.xlu0 %6336 }
 0x7dd   : > { %8984 = vpow2.f32 %v5870_v20 }
 0x7de   : > { %8986 = vpow2.f32 %v5882_v28  ;;  %v11405_v28 = vld [vmem:[#allocation31_spill] sm:$0xff] }
 0x7df   : > { %8988 = vpow2.f32 %v5884_v38  ;;  %v11407_v38 = vld [vmem:[#allocation39_spill] sm:$0xff] }
 0x7e0   : > { %v10764_v12 = vpop.eup %8976  ;;  %v8580_v0 = vpop.f32.mrf.mxu1 }
 0x7e1   : > { %v5880_v46 = vmul.f32 1.442695, %v8580_v0  ;;  %v5899_v11 = vsel %vm1233_vm2, %v10764_v12, 0.0  ;;  %v10768_v23 = vpop.eup %8978 }
 0x7e2   : > { %5900 = vadd.xlane.f32.xlu0 %v5899_v11  ;;  %v5667_v25 = vpop.f32.mrf.mxu1  ;;  %v5917_v53 = vsel %vm1233_vm2, %v10768_v23, 0.0  ;;  %v10772_v26 = vpop.eup %8980 }
 0x7e3   : > { %v5878_v3 = vmul.f32 1.442695, %v5667_v25  ;;  %8990 = vpow2.f32 %v5880_v46  ;;  %v5896_v32 = vsel %vm1233_vm2, %v10772_v26, 0.0 }
 0x7e5   : > { %8992 = vpow2.f32 %v5878_v3  ;;  %v11409_v3 = vld [vmem:[#allocation33_spill] sm:$0xff] }
 0x7e6   : > { %5918 = vadd.xlane.f32.xlu0 %v5917_v53 }
 0x7e8   : > { %v8594_v24 = vpop.f32.mrf.mxu1  ;;  %v10774_v22 = vpop.eup %8982 }
 0x7e9   : > { %v5888_v7 = vmul.f32 1.442695, %v8594_v24  ;;  %v5911_v62 = vsel %vm1233_vm2, %v10774_v22, 0.0 }
 0x7ea   : > { %v10778_v40 = vpop.eup %8984  ;;  %5897 = vadd.xlane.f32.xlu0 %v5896_v32  ;;  %v5849_v31 = vpop.f32.mrf.mxu1 }
 0x7eb   : > { %8994 = vpow2.f32 %v5888_v7  ;;  %v5886_v50 = vmul.f32 1.442695, %v5849_v31  ;;  %v5908_v18 = vsel %vm1233_vm2, %v10778_v40, 0.0  ;;  %v10782_v17 = vpop.eup %8986  ;;  %v11411_v7 = vld [vmem:[#allocation41_spill] sm:$0xff] }
 0x7ec   : > { %5909 = vadd.xlane.f32.xlu1 %v5908_v18  ;;  %v10786_v5 = vpop.eup %8988  ;;  %v5926_v57 = vsel %vm1233_vm2, %v10782_v17, 0.0 }
 0x7ed   : > { %8996 = vpow2.f32 %v5886_v50  ;;  %v5929_v4 = vsel %vm1233_vm2, %v10786_v5, 0.0 }
 0x7ee   : > { %5912 = vadd.xlane.f32.xlu0 %v5911_v62 }
 0x7f0   : > { %5927 = vadd.xlane.f32.xlu1 %v5926_v57  ;;  %v10790_v63 = vpop.eup %8990 }
 0x7f1   : > { %v5923_v14 = vsel %vm1233_vm2, %v10790_v63, 0.0 }
 0x7f2   : > { %v10794_v49 = vpop.eup %8992  ;;  %5930 = vadd.xlane.f32.xlu0 %v5929_v4 }
 0x7f3   : > { %v5920_v6 = vsel %vm1233_vm2, %v10794_v49, 0.0 }
 0x7f4   : > { %5921 = vadd.xlane.f32.xlu1 %v5920_v6 }
 0x7f6   : > { %5924 = vadd.xlane.f32.xlu0 %v5923_v14 }
 0x7f8   : > { %v10800_v42 = vpop.eup %8994 }
 0x7f9   : > { %v5935_v39 = vsel %vm1233_vm2, %v10800_v42, 0.0 }
 0x7fa   : > { %v10804_v45 = vpop.eup %8996  ;;  %5936 = vadd.xlane.f32.xlu0 %v5935_v39 }
 0x7fb   : > { %v5932_v16 = vsel %vm1233_vm2, %v10804_v45, 0.0 }
 0x7fe   : > { %5933 = vadd.xlane.f32.xlu0 %v5932_v16 }
 0x805   : > { %6508 = vrot.lane.b32.xlu1 %v9544_v33, %s9275_s17  ;;  %v6161_v33 = vpop.permute.xlu1 %6160 }
 0x809   : > { %6595 = vrot.lane.b32.xlu1 %v9556_v35, %s9275_s17  ;;  %v11402_v35 = vld [vmem:[#allocation30_spill] sm:$0xff] }
 0x80d   : > { %6700 = vrot.lane.b32.xlu1 %v11399_v19, %s9276_s16 }
 0x811   : > { %6764 = vrot.lane.b32.xlu1 %v10712_v27, %s9277_s8  ;;  %v10828_v27 = vpop.permute.xlu1 %6247 }
 0x814   : > { %6597 = vrot.lane.b32.xlu0 %v9550_v34, %s9275_s17  ;;  %v11403_v34 = vld [vmem:[#allocation37_spill] sm:$0xff]  ;;  %s7527_s17 = scalar_lea.sflag [#allocation4], %s9446_s30 }
 0x815   : > { %6704 = vrot.lane.b32.xlu1 %v11400_v1, %s9276_s16  ;;  %v6335_v58 = vpop.permute.xlu1 %6334 }
 0x818   : > { %6698 = vrot.lane.b32.xlu0 %v11401_v43, %s9276_s16 }
 0x819   : > { %6768 = vrot.lane.b32.xlu1 %v10744_v56, %s9277_s8  ;;  %v11404_v56 = vld [vmem:[#allocation38_spill] sm:$0xff]  ;;  %v10844_v20 = vpop.permute.xlu1 %6421 }
 0x81c   : > { %6762 = vrot.lane.b32.xlu0 %v10714_v10, %s9277_s8  ;;  %v10838_v10 = vpop.permute.xlu0 %6423 }
 0x81d   : > { %6708 = vrot.lane.b32.xlu1 %v11402_v35, %s9276_s16 }
 0x820   : > { %6702 = vrot.lane.b32.xlu0 %v11403_v34, %s9276_s16 }
 0x821   : > { %6772 = vrot.lane.b32.xlu1 %v10716_v41, %s9277_s8  ;;  %v11406_v41 = vld [vmem:[#allocation32_spill] sm:$0xff] }
 0x824   : > { %6766 = vrot.lane.b32.xlu0 %v10746_v13, %s9277_s8  ;;  %v10850_v13 = vpop.permute.xlu0 %6510 }
 0x825   : > { %6712 = vrot.lane.b32.xlu1 %v11404_v56, %s9276_s16 }
 0x828   : > { %6706 = vrot.lane.b32.xlu0 %v11405_v28, %s9276_s16 }
 0x829   : > { %6776 = vrot.lane.b32.xlu1 %v10748_v8, %s9277_s8 }
 0x82c   : > { %6770 = vrot.lane.b32.xlu0 %v10718_v30, %s9277_s8  ;;  %v11408_v30 = vld [vmem:[#allocation40_spill] sm:$0xff] }
 0x82d   : > { %6716 = vrot.lane.b32.xlu1 %v11406_v41, %s9276_s16 }
 0x830   : > { %6710 = vrot.lane.b32.xlu0 %v11407_v38, %s9276_s16  ;;  %v5895_v0 = vpop.xlane.xlu1 %5894 }
 0x831   : > { %v5939_v46 = vadd.f32 1e-08, %v5895_v0  ;;  %6780 = vrot.lane.b32.xlu1 %v10720_v52, %s9277_s8 }
 0x832   : > { %v5892_v11 = vpop.xlane.xlu0 %5891 }
 0x833   : > { %v5938_v8 = vadd.f32 1e-08, %v5892_v11  ;;  %8998 = vrcp.f32 %v5939_v46 }
 0x834   : > { %6774 = vrot.lane.b32.xlu0 %v10750_v55, %s9277_s8  ;;  %v11410_v55 = vld [vmem:[#allocation34_spill] sm:$0xff] }
 0x835   : > { %9000 = vrcp.f32 %v5938_v8  ;;  %6720 = vrot.lane.b32.xlu1 %v11408_v30, %s9276_s16 }
 0x838   : > { %v5907_v25 = vpop.xlane.xlu0 %5906  ;;  %6714 = vrot.lane.b32.xlu0 %v11409_v3, %s9276_s16 }
 0x839   : > { %v5943_v53 = vadd.f32 1e-08, %v5907_v25  ;;  %6784 = vrot.lane.b32.xlu1 %v10752_v51, %s9277_s8 }
 0x83a   : > { %v5904_v24 = vpop.xlane.xlu1 %5903 }
 0x83b   : > { %v5942_v52 = vadd.f32 1e-08, %v5904_v24  ;;  %9002 = vrcp.f32 %v5943_v53 }
 0x83c   : > { %6778 = vrot.lane.b32.xlu0 %v10722_v37, %s9277_s8  ;;  %v11412_v37 = vld [vmem:[#allocation42_spill] sm:$0xff] }
 0x83d   : > { %9004 = vrcp.f32 %v5942_v52  ;;  %6724 = vrot.lane.b32.xlu1 %v11410_v55, %s9276_s16 }
 0x840   : > { %6718 = vrot.lane.b32.xlu0 %v11411_v7, %s9276_s16  ;;  %v8999_v32 = vpop.eup %8998 }
 0x841   : > { %6788 = vrot.lane.b32.xlu1 %v10724_v21, %s9277_s8  ;;  %v5971_v50 = vmul.f32 %v8999_v32, %v10728_v2  ;;  %v11413_v21 = vld [vmem:[#allocation35_spill] sm:$0xff] }
 0x842   : > { %v9001_v31 = vpop.eup %9000 }
 0x843   : > { %v5970_v51 = vmul.f32 %v9001_v31, %v10732_v48 }
 0x844   : > { %6782 = vrot.lane.b32.xlu0 %v10754_v60, %s9277_s8 }
 0x845   : > { %8599 = vmatprep.mubr.msk.f32.mxu0 %vm1233_vm2, %v5970_v51  ;;  %6728 = vrot.lane.b32.xlu1 %v11412_v37, %s9276_s16 }
 0x846   : > { %8600 = vmatmul.mubr.msk.f32.vlgmr.msra.gmra.mxu0 %vm1233_vm2, %v5971_v50 }
 0x847   : > { %8610 = vmatpush3.msra.mxu0 %v10704_v54  ;;  %v11414_v54 = vld [vmem:[#allocation43_spill] sm:$0xff] }
 0x848   : > { %8611 = vmatprep.subr.mxu0 %v6161_v33  ;;  %6722 = vrot.lane.b32.xlu0 %v11413_v21, %s9276_s16  ;;  %v9003_v18 = vpop.eup %9002 }
 0x849   : > { %8612 = vmatpush3.msra.mxu0 %v6161_v33  ;;  %v5975_v2 = vmul.f32 %v9003_v18, %v10736_v61 }
 0x84a   : > { %v9005_v48 = vpop.eup %9004  ;;  %8623 = vmatprep.subr.mxu0 %v6337_v36 }
 0x84b   : > { %v5974_v60 = vmul.f32 %v9005_v48, %v10740_v44 }
 0x84c   : > { %6786 = vrot.lane.b32.xlu0 %v10726_v29, %s9277_s8 }
 0x84d   : > { %8613 = vmatprep.mubr.msk.f32.mxu0 %vm1233_vm2, %v5974_v60 }
 0x84e   : > { %8614 = vmatmul.mubr.msk.f32.vlgmr.msra.gmra.mxu0 %vm1233_vm2, %v5975_v2 }
 0x84f   : > { %8624 = vmatpush3.msra.mxu0 %v6337_v36 }
 0x850   : > { %8625 = vmatprep.subr.mxu0 %v6335_v58  ;;  %6726 = vrot.lane.b32.xlu0 %v11414_v54, %s9276_s16  ;;  %s9190_s16 = scalar_lea.vmem %s7541_s14, 128 }
 0x851   : > { %8626 = vmatpush3.msra.mxu0 %v6335_v58  ;;  %p9191_p5 = scmp.ne.s32.totalorder %s7541_s14, %s9190_s16 }
 0x852   : > { %8637 = vmatprep.subr.mxu0 %v10850_v13 }
 0x853   : > { %p9192_p7 = pnand %p9191_p5, %p11431_p2 }
 0x855   : > { %p9193_p12 = pneg %p9192_p7 }
 0x85b   : > { %v5916_v62 = vpop.xlane.xlu1 %5915 }
 0x85c   : > { %v5946_v57 = vadd.f32 1e-08, %v5916_v62 }
 0x85e   : > { %9006 = vrcp.f32 %v5946_v57 }
 0x86b   : > { %v9007_v44 = vpop.eup %9006  ;;  %v5901_v4 = vpop.xlane.xlu0 %5900 }
 0x86c   : > { %v5978_v29 = vmul.f32 %v9007_v44, %v10760_v59  ;;  %v5941_v14 = vadd.f32 1e-08, %v5901_v4  ;;  %v11416_v44 = vld [vmem:[#allocation22_spill] sm:$0xff] }
 0x86e   : > { %8627 = vmatprep.mubr.msk.f32.mxu0 %vm1233_vm2, %v5978_v29 }
 0x86f   : > { %v5919_v61 = vpop.xlane.xlu0 %5918 }
 0x870   : > { %v5947_v6 = vadd.f32 1e-08, %v5919_v61 }
 0x872   : > { %9008 = vrcp.f32 %v5947_v6  ;;  %v11417_v6 = vld [vmem:[#allocation15_spill] sm:$0xff] }
 0x873   : > { %v5898_v39 = vpop.xlane.xlu0 %5897  ;;  %9010 = vrcp.f32 %v5941_v14 }
 0x874   : > { %v5940_v16 = vadd.f32 1e-08, %v5898_v39 }
 0x875   : > { %v5910_v19 = vpop.xlane.xlu1 %5909 }
 0x876   : > { %9012 = vrcp.f32 %v5940_v16  ;;  %v5944_v1 = vadd.f32 1e-08, %v5910_v19  ;;  %v11418_v19 = vld [vmem:[#allocation16_spill] sm:$0xff] }
 0x877   : > { %v5913_v43 = vpop.xlane.xlu0 %5912 }
 0x878   : > { %9014 = vrcp.f32 %v5944_v1  ;;  %v5945_v33 = vadd.f32 1e-08, %v5913_v43 }
 0x879   : > { %v5928_v35 = vpop.xlane.xlu1 %5927 }
 0x87a   : > { %9016 = vrcp.f32 %v5945_v33  ;;  %v5950_v34 = vadd.f32 1e-08, %v5928_v35  ;;  %v11419_v35 = vld [vmem:[#allocation23_spill] sm:$0xff] }
 0x87b   : > { %v5931_v36 = vpop.xlane.xlu0 %5930 }
 0x87c   : > { %9018 = vrcp.f32 %v5950_v34  ;;  %v5951_v59 = vadd.f32 1e-08, %v5931_v36 }
 0x87d   : > { %v5922_v56 = vpop.xlane.xlu1 %5921 }
 0x87e   : > { %9020 = vrcp.f32 %v5951_v59  ;;  %v5948_v58 = vadd.f32 1e-08, %v5922_v56 }
 0x87f   : > { %v9009_v28 = vpop.eup %9008  ;;  %v5925_v41 = vpop.xlane.xlu0 %5924 }
 0x880   : > { %9022 = vrcp.f32 %v5948_v58  ;;  %v5949_v38 = vadd.f32 1e-08, %v5925_v41  ;;  %v5979_v0 = vmul.f32 %v9009_v28, %v10768_v23  ;;  %v9011_v11 = vpop.eup %9010  ;;  %v11420_v28 = vld [vmem:[#allocation24_spill] sm:$0xff] }
 0x881   : > { %v6509_v46 = vpop.permute.xlu1 %6508  ;;  %v5973_v52 = vmul.f32 %v9011_v11, %v10764_v12 }
 0x882   : > { %9024 = vrcp.f32 %v5949_v38  ;;  %8628 = vmatmul.mubr.msk.f32.vlgmr.msra.gmra.mxu0 %vm1233_vm2, %v5979_v0 }
 0x883   : > { %v9013_v8 = vpop.eup %9012  ;;  %8638 = vmatpush3.msra.mxu0 %v10850_v13  ;;  %v5937_v30 = vpop.xlane.xlu0 %5936 }
 0x884   : > { %8639 = vmatprep.subr.mxu0 %v6509_v46  ;;  %v5972_v25 = vmul.f32 %v9013_v8, %v10772_v26  ;;  %v5953_v53 = vadd.f32 1e-08, %v5937_v30 }
 0x885   : > { %v9015_v3 = vpop.eup %9014  ;;  %8640 = vmatpush3.msra.mxu0 %v6509_v46  ;;  %v6596_v24 = vpop.permute.xlu1 %6595  ;;  %v11421_v46 = vld [vmem:[#allocation17_spill] sm:$0xff] }
 0x886   : > { %8606 = vmatprep.mubr.msk.f32.mxu1 %vm1233_vm2, %v5972_v25  ;;  %v5976_v23 = vmul.f32 %v9015_v3, %v10778_v40  ;;  %9026 = vrcp.f32 %v5953_v53  ;;  %v11422_v53 = vld [vmem:[#allocation18_spill] sm:$0xff] }
 0x887   : > { %v9017_v55 = vpop.eup %9016  ;;  %v5934_v7 = vpop.xlane.xlu0 %5933  ;;  %8607 = vmatmul.mubr.msk.f32.vlgmr.msra.gmra.mxu1 %vm1233_vm2, %v5973_v52 }
 0x888   : > { %v5952_v32 = vadd.f32 1e-08, %v5934_v7  ;;  %8617 = vmatpush3.msra.mxu1 %v10709_v15  ;;  %8620 = vmatprep.mubr.msk.f32.mxu1 %vm1233_vm2, %v5976_v23  ;;  %v5977_v26 = vmul.f32 %v9017_v55, %v10774_v22  ;;  %v11423_v55 = vld [vmem:[#allocation25_spill] sm:$0xff] }
 0x889   : > { %v9019_v13 = vpop.eup %9018  ;;  %8618 = vmatprep.subr.mxu1 %v10828_v27  ;;  %v10906_v12 = vpop.permute.xlu1 %6700 }
 0x88a   : > { %9028 = vrcp.f32 %v5952_v32  ;;  %8619 = vmatpush3.msra.mxu1 %v10828_v27  ;;  %v5982_v40 = vmul.f32 %v9019_v13, %v10782_v17 }
 0x88b   : > { %v9021_v31 = vpop.eup %9020  ;;  %8630 = vmatprep.subr.mxu1 %v10838_v10  ;;  %v6598_v51 = vpop.permute.xlu0 %6597  ;;  %8621 = vmatmul.mubr.msk.f32.vlgmr.msra.gmra.mxu1 %vm1233_vm2, %v5977_v26 }
 0x88c   : > { %8631 = vmatpush3.msra.mxu1 %v10838_v10  ;;  %8641 = vmatprep.mubr.msk.f32.mxu0 %vm1233_vm2, %v5982_v40  ;;  %v5983_v15 = vmul.f32 %v9021_v31, %v10786_v5  ;;  %v11424_v31 = vld [vmem:[#allocation26_spill] sm:$0xff] }
 0x88d   : > { %v9023_v22 = vpop.eup %9022  ;;  %8632 = vmatprep.subr.mxu1 %v10844_v20  ;;  %v10916_v50 = vpop.permute.xlu1 %6764 }
 0x88e   : > { %8633 = vmatpush3.msra.mxu1 %v10844_v20  ;;  %8642 = vmatmul.mubr.msk.f32.vlgmr.msra.gmra.mxu0 %vm1233_vm2, %v5983_v15  ;;  %v5980_v17 = vmul.f32 %v9023_v22, %v10794_v49  ;;  %v11415_v20 = vld [vmem:[#allocation21_spill] sm:$0xff] }
 0x88f   : > { %v9025_v27 = vpop.eup %9024  ;;  %8644 = vmatprep.subr.mxu1 %v6598_v51  ;;  %v10921_v37 = vpop.permute.xlu0 %6698 }
 0x890   : > { %8634 = vmatprep.mubr.msk.f32.mxu1 %vm1233_vm2, %v5980_v17  ;;  %v5981_v10 = vmul.f32 %v9025_v27, %v10790_v63  ;;  %v11425_v17 = vld [vmem:[#allocation19_spill] sm:$0xff] }
 0x891   : > { %v6705_v5 = vpop.permute.xlu1 %6704 }
 0x892   : > { %8635 = vmatmul.mubr.msk.f32.vlgmr.msra.gmra.mxu1 %vm1233_vm2, %v5981_v10  ;;  %v6877_v18 = vsel %vm494_vm1, %v11415_v20, %v6705_v5 }
 0x893   : > { %8645 = vmatpush3.msra.mxu1 %v6598_v51  ;;  %v10926_v21 = vpop.permute.xlu0 %6762  ;;  %v9027_v48 = vpop.eup %9026 }
 0x894   : > { %8646 = vmatprep.subr.mxu1 %v6596_v24  ;;  %v5985_v57 = vmul.f32 %v9027_v48, %v10800_v42 }
 0x895   : > { %8647 = vmatpush3.msra.mxu1 %v6596_v24  ;;  %v6769_v49 = vpop.permute.xlu1 %6768 }
 0x896   : > { %v10931_v60 = vsel %vm1233_vm2, %v6877_v18, %v6769_v49  ;;  %v11426_v18 = vld [vmem:[#allocation20_spill] sm:$0xff] }
 0x897   : > { %v9029_v2 = vpop.eup %9028  ;;  %v6703_v54 = vpop.permute.xlu0 %6702 }
 0x898   : > { %v5984_v63 = vmul.f32 %v9029_v2, %v10804_v45  ;;  %v6876_v4 = vsel %vm494_vm1, %v11416_v44, %v6703_v54  ;;  %v6926_v54 = vld [vmem:[#allocation7 + $0x18] sm:$0xff] }
 0x899   : > { %v6709_v62 = vpop.permute.xlu1 %6708  ;;  %8651 = vmatprep.subr.mxu0 %v6926_v54 }
 0x89a   : > { %8648 = vmatprep.mubr.msk.f32.mxu1 %vm1233_vm2, %v5984_v63  ;;  %v6879_v14 = vsel %vm494_vm1, %v11417_v6, %v6709_v62  ;;  %v6925_v63 = vld [vmem:[#allocation7 + $0x10] sm:$0xff]  ;;  %8652 = vmatpush3.msra.mxu0 %v6926_v54  ;;  %v6924_v62 = vld [vmem:[#allocation7 + $0x8] sm:$0xff] }
 0x89b   : > { %v6767_v29 = vpop.permute.xlu0 %6766  ;;  %8649 = vmatmul.mubr.msk.f32.vlgmr.msra.gmra.mxu1 %vm1233_vm2, %v5985_v57  ;;  %8653 = vmatprep.subr.mxu0 %v6925_v63  ;;  %v6923_v57 = vld [vmem:[#allocation7] sm:$0xff] }
 0x89c   : > { %v10940_v61 = vsel %vm1233_vm2, %v6876_v4, %v6767_v29  ;;  %8654 = vmatpush3.msra.mxu0 %v6925_v63 }
 0x89d   : > { %v6773_v39 = vpop.permute.xlu1 %6772  ;;  %8655 = vmatprep.subr.mxu0 %v6924_v62 }
 0x89e   : > { %v10945_v45 = vsel %vm1233_vm2, %v6879_v14, %v6773_v39  ;;  %8656 = vmatpush3.msra.mxu0 %v6924_v62 }
 0x89f   : > { %v6707_v16 = vpop.permute.xlu0 %6706  ;;  %8657 = vmatprep.subr.mxu0 %v6923_v57 }
 0x8a0   : > { %v6878_v1 = vsel %vm494_vm1, %v11418_v19, %v6707_v16  ;;  %8658 = vmatpush3.msra.mxu0 %v6923_v57 }
 0x8a1   : > { %v6713_v42 = vpop.permute.xlu1 %6712 }
 0x8a2   : > { %v6881_v34 = vsel %vm494_vm1, %v11419_v35, %v6713_v42 }
 0x8a3   : > { %v6771_v43 = vpop.permute.xlu0 %6770 }
 0x8a4   : > { %v10950_v33 = vsel %vm1233_vm2, %v6878_v1, %v6771_v43 }
 0x8a5   : > { %v6777_v36 = vpop.permute.xlu1 %6776 }
 0x8a6   : > { %v10955_v59 = vsel %vm1233_vm2, %v6881_v34, %v6777_v36 }
 0x8a7   : > { %v6711_v56 = vpop.permute.xlu0 %6710 }
 0x8a8   : > { %v6880_v41 = vsel %vm494_vm1, %v11420_v28, %v6711_v56 }
 0x8a9   : > { %v6717_v58 = vpop.permute.xlu1 %6716 }
 0x8aa   : > { %v6883_v11 = vsel %vm494_vm1, %v11421_v46, %v6717_v58 }
 0x8ab   : > { %v6775_v38 = vpop.permute.xlu0 %6774 }
 0x8ac   : > { %v10960_v0 = vsel %vm1233_vm2, %v6880_v41, %v6775_v38  ;;  %v11427_v38 = vld [vmem:[#allocation13_spill] sm:$0xff] }
 0x8ad   : > { %v6781_v8 = vpop.permute.xlu1 %6780  ;;  %v6874_v46 = vsel %vm494_vm1, %v11427_v38, %v10921_v37 }
 0x8ae   : > { %v10965_v30 = vsel %vm1233_vm2, %v6883_v11, %v6781_v8  ;;  %v11428_v8 = vld [vmem:[#allocation14_spill] sm:$0xff] }
 0x8af   : > { %v6715_v25 = vpop.permute.xlu0 %6714 }
 0x8b0   : > { %v6882_v24 = vsel %vm494_vm1, %v11422_v53, %v6715_v25 }
 0x8b1   : > { %v6721_v3 = vpop.permute.xlu1 %6720 }
 0x8b2   : > { %v6885_v7 = vsel %vm494_vm1, %v11423_v55, %v6721_v3 }
 0x8b3   : > { %v6779_v52 = vpop.permute.xlu0 %6778 }
 0x8b4   : > { %v10970_v23 = vsel %vm1233_vm2, %v6882_v24, %v6779_v52 }
 0x8b5   : > { %v6785_v32 = vpop.permute.xlu1 %6784 }
 0x8b6   : > { %v10975_v26 = vsel %vm1233_vm2, %v6885_v7, %v6785_v32 }
 0x8b7   : > { %v6719_v13 = vpop.permute.xlu0 %6718 }
 0x8b8   : > { %v6884_v51 = vsel %vm494_vm1, %v11424_v31, %v6719_v13 }
 0x8b9   : > { %v6725_v40 = vpop.permute.xlu1 %6724 }
 0x8ba   : > { %v6887_v27 = vsel %vm494_vm1, %v11425_v17, %v6725_v40 }
 0x8bb   : > { %v6783_v15 = vpop.permute.xlu0 %6782 }
 0x8bc   : > { %v10980_v22 = vsel %vm1233_vm2, %v6884_v51, %v6783_v15 }
 0x8bd   : > { %v6789_v10 = vpop.permute.xlu1 %6788 }
 0x8be   : > { %v10985_v5 = vsel %vm1233_vm2, %v6887_v27, %v6789_v10 }
 0x8bf   : > { %v6723_v20 = vpop.permute.xlu0 %6722 }
 0x8c0   : > { %v6886_v49 = vsel %vm494_vm1, %v11426_v18, %v6723_v20 }
 0x8c1   : > { %v6729_v28 = vpop.permute.xlu1 %6728 }
 0x8c3   : > { %v6787_v48 = vpop.permute.xlu0 %6786 }
 0x8c4   : > { %v10990_v2 = vsel %vm1233_vm2, %v6886_v49, %v6787_v48  ;;  %v11430_v48 = vld [vmem:[#allocation27_spill] sm:$0xff] }
 0x8c7   : > { %v6727_v41 = vpop.permute.xlu0 %6726 }
 0x906   : > { %v8601_v44 = vpop.f32.mrf.mxu0 }
 0x907   : > { %6828 = vrot.lane.b32.xlu1 %v8601_v44, %s9278_s29  ;;  %v11123_v44 = vld [vmem:[%s11336_s3] ss:$0 sm:$0xff] }
 0x908   : > { %v6064_v4 = vpop.f32.mrf.mxu0 }
 0x909   : > { %6826 = vrot.lane.b32.xlu0 %v6064_v4, %s9278_s29 }
 0x90e   : > { %v8615_v29 = vpop.f32.mrf.mxu0 }
 0x90f   : > { %6836 = vrot.lane.b32.xlu1 %v8615_v29, %s9278_s29 }
 0x910   : > { %v6238_v6 = vpop.f32.mrf.mxu0 }
 0x911   : > { %6834 = vrot.lane.b32.xlu0 %v6238_v6, %s9278_s29 }
 0x942   : > { %v8629_v39 = vpop.f32.mrf.mxu0 }
 0x944   : > { %v6412_v42 = vpop.f32.mrf.mxu0 }
 0x947   : > { %v8608_v14 = vpop.f32.mrf.mxu1 }
 0x948   : > { %6832 = vrot.lane.b32.xlu1 %v8608_v14, %s9278_s29 }
 0x949   : > { %v6151_v16 = vpop.f32.mrf.mxu1 }
 0x94a   : > { %6830 = vrot.lane.b32.xlu0 %v6151_v16, %s9278_s29 }
 0x94b   : > { %v8622_v19 = vpop.f32.mrf.mxu1 }
 0x94c   : > { %6844 = vrot.lane.b32.xlu1 %v8629_v39, %s9278_s29  ;;  %v11130_v39 = vld [vmem:[%s11337_s4] ss:$0 sm:$0xff] }
 0x94d   : > { %v6325_v1 = vpop.f32.mrf.mxu1 }
 0x94e   : > { %6842 = vrot.lane.b32.xlu0 %v6412_v42, %s9278_s29  ;;  %v8643_v43 = vpop.f32.mrf.mxu0 }
 0x950   : > { %6840 = vrot.lane.b32.xlu1 %v8622_v19, %s9278_s29  ;;  %v6586_v35 = vpop.f32.mrf.mxu0 }
 0x952   : > { %6838 = vrot.lane.b32.xlu0 %v6325_v1, %s9278_s29  ;;  %v8636_v34 = vpop.f32.mrf.mxu1 }
 0x954   : > { %6852 = vrot.lane.b32.xlu1 %v8643_v43, %s9278_s29  ;;  %v6499_v36 = vpop.f32.mrf.mxu1 }
 0x956   : > { %6850 = vrot.lane.b32.xlu0 %v6586_v35, %s9278_s29 }
 0x958   : > { %6848 = vrot.lane.b32.xlu1 %v8636_v34, %s9278_s29 }
 0x95a   : > { %6846 = vrot.lane.b32.xlu0 %v6499_v36, %s9278_s29 }
 0x95b   : > { %v8650_v56 = vpop.f32.mrf.mxu1 }
 0x95c   : > { %6792 = vrot.lane.b32.xlu1 %v10756_v9, %s9277_s8  ;;  %v6875_v9 = vsel %vm494_vm1, %v11428_v8, %v10906_v12 }
 0x95d   : > { %v6673_v58 = vpop.f32.mrf.mxu1  ;;  %v6891_v3 = vsel %vm1233_vm2, %v6875_v9, %v10916_v50 }
 0x95e   : > { %6790 = vrot.lane.b32.xlu0 %v10758_v47, %s9277_s8  ;;  %v6890_v47 = vsel %vm1233_vm2, %v6874_v46, %v10926_v21  ;;  %s9194_s8 = sshll.u32 %s9279_s22, 4  ;;  %s9195_s8 = int_to_ptr.vmem [resolvable:$false] %s9194_s8 }
 0x95f   : > { %p9197_p13 = scmp.lt.s32.totalorder %s7541_s14, %s9195_s8 }
 0x960   : > { %6856 = vrot.lane.b32.xlu1 %v8650_v56, %s9278_s29 }
 0x962   : > { %6854 = vrot.lane.b32.xlu0 %v6673_v58, %s9278_s29  ;;  %s9196_s29 = scalar_lea.vmem %s9195_s8, 256 }
 0x963   : > { %p9198_p0 = scmp.lt.s32.totalorder %s9196_s29, %s9190_s16 }
 0x965   : > { %p9199_p10 = por %p9198_p0, %p9197_p13 }
 0x967   : > { %p9200_p3 = pnand %p9199_p10, %p9193_p12 }
 0x979   : > { %v6829_v11 = vpop.permute.xlu1 %6828 }
 0x97a   : > { %v11026_v24 = vsel %vm6906_vm3, %v6891_v3, %v6829_v11 }
 0x97b   : > { %v6827_v25 = vpop.permute.xlu0 %6826 }
 0x97c   : > { %v11023_v53 = vsel %vm6906_vm3, %v6890_v47, %v6827_v25 }
 0x97d   : > { %8659 = vmatprep.mubr.msk.f32.mxu0 %vm294_vm0, %v11023_v53 }
 0x97e   : > { %8660 = vmatmul.mubr.msk.f32.vlgmr.msra.gmra.mxu0 %vm294_vm0, %v11026_v24 }
 0x981   : > { %v6837_v12 = vpop.permute.xlu1 %6836 }
 0x983   : > { %v6835_v37 = vpop.permute.xlu0 %6834 }
 0x984   : > { %v11044_v32 = vsel %vm6906_vm3, %v10950_v33, %v6835_v37 }
 0x9ba   : > { %v6833_v52 = vpop.permute.xlu1 %6832 }
 0x9bb   : > { %v11038_v50 = vsel %vm6906_vm3, %v10931_v60, %v6833_v52 }
 0x9bc   : > { %v6831_v21 = vpop.permute.xlu0 %6830 }
 0x9bd   : > { %v11034_v55 = vsel %vm6906_vm3, %v10940_v61, %v6831_v21  ;;  %v11052_v61 = vsel %vm6906_vm3, %v10945_v45, %v6837_v12 }
 0x9be   : > { %8662 = vmatprep.mubr.msk.f32.mxu0 %vm294_vm0, %v11034_v55  ;;  %v6845_v7 = vpop.permute.xlu1 %6844 }
 0x9bf   : > { %8663 = vmatmul.mubr.msk.f32.gmra.mxu0 %vm294_vm0, %v11038_v50 }
 0x9c0   : > { %v6843_v13 = vpop.permute.xlu0 %6842  ;;  %8665 = vmatprep.mubr.msk.f32.mxu0 %vm294_vm0, %v11044_v32 }
 0x9c1   : > { %v11068_v45 = vsel %vm6906_vm3, %v10970_v23, %v6843_v13 }
 0x9c2   : > { %v6841_v60 = vpop.permute.xlu1 %6840 }
 0x9c3   : > { %8666 = vmatmul.mubr.msk.f32.gmra.mxu0 %vm294_vm0, %v11052_v61  ;;  %v11062_v31 = vsel %vm6906_vm3, %v10955_v59, %v6841_v60 }
 0x9c4   : > { %v6839_v40 = vpop.permute.xlu0 %6838 }
 0x9c5   : > { %v11058_v33 = vsel %vm6906_vm3, %v10960_v0, %v6839_v40  ;;  %v11076_v0 = vsel %vm6906_vm3, %v10965_v30, %v6845_v7 }
 0x9c6   : > { %8668 = vmatprep.mubr.msk.f32.mxu0 %vm294_vm0, %v11058_v33  ;;  %v6853_v51 = vpop.permute.xlu1 %6852 }
 0x9c7   : > { %8669 = vmatmul.mubr.msk.f32.gmra.mxu0 %vm294_vm0, %v11062_v31 }
 0x9c8   : > { %v6851_v15 = vpop.permute.xlu0 %6850  ;;  %8671 = vmatprep.mubr.msk.f32.mxu0 %vm294_vm0, %v11068_v45 }
 0x9c9   : > { %v11092_v30 = vsel %vm6906_vm3, %v10990_v2, %v6851_v15  ;;  %v6889_v2 = vsel %vm494_vm1, %v11430_v48, %v6729_v28 }
 0x9ca   : > { %v6849_v59 = vpop.permute.xlu1 %6848 }
 0x9cb   : > { %8672 = vmatmul.mubr.msk.f32.gmra.mxu0 %vm294_vm0, %v11076_v0  ;;  %v11086_v27 = vsel %vm6906_vm3, %v10975_v26, %v6849_v59  ;;  %v11429_v26 = vld [vmem:[#allocation28_spill] sm:$0xff] }
 0x9cc   : > { %v6847_v17 = vpop.permute.xlu0 %6846  ;;  %v6888_v18 = vsel %vm494_vm1, %v11429_v26, %v6727_v41 }
 0x9cd   : > { %v11082_v23 = vsel %vm6906_vm3, %v10980_v22, %v6847_v17  ;;  %v11100_v22 = vsel %vm6906_vm3, %v10985_v5, %v6853_v51 }
 0x9ce   : > { %8674 = vmatprep.mubr.msk.f32.mxu0 %vm294_vm0, %v11082_v23  ;;  %v6793_v10 = vpop.permute.xlu1 %6792 }
 0x9cf   : > { %8675 = vmatmul.mubr.msk.f32.gmra.mxu0 %vm294_vm0, %v11086_v27  ;;  %v6905_v62 = vsel %vm1233_vm2, %v6889_v2, %v6793_v10 }
 0x9d0   : > { %v6791_v20 = vpop.permute.xlu0 %6790  ;;  %8677 = vmatprep.mubr.msk.f32.mxu0 %vm294_vm0, %v11092_v30 }
 0x9d1   : > { %v6904_v54 = vsel %vm1233_vm2, %v6888_v18, %v6791_v20 }
 0x9d2   : > { %v6857_v49 = vpop.permute.xlu1 %6856 }
 0x9d3   : > { %8678 = vmatmul.mubr.msk.f32.gmra.mxu0 %vm294_vm0, %v11100_v22  ;;  %v11114_v5 = vsel %vm6906_vm3, %v6905_v62, %v6857_v49 }
 0x9d4   : > { %v6855_v63 = vpop.permute.xlu0 %6854 }
 0x9d5   : > { %v11111_v57 = vsel %vm6906_vm3, %v6904_v54, %v6855_v63 }
 0x9d6   : > { %8680 = vmatprep.mubr.msk.f32.mxu0 %vm294_vm0, %v11111_v57 }
 0x9d7   : > { %8681 = vmatmul.mubr.msk.f32.gmra.mxu0 %vm294_vm0, %v11114_v5 }
 0xa3e   : > { %v8661_v4 = vpop.f32.mrf.mxu0 }
 0xa3f   : > { %v7128_v29 = vadd.f32 %v8661_v4, %v11123_v44 }
 0xa40   : > { %v7041_v6 = vpop.f32.mrf.mxu0 }
 0xa41   : > { %9030 = vtanh.f32 %v7128_v29  ;;  %v7127_v14 = vadd.f32 %v11123_v44, %v7041_v6 }
 0xa43   : > { %9032 = vtanh.f32 %v7127_v14 }
 0xa4e   : > { %v9031_v16 = vpop.eup %9030 }
 0xa4f   : > { %v7167_v42 = vmul.f32 %v9031_v16, %v11130_v39 }
 0xa50   : > { %v9033_v19 = vpop.eup %9032 }
 0xa51   : > { %v7185_v1 = vsel %vm294_vm0, %v7167_v42, 0.0  ;;  %v7166_v43 = vmul.f32 %v9033_v19, %v11130_v39 }
 0xa52   : > { %7186 = vadd.xlane.f32.xlu1 %v7185_v1 }
 0xa53   : > { %v7182_v35 = vsel %vm294_vm0, %v7166_v43, 0.0 }
 0xa54   : > { %7183 = vadd.xlane.f32.xlu0 %v7182_v35 }
 0xa7f   : > { %v8664_v34 = vpop.f32.mrf.mxu0 }
 0xa80   : > { %v7130_v36 = vadd.f32 %v8664_v34, %v11123_v44 }
 0xa81   : > { %v7051_v56 = vpop.f32.mrf.mxu0 }
 0xa82   : > { %9034 = vtanh.f32 %v7130_v36  ;;  %v7129_v58 = vadd.f32 %v11123_v44, %v7051_v56 }
 0xa83   : > { %v8667_v28 = vpop.f32.mrf.mxu0 }
 0xa84   : > { %9036 = vtanh.f32 %v7129_v58  ;;  %v7132_v41 = vadd.f32 %v8667_v28, %v11123_v44 }
 0xa85   : > { %v7061_v38 = vpop.f32.mrf.mxu0 }
 0xa86   : > { %9038 = vtanh.f32 %v7132_v41  ;;  %v7131_v46 = vadd.f32 %v11123_v44, %v7061_v38 }
 0xa87   : > { %v8670_v11 = vpop.f32.mrf.mxu0 }
 0xa88   : > { %9040 = vtanh.f32 %v7131_v46  ;;  %v7134_v8 = vadd.f32 %v8670_v11, %v11123_v44 }
 0xa89   : > { %v7071_v9 = vpop.f32.mrf.mxu0 }
 0xa8a   : > { %9042 = vtanh.f32 %v7134_v8  ;;  %v7133_v47 = vadd.f32 %v11123_v44, %v7071_v9 }
 0xa8b   : > { %v8673_v25 = vpop.f32.mrf.mxu0 }
 0xa8c   : > { %9044 = vtanh.f32 %v7133_v47  ;;  %v7136_v3 = vadd.f32 %v8673_v25, %v11123_v44 }
 0xa8d   : > { %v7081_v12 = vpop.f32.mrf.mxu0 }
 0xa8e   : > { %9046 = vtanh.f32 %v7136_v3  ;;  %v7135_v37 = vadd.f32 %v11123_v44, %v7081_v12 }
 0xa8f   : > { %v9035_v52 = vpop.eup %9034  ;;  %v8676_v21 = vpop.f32.mrf.mxu0 }
 0xa90   : > { %9048 = vtanh.f32 %v7135_v37  ;;  %v7138_v7 = vadd.f32 %v8676_v21, %v11123_v44  ;;  %v7169_v13 = vmul.f32 %v9035_v52, %v11130_v39 }
 0xa91   : > { %v9037_v60 = vpop.eup %9036  ;;  %v7091_v40 = vpop.f32.mrf.mxu0 }
 0xa92   : > { %9050 = vtanh.f32 %v7138_v7  ;;  %v7137_v51 = vadd.f32 %v11123_v44, %v7091_v40  ;;  %v7191_v15 = vsel %vm294_vm0, %v7169_v13, 0.0  ;;  %v7168_v59 = vmul.f32 %v9037_v60, %v11130_v39 }
 0xa93   : > { %v9039_v17 = vpop.eup %9038  ;;  %7192 = vadd.xlane.f32.xlu0 %v7191_v15  ;;  %v8679_v10 = vpop.f32.mrf.mxu0 }
 0xa94   : > { %9052 = vtanh.f32 %v7137_v51  ;;  %v7140_v20 = vadd.f32 %v8679_v10, %v11123_v44  ;;  %v7171_v49 = vmul.f32 %v9039_v17, %v11130_v39  ;;  %v7188_v2 = vsel %vm294_vm0, %v7168_v59, 0.0 }
 0xa95   : > { %v9041_v26 = vpop.eup %9040  ;;  %v7101_v18 = vpop.f32.mrf.mxu0 }
 0xa96   : > { %9054 = vtanh.f32 %v7140_v20  ;;  %v7139_v48 = vadd.f32 %v11123_v44, %v7101_v18  ;;  %v7170_v54 = vmul.f32 %v9041_v26, %v11130_v39  ;;  %v7197_v16 = vsel %vm294_vm0, %v7171_v49, 0.0 }
 0xa97   : > { %v9043_v63 = vpop.eup %9042  ;;  %7189 = vadd.xlane.f32.xlu0 %v7188_v2  ;;  %v8682_v62 = vpop.f32.mrf.mxu0 }
 0xa98   : > { %9056 = vtanh.f32 %v7139_v48  ;;  %v7142_v4 = vadd.f32 %v8682_v62, %v11123_v44  ;;  %v7194_v29 = vsel %vm294_vm0, %v7170_v54, 0.0  ;;  %v7173_v1 = vmul.f32 %v9043_v63, %v11130_v39 }
 0xa99   : > { %v9045_v6 = vpop.eup %9044  ;;  %7195 = vadd.xlane.f32.xlu1 %v7194_v29  ;;  %v7111_v14 = vpop.f32.mrf.mxu0 }
 0xa9a   : > { %9058 = vtanh.f32 %v7142_v4  ;;  %v7141_v42 = vadd.f32 %v11123_v44, %v7111_v14  ;;  %v7172_v19 = vmul.f32 %v9045_v6, %v11130_v39  ;;  %v7203_v36 = vsel %vm294_vm0, %v7173_v1, 0.0 }
 0xa9b   : > { %v9047_v43 = vpop.eup %9046  ;;  %7198 = vadd.xlane.f32.xlu0 %v7197_v16 }
 0xa9c   : > { %9060 = vtanh.f32 %v7141_v42  ;;  %v7200_v35 = vsel %vm294_vm0, %v7172_v19, 0.0  ;;  %v7175_v58 = vmul.f32 %v9047_v43, %v11130_v39 }
 0xa9d   : > { %v9049_v34 = vpop.eup %9048  ;;  %7201 = vadd.xlane.f32.xlu1 %v7200_v35 }
 0xa9e   : > { %v7174_v56 = vmul.f32 %v9049_v34, %v11130_v39  ;;  %v7209_v38 = vsel %vm294_vm0, %v7175_v58, 0.0 }
 0xa9f   : > { %v9051_v28 = vpop.eup %9050  ;;  %7204 = vadd.xlane.f32.xlu0 %v7203_v36 }
 0xaa0   : > { %v7206_v44 = vsel %vm294_vm0, %v7174_v56, 0.0  ;;  %v7177_v11 = vmul.f32 %v9051_v28, %v11130_v39 }
 0xaa1   : > { %v9053_v41 = vpop.eup %9052  ;;  %7207 = vadd.xlane.f32.xlu1 %v7206_v44 }
 0xaa2   : > { %v7176_v46 = vmul.f32 %v9053_v41, %v11130_v39  ;;  %v7215_v25 = vsel %vm294_vm0, %v7177_v11, 0.0 }
 0xaa3   : > { %v9055_v8 = vpop.eup %9054  ;;  %7210 = vadd.xlane.f32.xlu0 %v7209_v38 }
 0xaa4   : > { %v7212_v9 = vsel %vm294_vm0, %v7176_v46, 0.0  ;;  %v7179_v12 = vmul.f32 %v9055_v8, %v11130_v39 }
 0xaa5   : > { %v9057_v47 = vpop.eup %9056  ;;  %7213 = vadd.xlane.f32.xlu1 %v7212_v9 }
 0xaa6   : > { %v7178_v3 = vmul.f32 %v9057_v47, %v11130_v39  ;;  %v7221_v7 = vsel %vm294_vm0, %v7179_v12, 0.0 }
 0xaa7   : > { %v9059_v37 = vpop.eup %9058  ;;  %7216 = vadd.xlane.f32.xlu0 %v7215_v25 }
 0xaa8   : > { %v7218_v52 = vsel %vm294_vm0, %v7178_v3, 0.0  ;;  %v7181_v60 = vmul.f32 %v9059_v37, %v11130_v39 }
 0xaa9   : > { %v9061_v21 = vpop.eup %9060  ;;  %7219 = vadd.xlane.f32.xlu1 %v7218_v52 }
 0xaaa   : > { %v7180_v13 = vmul.f32 %v9061_v21, %v11130_v39  ;;  %v7227_v51 = vsel %vm294_vm0, %v7181_v60, 0.0 }
 0xaab   : > { %7222 = vadd.xlane.f32.xlu0 %v7221_v7 }
 0xaac   : > { %v7224_v40 = vsel %vm294_vm0, %v7180_v13, 0.0 }
 0xaad   : > { %7225 = vadd.xlane.f32.xlu1 %v7224_v40 }
 0xaaf   : > { %7228 = vadd.xlane.f32.xlu0 %v7227_v51 }
 0xadb   : > { %v7187_v59 = vpop.xlane.xlu1 %7186 }
 0xadd   : > { %v7184_v15 = vpop.xlane.xlu0 %7183 }
 0xade   : > { %v7230_v17 = vmax.f32 %v7184_v15, %v7187_v59 }
 0xae0   : > { %v7231_v10 = vrot.slane %v7230_v17, 4 }
 0xae2   : > { %v7232_v20 = vmax.f32 %v7230_v17, %v7231_v10 }
 0xae4   : > { %v7233_v26 = vrot.slane %v7232_v20, 2 }
 0xae6   : > { %v7234_v18 = vmax.f32 %v7232_v20, %v7233_v26 }
 0xae8   : > { %v7235_v49 = vrot.slane %v7234_v18, 1 }
 0xaea   : > { %v7236_v48 = vmax.f32 %v7234_v18, %v7235_v49 }
 0xaec   : > { %v7286_v2 = vsub.f32 %v7184_v15, %v7236_v48  ;;  %v7287_v54 = vsub.f32 %v7187_v59, %v7236_v48 }
 0xaee   : > { %v7302_v63 = vmul.f32 1.442695, %v7286_v2  ;;  %v7304_v39 = vmul.f32 1.442695, %v7287_v54 }
 0xaf0   : > { %9062 = vpow2.f32 %v7302_v63 }
 0xaf1   : > { %9064 = vpow2.f32 %v7304_v39 }
 0xafd   : > { %v11178_v28 = vpop.eup %9062 }
 0xafe   : > { %v11182_v41 = vpop.eup %9064 }
 0xaff   : > { %v7334_v12 = vadd.f32 %v11182_v41, %v11178_v28 }
 0xb01   : > { %v7335_v10 = vrot.slane %v7334_v12, 4 }
 0xb1c   : > { %v7193_v62 = vpop.xlane.xlu0 %7192 }
 0xb20   : > { %v7190_v4 = vpop.xlane.xlu0 %7189 }
 0xb21   : > { %v7237_v29 = vmax.f32 %v7190_v4, %v7193_v62 }
 0xb22   : > { %v7196_v6 = vpop.xlane.xlu1 %7195 }
 0xb23   : > { %v7238_v14 = vrot.slane %v7237_v29, 4 }
 0xb24   : > { %v7199_v16 = vpop.xlane.xlu0 %7198 }
 0xb25   : > { %v7239_v42 = vmax.f32 %v7237_v29, %v7238_v14  ;;  %v7244_v19 = vmax.f32 %v7196_v6, %v7199_v16 }
 0xb26   : > { %v7202_v1 = vpop.xlane.xlu1 %7201 }
 0xb27   : > { %v7240_v43 = vrot.slane %v7239_v42, 2  ;;  %v7245_v35 = vrot.slane %v7244_v19, 4 }
 0xb28   : > { %v7205_v34 = vpop.xlane.xlu0 %7204 }
 0xb29   : > { %v7241_v36 = vmax.f32 %v7239_v42, %v7240_v43  ;;  %v7246_v56 = vmax.f32 %v7244_v19, %v7245_v35  ;;  %v7251_v58 = vmax.f32 %v7202_v1, %v7205_v34  ;;  %v7336_v42 = vadd.f32 %v7335_v10, %v7334_v12 }
 0xb2a   : > { %v11180_v44 = vpop.xlane.xlu1 %7207 }
 0xb2b   : > { %v7242_v38 = vrot.slane %v7241_v36, 1  ;;  %v7247_v46 = vrot.slane %v7246_v56, 2  ;;  %v7252_v11 = vrot.slane %v7251_v58, 4 }
 0xb2c   : > { %v7211_v8 = vpop.xlane.xlu0 %7210 }
 0xb2d   : > { %v7243_v9 = vmax.f32 %v7241_v36, %v7242_v38  ;;  %v7248_v47 = vmax.f32 %v7246_v56, %v7247_v46  ;;  %v7253_v25 = vmax.f32 %v7251_v58, %v7252_v11  ;;  %v7258_v3 = vmax.f32 %v11180_v44, %v7211_v8 }
 0xb2e   : > { %v11187_v37 = vpop.xlane.xlu1 %7213 }
 0xb2f   : > { %v7288_v52 = vsub.f32 %v7190_v4, %v7243_v9  ;;  %v7289_v21 = vsub.f32 %v7193_v62, %v7243_v9  ;;  %v7249_v7 = vrot.slane %v7248_v47, 1  ;;  %v7254_v13 = vrot.slane %v7253_v25, 2 }
 0xb30   : > { %v7259_v60 = vrot.slane %v7258_v3, 4  ;;  %v11189_v40 = vpop.xlane.xlu0 %7216 }
 0xb31   : > { %v7306_v51 = vmul.f32 1.442695, %v7288_v52  ;;  %v7308_v15 = vmul.f32 1.442695, %v7289_v21  ;;  %v7250_v59 = vmax.f32 %v7248_v47, %v7249_v7  ;;  %v7255_v17 = vmax.f32 %v7253_v25, %v7254_v13 }
 0xb32   : > { %v7260_v20 = vmax.f32 %v7258_v3, %v7259_v60  ;;  %v7265_v26 = vmax.f32 %v11187_v37, %v11189_v40  ;;  %v11193_v18 = vpop.xlane.xlu1 %7219  ;;  %v7337_v52 = vrot.slane %v7336_v42, 2 }
 0xb33   : > { %9066 = vpow2.f32 %v7306_v51  ;;  %v7290_v49 = vsub.f32 %v7196_v6, %v7250_v59  ;;  %v7291_v48 = vsub.f32 %v7199_v16, %v7250_v59  ;;  %v7256_v2 = vrot.slane %v7255_v17, 1 }
 0xb34   : > { %9068 = vpow2.f32 %v7308_v15  ;;  %v7261_v54 = vrot.slane %v7260_v20, 2  ;;  %v7266_v63 = vrot.slane %v7265_v26, 4  ;;  %v7223_v39 = vpop.xlane.xlu0 %7222 }
 0xb35   : > { %v7310_v62 = vmul.f32 1.442695, %v7290_v49  ;;  %v7312_v4 = vmul.f32 1.442695, %v7291_v48  ;;  %v7257_v29 = vmax.f32 %v7255_v17, %v7256_v2  ;;  %v7272_v14 = vmax.f32 %v11193_v18, %v7223_v39 }
 0xb36   : > { %v7262_v19 = vmax.f32 %v7260_v20, %v7261_v54  ;;  %v7267_v43 = vmax.f32 %v7265_v26, %v7266_v63  ;;  %v7226_v58 = vpop.xlane.xlu1 %7225  ;;  %v7338_v26 = vadd.f32 %v7337_v52, %v7336_v42 }
 0xb37   : > { %9070 = vpow2.f32 %v7310_v62  ;;  %v7292_v35 = vsub.f32 %v7202_v1, %v7257_v29  ;;  %v7293_v36 = vsub.f32 %v7205_v34, %v7257_v29  ;;  %v7273_v56 = vrot.slane %v7272_v14, 4 }
 0xb38   : > { %9072 = vpow2.f32 %v7312_v4  ;;  %v7263_v6 = vrot.slane %v7262_v19, 1  ;;  %v7268_v16 = vrot.slane %v7267_v43, 2  ;;  %v7229_v38 = vpop.xlane.xlu0 %7228 }
 0xb39   : > { %v7314_v46 = vmul.f32 1.442695, %v7292_v35  ;;  %v7316_v11 = vmul.f32 1.442695, %v7293_v36  ;;  %v7274_v9 = vmax.f32 %v7272_v14, %v7273_v56  ;;  %v7279_v47 = vmax.f32 %v7226_v58, %v7229_v38 }
 0xb3a   : > { %v7264_v25 = vmax.f32 %v7262_v19, %v7263_v6  ;;  %v7269_v3 = vmax.f32 %v7267_v43, %v7268_v16  ;;  %v7339_v19 = vrot.slane %v7338_v26, 1 }
 0xb3b   : > { %9074 = vpow2.f32 %v7314_v46  ;;  %v7275_v12 = vrot.slane %v7274_v9, 2  ;;  %v7280_v21 = vrot.slane %v7279_v47, 4 }
 0xb3c   : > { %9076 = vpow2.f32 %v7316_v11  ;;  %v7294_v1 = vsub.f32 %v11180_v44, %v7264_v25  ;;  %v7295_v34 = vsub.f32 %v7211_v8, %v7264_v25  ;;  %v7270_v7 = vrot.slane %v7269_v3, 1 }
 0xb3d   : > { %v7276_v13 = vmax.f32 %v7274_v9, %v7275_v12  ;;  %v7281_v60 = vmax.f32 %v7279_v47, %v7280_v21  ;;  %v7340_v47 = vadd.f32 %v7339_v19, %v7338_v26 }
 0xb3e   : > { %v7318_v51 = vmul.f32 1.442695, %v7294_v1  ;;  %v7320_v15 = vmul.f32 1.442695, %v7295_v34  ;;  %v7271_v59 = vmax.f32 %v7269_v3, %v7270_v7 }
 0xb3f   : > { %v7277_v17 = vrot.slane %v7276_v13, 1  ;;  %v7282_v10 = vrot.slane %v7281_v60, 2 }
 0xb40   : > { %v11197_v20 = vpop.eup %9066  ;;  %9078 = vpow2.f32 %v7318_v51  ;;  %v7296_v49 = vsub.f32 %v11187_v37, %v7271_v59  ;;  %v7297_v48 = vsub.f32 %v11189_v40, %v7271_v59 }
 0xb41   : > { %v11201_v2 = vpop.eup %9068  ;;  %9080 = vpow2.f32 %v7320_v15  ;;  %v7278_v44 = vmax.f32 %v7276_v13, %v7277_v17  ;;  %v7283_v8 = vmax.f32 %v7281_v60, %v7282_v10 }
 0xb42   : > { %v7341_v54 = vadd.f32 %v11201_v2, %v11197_v20  ;;  %v7322_v63 = vmul.f32 1.442695, %v7296_v49  ;;  %v7324_v62 = vmul.f32 1.442695, %v7297_v48 }
 0xb43   : > { %v7298_v4 = vsub.f32 %v11193_v18, %v7278_v44  ;;  %v7299_v29 = vsub.f32 %v7223_v39, %v7278_v44  ;;  %v7284_v14 = vrot.slane %v7283_v8, 1 }
 0xb44   : > { %v11206_v42 = vpop.eup %9070  ;;  %v7342_v37 = vrot.slane %v7341_v54, 4  ;;  %9082 = vpow2.f32 %v7322_v63 }
 0xb45   : > { %v11208_v40 = vpop.eup %9072  ;;  %9084 = vpow2.f32 %v7324_v62  ;;  %v7326_v43 = vmul.f32 1.442695, %v7298_v4  ;;  %v7328_v35 = vmul.f32 1.442695, %v7299_v29  ;;  %v7285_v36 = vmax.f32 %v7283_v8, %v7284_v14 }
 0xb46   : > { %v7343_v56 = vadd.f32 %v7342_v37, %v7341_v54  ;;  %v7348_v6 = vadd.f32 %v11208_v40, %v11206_v42 }
 0xb47   : > { %9086 = vpow2.f32 %v7326_v43  ;;  %v7300_v16 = vsub.f32 %v7226_v58, %v7285_v36  ;;  %v7301_v18 = vsub.f32 %v7229_v38, %v7285_v36 }
 0xb48   : > { %v11212_v39 = vpop.eup %9074  ;;  %v7344_v46 = vrot.slane %v7343_v56, 2  ;;  %v7349_v11 = vrot.slane %v7348_v6, 4  ;;  %9088 = vpow2.f32 %v7328_v35 }
 0xb49   : > { %v11214_v9 = vpop.eup %9076  ;;  %v7330_v25 = vmul.f32 1.442695, %v7300_v16  ;;  %v7332_v3 = vmul.f32 1.442695, %v7301_v18 }
 0xb4a   : > { %v7345_v52 = vadd.f32 %v7344_v46, %v7343_v56  ;;  %v7350_v12 = vadd.f32 %v7349_v11, %v7348_v6  ;;  %v7355_v21 = vadd.f32 %v11214_v9, %v11212_v39 }
 0xb4b   : > { %9090 = vpow2.f32 %v7330_v25 }
 0xb4c   : > { %v7346_v1 = vrot.slane %v7345_v52, 1  ;;  %v7351_v34 = vrot.slane %v7350_v12, 2  ;;  %v7356_v58 = vrot.slane %v7355_v21, 4  ;;  %9092 = vpow2.f32 %v7332_v3 }
 0xb4d   : > { %v11218_v38 = vpop.eup %9078  ;;  %9094 = vrcp.f32 %v7340_v47 }
 0xb4e   : > { %v11220_v7 = vpop.eup %9080  ;;  %v7347_v13 = vadd.f32 %v7346_v1, %v7345_v52  ;;  %v7352_v60 = vadd.f32 %v7351_v34, %v7350_v12  ;;  %v7357_v51 = vadd.f32 %v7356_v58, %v7355_v21 }
 0xb4f   : > { %v7362_v15 = vadd.f32 %v11220_v7, %v11218_v38 }
 0xb50   : > { %9096 = vrcp.f32 %v7347_v13  ;;  %v7353_v59 = vrot.slane %v7352_v60, 1  ;;  %v7358_v17 = vrot.slane %v7357_v51, 2 }
 0xb51   : > { %v11224_v10 = vpop.eup %9082  ;;  %v7363_v26 = vrot.slane %v7362_v15, 4 }
 0xb52   : > { %v11226_v49 = vpop.eup %9084  ;;  %v7354_v48 = vadd.f32 %v7353_v59, %v7352_v60  ;;  %v7359_v44 = vadd.f32 %v7358_v17, %v7357_v51 }
 0xb53   : > { %v7364_v8 = vadd.f32 %v7363_v26, %v7362_v15  ;;  %v7369_v54 = vadd.f32 %v11226_v49, %v11224_v10 }
 0xb54   : > { %v11230_v63 = vpop.eup %9086  ;;  %9098 = vrcp.f32 %v7354_v48  ;;  %v7360_v62 = vrot.slane %v7359_v44, 1 }
 0xb55   : > { %v11232_v4 = vpop.eup %9088  ;;  %v7365_v29 = vrot.slane %v7364_v8, 2  ;;  %v7370_v14 = vrot.slane %v7369_v54, 4 }
 0xb56   : > { %v7361_v19 = vadd.f32 %v7360_v62, %v7359_v44  ;;  %v7376_v37 = vadd.f32 %v11232_v4, %v11230_v63 }
 0xb57   : > { %v7366_v43 = vadd.f32 %v7365_v29, %v7364_v8  ;;  %v7371_v35 = vadd.f32 %v7370_v14, %v7369_v54 }
 0xb58   : > { %v11236_v36 = vpop.eup %9090  ;;  %9100 = vrcp.f32 %v7361_v19  ;;  %v7377_v56 = vrot.slane %v7376_v37, 4 }
 0xb59   : > { %v11238_v6 = vpop.eup %9092  ;;  %v7367_v16 = vrot.slane %v7366_v43, 1  ;;  %v7372_v18 = vrot.slane %v7371_v35, 2 }
 0xb5a   : > { %v9095_v46 = vpop.eup %9094  ;;  %v7378_v11 = vadd.f32 %v7377_v56, %v7376_v37  ;;  %v7383_v47 = vadd.f32 %v11238_v6, %v11236_v36 }
 0xb5b   : > { %v7368_v25 = vadd.f32 %v7367_v16, %v7366_v43  ;;  %v7373_v3 = vadd.f32 %v7372_v18, %v7371_v35  ;;  %v7398_v1 = vmul.f32 %v9095_v46, %v11178_v28  ;;  %v7399_v15 = vmul.f32 %v9095_v46, %v11182_v41 }
 0xb5c   : > { %v7379_v52 = vrot.slane %v7378_v11, 2  ;;  %v7384_v12 = vrot.slane %v7383_v47, 4 }
 0xb5d   : > { %v9097_v21 = vpop.eup %9096  ;;  %9102 = vrcp.f32 %v7368_v25  ;;  %v7374_v34 = vrot.slane %v7373_v3, 1  ;;  %v7414_v28 = vmul.f32 %v7398_v1, %v11023_v53 }
 0xb5e   : > { %v7400_v58 = vmul.f32 %v9097_v21, %v11197_v20  ;;  %v7401_v13 = vmul.f32 %v9097_v21, %v11201_v2  ;;  %v7380_v60 = vadd.f32 %v7379_v52, %v7378_v11  ;;  %v7385_v51 = vadd.f32 %v7384_v12, %v7383_v47 }
 0xb5f   : > { %v7375_v59 = vadd.f32 %v7374_v34, %v7373_v3  ;;  %v7415_v2 = vmul.f32 %v7399_v15, %v11026_v24  ;;  %v7430_v53 = vsel %vm294_vm0, %v7414_v28, 0.0 }
 0xb60   : > { %v7381_v17 = vrot.slane %v7380_v60, 1  ;;  %v7386_v26 = vrot.slane %v7385_v51, 2  ;;  %v7416_v44 = vmul.f32 %v7400_v58, %v11034_v55  ;;  %v7417_v8 = vmul.f32 %v7401_v13, %v11038_v50 }
 0xb61   : > { %v9099_v48 = vpop.eup %9098  ;;  %9104 = vrcp.f32 %v7375_v59  ;;  %v7431_v24 = vsel %vm294_vm0, %v7415_v2, 0.0 }
 0xb62   : > { %v7402_v54 = vmul.f32 %v9099_v48, %v11206_v42  ;;  %v7403_v20 = vmul.f32 %v9099_v48, %v11208_v40  ;;  %v7382_v62 = vadd.f32 %v7381_v17, %v7380_v60  ;;  %v7387_v29 = vadd.f32 %v7386_v26, %v7385_v51 }
 0xb63   : > { %v7439_v55 = vsel %vm294_vm0, %v7416_v44, 0.0  ;;  %v7440_v50 = vsel %vm294_vm0, %v7417_v8, 0.0  ;;  %v7432_v46 = vadd.f32 %v7431_v24, %v7430_v53 }
 0xb64   : > { %v7418_v41 = vmul.f32 %v7402_v54, %v11044_v32  ;;  %v7419_v14 = vmul.f32 %v7403_v20, %v11052_v61  ;;  %9106 = vrcp.f32 %v7382_v62  ;;  %v7388_v37 = vrot.slane %v7387_v29, 1 }
 0xb65   : > { %v9101_v19 = vpop.eup %9100  ;;  %v7441_v35 = vadd.f32 %v7440_v50, %v7439_v55 }
 0xb66   : > { %v7404_v42 = vmul.f32 %v9101_v19, %v11212_v39  ;;  %v7405_v40 = vmul.f32 %v9101_v19, %v11214_v9  ;;  %v7448_v43 = vsel %vm294_vm0, %v7418_v41, 0.0  ;;  %v7449_v32 = vsel %vm294_vm0, %v7419_v14, 0.0 }
 0xb67   : > { %v7389_v61 = vadd.f32 %v7388_v37, %v7387_v29  ;;  %v7450_v11 = vadd.f32 %v7449_v32, %v7448_v43  ;;  %v7442_v3 = vrot.slane %v7441_v35, 4 }
 0xb68   : > { %v7420_v56 = vmul.f32 %v7404_v42, %v11058_v33  ;;  %v7421_v16 = vmul.f32 %v7405_v40, %v11062_v31  ;;  %v7433_v33 = vrot.slane %v7432_v46, 4 }
 0xb69   : > { %9108 = vrcp.f32 %v7389_v61  ;;  %v7451_v1 = vrot.slane %v7450_v11, 4  ;;  %v7443_v60 = vadd.f32 %v7442_v3, %v7441_v35 }
 0xb6a   : > { %v9103_v18 = vpop.eup %9102  ;;  %v7457_v39 = vsel %vm294_vm0, %v7420_v56, 0.0  ;;  %v7458_v9 = vsel %vm294_vm0, %v7421_v16, 0.0 }
 0xb6b   : > { %v7459_v47 = vadd.f32 %v7458_v9, %v7457_v39  ;;  %v7406_v25 = vmul.f32 %v9103_v18, %v11218_v38  ;;  %v7407_v52 = vmul.f32 %v9103_v18, %v11220_v7  ;;  %v7452_v17 = vadd.f32 %v7451_v1, %v7450_v11 }
 0xb6c   : > { %v7444_v28 = vrot.slane %v7443_v60, 2 }
 0xb6d   : > { %v7422_v12 = vmul.f32 %v7406_v25, %v11068_v45  ;;  %v7460_v31 = vrot.slane %v7459_v47, 4  ;;  %v7423_v34 = vmul.f32 %v7407_v52, %v11076_v0  ;;  %v7434_v45 = vadd.f32 %v7433_v33, %v7432_v46 }
 0xb6e   : > { %v9105_v21 = vpop.eup %9104  ;;  %v7453_v41 = vrot.slane %v7452_v17, 2  ;;  %v7445_v53 = vadd.f32 %v7444_v28, %v7443_v60 }
 0xb6f   : > { %v7466_v58 = vsel %vm294_vm0, %v7422_v12, 0.0  ;;  %v7408_v13 = vmul.f32 %v9105_v21, %v11224_v10  ;;  %v7467_v51 = vsel %vm294_vm0, %v7423_v34, 0.0  ;;  %v7409_v38 = vmul.f32 %v9105_v21, %v11226_v49 }
 0xb70   : > { %v7468_v15 = vadd.f32 %v7467_v51, %v7466_v58  ;;  %v7461_v26 = vadd.f32 %v7460_v31, %v7459_v47  ;;  %v7435_v29 = vrot.slane %v7434_v45, 2 }
 0xb71   : > { %v7424_v7 = vmul.f32 %v7408_v13, %v11082_v23  ;;  %v9107_v59 = vpop.eup %9106  ;;  %v7425_v48 = vmul.f32 %v7409_v38, %v11086_v27 }
 0xb72   : > { %v7469_v44 = vrot.slane %v7468_v15, 4  ;;  %v7410_v8 = vmul.f32 %v9107_v59, %v11230_v63  ;;  %v7411_v10 = vmul.f32 %v9107_v59, %v11232_v4  ;;  %v7462_v27 = vrot.slane %v7461_v26, 2 }
 0xb73   : > { %v7475_v0 = vsel %vm294_vm0, %v7424_v7, 0.0  ;;  %v7476_v54 = vsel %vm294_vm0, %v7425_v48, 0.0  ;;  %v7436_v43 = vadd.f32 %v7435_v29, %v7434_v45 }
 0xb74   : > { %v7470_v49 = vadd.f32 %v7469_v44, %v7468_v15  ;;  %v7477_v20 = vadd.f32 %v7476_v54, %v7475_v0  ;;  %v7426_v23 = vmul.f32 %v7410_v8, %v11092_v30  ;;  %v7427_v2 = vmul.f32 %v7411_v10, %v11100_v22 }
 0xb75   : > { %v7454_v22 = vadd.f32 %v7453_v41, %v7452_v17  ;;  %v7463_v32 = vadd.f32 %v7462_v27, %v7461_v26  ;;  %v7437_v39 = vrot.slane %v7436_v43, 1 }
 0xb76   : > { %v9109_v62 = vpop.eup %9108  ;;  %v7478_v14 = vrot.slane %v7477_v20, 4  ;;  %v7484_v19 = vsel %vm294_vm0, %v7426_v23, 0.0  ;;  %v7485_v63 = vsel %vm294_vm0, %v7427_v2, 0.0  ;;  %v7471_v37 = vrot.slane %v7470_v49, 2 }
 0xb77   : > { %v7412_v4 = vmul.f32 %v9109_v62, %v11236_v36  ;;  %v7486_v55 = vadd.f32 %v7485_v63, %v7484_v19  ;;  %v7413_v50 = vmul.f32 %v9109_v62, %v11238_v6  ;;  %v7446_v6 = vrot.slane %v7445_v53, 1 }
 0xb78   : > { %v7479_v42 = vadd.f32 %v7478_v14, %v7477_v20  ;;  %v7472_v56 = vadd.f32 %v7471_v37, %v7470_v49  ;;  %v7455_v11 = vrot.slane %v7454_v22, 1  ;;  %v7464_v9 = vrot.slane %v7463_v32, 1 }
 0xb79   : > { %v7428_v30 = vmul.f32 %v7412_v4, %v11111_v57  ;;  %v7429_v40 = vmul.f32 %v7413_v50, %v11114_v5  ;;  %v7487_v24 = vrot.slane %v7486_v55, 4  ;;  %v7447_v3 = vadd.f32 %v7446_v6, %v7445_v53 }
 0xb7a   : > { %v7480_v61 = vrot.slane %v7479_v42, 2  ;;  %v7473_v5 = vrot.slane %v7472_v56, 1  ;;  %v7456_v21 = vadd.f32 %v7455_v11, %v7454_v22  ;;  %v7438_v1 = vadd.f32 %v7437_v39, %v7436_v43 }
 0xb7b   : > { %v7493_v35 = vsel %vm294_vm0, %v7428_v30, 0.0  ;;  %v7494_v36 = vsel %vm294_vm0, %v7429_v40, 0.0  ;;  %v7488_v16 = vadd.f32 %v7487_v24, %v7486_v55  ;;  %v7465_v31 = vadd.f32 %v7464_v9, %v7463_v32 }
 0xb7c   : > { %v7481_v18 = vadd.f32 %v7480_v61, %v7479_v42  ;;  %v7495_v46 = vadd.f32 %v7494_v36, %v7493_v35  ;;  %v7474_v58 = vadd.f32 %v7473_v5, %v7472_v56  ;;  %v7511_v51 = vsel %vm7510_vm4, %v7447_v3, %v7438_v1 }
 0xb7d   : > { %v7489_v57 = vrot.slane %v7488_v16, 2  ;;  %v7513_v15 = vsel %vm7512_vm5, %v7456_v21, %v7511_v51 }
 0xb7e   : > { %v7496_v47 = vrot.slane %v7495_v46, 4  ;;  %v7482_v52 = vrot.slane %v7481_v18, 1  ;;  %v7515_v59 = vsel %vm7514_vm6, %v7465_v31, %v7513_v15 }
 0xb7f   : > { %v7490_v25 = vadd.f32 %v7489_v57, %v7488_v16  ;;  %v7517_v45 = vsel %vm7516_vm7, %v7474_v58, %v7515_v59 }
 0xb80   : > { %v7497_v12 = vadd.f32 %v7496_v47, %v7495_v46  ;;  %v7483_v13 = vadd.f32 %v7482_v52, %v7481_v18 }
 0xb81   : > { %v7491_v33 = vrot.slane %v7490_v25, 1 }
 0xb82   : > { %v7498_v34 = vrot.slane %v7497_v12, 2  ;;  %v7519_v26 = vsel %vm7518_vm8, %v7483_v13, %v7517_v45 }
 0xb83   : > { %v7492_v38 = vadd.f32 %v7491_v33, %v7490_v25 }
 0xb84   : > { %v7499_v60 = vadd.f32 %v7498_v34, %v7497_v12 }
 0xb85   : > { %v7521_v48 = vsel %vm7520_vm9, %v7492_v38, %v7519_v26 }
 0xb86   : > { %v7500_v7 = vrot.slane %v7499_v60, 1 }
 0xb88   : > { %v7501_v17 = vadd.f32 %v7500_v7, %v7499_v60 }
 0xb8a   : > { %v7523_v44 = vsel %vm7522_vm10, %v7501_v17, %v7521_v48 }
 0xb8b   : > { %7525 = vst.msk [vmem:[%s272_s13] sm:$0xff] %vm294_vm0, %v7523_v44 }
 0xb8c   : > { %9203 = shalt.err (!%p9200_p3)
}
 0xb8d   : > { %s9204_s6 = scalar_lea.hbm %s11295_s11, 128  ;;  %s9208_s26 = scalar_lea.hbm %s11338_s5, 256 }
 0xb8e   : > { %p9205_p11 = scmp.ne.s32.totalorder %s11295_s11, %s9204_s6  ;;  %p9209_p4 = scmp.lt.s32.totalorder %s11295_s11, %s11338_s5 }
 0xb8f   : > { %p9210_p6 = scmp.lt.s32.totalorder %s9208_s26, %s9204_s6 }
 0xb90   : > { %p9206_p9 = pnand %p9205_p11, %p11431_p2 }
 0xb91   : > { %p9211_p8 = por %p9210_p6, %p9209_p4 }
 0xb92   : > { %p9207_p1 = pneg %p9206_p9 }
 0xb94   : > { %p9212_p5 = pnand %p9211_p8, %p9207_p1 }
 0xb96   : > { %9215 = shalt.err (!%p9212_p5)
}
 0xb97   : > { %8701 = dma.vmem_to_hbm [thread:$0]  (%p11431_p2), %s7541_s14, 128, %s11295_s11, %s7527_s17  }
 0xb98 PF: > { %s7552_s12 = sand.u32 1, %s9246_s18   ;;  %p11432_p7 = scmp.ne.s32.totalorder %s11349_s25, 0 }
 0xb99   : > { %p11433_p12 = scmp.ge.s32.totalorder %s9258_s21, 2  ;;  %s7553_s13 = scalar_lea.sflag [#allocation4], %s7552_s12 }
 0xb9b   : > { %p8715_p13 = pnand %p11433_p12, %p11432_p7 }
 0xb9d   : > { %p8716_p0 = pneg %p8715_p13 }
 0xb9f   : > { %9241 = dma.done.wait (%p8716_p0), %s7553_s13, 128  }
 0xba0   : > { %9243 = vsyncadd (%p8716_p0), %s7553_s13, 4294967168  ;;  %p19_p10 = scmp.ge.s32.totalorder %s9388_s15, 4   ;;  %s11434_s18 = smov %s9250_s19 }
 0xba1   : > { %s11435_s19 = smov %s9254_s20  ;;  %s11436_s20 = smov %s9404_s27 }
 0xba2   : > { %s11437_s21 = smov %s9388_s15  ;;  %21 = sbr.rel (!%p19_p10) target bundleno = 6 (0x6), region = 93 }
 0xba7   :  { %7558 = vsyncpa [#allocation3], 1 }
 0xba8   :  { %7560 = vsyncpa [#allocation3 + $0x1], 1 }
 0xba9   :  { %7561 = vsyncpa [#allocation6], 1 }
 0xbaa   :  { %7562 = vsyncpa [#allocation4], 1 }
 0xbab   :  { %7564 = vsyncpa [#allocation4 + $0x1], 1 }

</bundles_post_ra>
